<compile_context>
chip_gen: v7x
topology: tpu7x:2x2x1
jax: 0.10.0
libtpu: 0.0.40
codegen_flags: <defaults>
</compile_context>

<pallas_src>
import functools

import jax
import jax.numpy as jnp
from jax import lax
from jax.experimental import pallas as pl
from jax.experimental.pallas import tpu as pltpu

BN_EPS = 1e-5
K = 4        # conv kernel size of conv1..conv4
STRIDE = 2
PAD = 1

# Operand dtype for the conv2..conv4 MXU ops (accumulation is always f32).
MXU_DTYPE = jnp.bfloat16


# ----------------------------------------------------------------------------
# Small integer helpers (shift/mask for power-of-two divisors: guaranteed to
# lower on the VPU; the demo config only uses power-of-two divisors).
# ----------------------------------------------------------------------------
def _div(x, d):
    if d & (d - 1) == 0:
        return x >> (d.bit_length() - 1)
    return x // d


def _mod(x, d):
    if d & (d - 1) == 0:
        return x & (d - 1)
    return x - _div(x, d) * d


# ----------------------------------------------------------------------------
# In-kernel construction of the constant 0/1 gather matrix (no HBM traffic).
#   (G @ A)[k*rows_pad + ro, c] = A[input row of tap k for output pixel ro, c]
# for a row-major activation matrix A = [n*h*w, C] with row = (b*h + y)*w + x.
# Out-of-bounds taps (zero padding) and rows ro >= n_valid are all-zero.
# ----------------------------------------------------------------------------
def _gather_matrix(n_img, h, w, rows_pad, n_valid, dtype):
    oh = (h + 2 * PAD - K) // STRIDE + 1
    ow = (w + 2 * PAD - K) // STRIDE + 1
    r_in = n_img * h * w
    rows16 = K * K * rows_pad

    # All per-row index math runs on a [rows16, 1] iota (a few hundred lanes of
    # VPU work); only the final compare/select touches the full matrix.
    r = lax.broadcasted_iota(jnp.int32, (rows16, 1), 0)
    k = _div(r, rows_pad)
    ro = _mod(r, rows_pad)
    kh = _div(k, K)
    kw = _mod(k, K)
    b = _div(ro, oh * ow)
    rem = _mod(ro, oh * ow)
    oy = _div(rem, ow)
    ox = _mod(rem, ow)
    y = STRIDE * oy + kh - PAD
    x = STRIDE * ox + kw - PAD
    tgt = (b * h + y) * w + x
    valid = (y >= 0) & (y < h) & (x >= 0) & (x < w) & (ro < n_valid)

    col = lax.broadcasted_iota(jnp.int32, (1, r_in), 1)
    hit = valid & (col == tgt)                       # broadcast -> [rows16, r_in]
    return jnp.where(hit, 1.0, 0.0).astype(dtype)


# ----------------------------------------------------------------------------
# The fused whole-network Pallas kernel
# ----------------------------------------------------------------------------
def _discriminator_kernel(p1_ref, w1_ref, w2_ref, w3_ref, w4_ref, wfc_ref,
                          pv_ref, o_ref, xr_ref, *, n, img):
    f32 = jnp.float32
    cd = w1_ref.shape[1]

    # ---- conv1 (no BN): wrapper-built im2col patches @ W1 + b1, ReLU (f32) --
    a = jnp.dot(p1_ref[...], w1_ref[...], preferred_element_type=f32)
    a = jnp.maximum(a + pv_ref[0:1, 0:cd], 0.0)             # [n*(img/2)^2, cd]

    def conv_bn_relu(a_in, w_ref, g_row, h, rows_pad, n_valid):
        c_in = a_in.shape[1]
        c_out = w_ref.shape[1]
        # (1) ONE MXU op: all 16 taps gathered with an in-kernel-built 0/1 matrix.
        g = _gather_matrix(n, h, h, rows_pad, n_valid, MXU_DTYPE)
        x = jnp.dot(g, a_in.astype(MXU_DTYPE), preferred_element_type=f32)
        x = x.astype(MXU_DTYPE)      # exact: every entry is a copied activation or 0
        # (2) tiny relayout [16*rows_pad, c_in] -> [rows_pad, 16*c_in] via VMEM
        #     scratch: 16 cheap static sub-tile stores, no extra matmuls.
        for k in range(K * K):
            xr_ref[0:rows_pad, k * c_in:(k + 1) * c_in] = (
                x[k * rows_pad:(k + 1) * rows_pad, :])
        xr = xr_ref[0:rows_pad, 0:K * K * c_in]
        # (3) ONE MXU op over the stacked contraction dim (16*c_in = 128/256/512).
        acc = jnp.dot(xr, w_ref[...], preferred_element_type=f32)
        # (4) training-mode BatchNorm over the n_valid real rows + ReLU (f32 VPU).
        #     The conv bias is skipped: it cancels exactly against the batch mean.
        #     Padded rows (conv4) are exact zeros so the sums are unaffected.
        gamma = pv_ref[g_row:g_row + 1, 0:c_out]
        beta = pv_ref[g_row + 1:g_row + 2, 0:c_out]
        inv_n = 1.0 / float(n_valid)
        mean = jnp.sum(acc, axis=0, keepdims=True) * inv_n
        msq = jnp.sum(acc * acc, axis=0, keepdims=True) * inv_n
        var = jnp.maximum(msq - mean * mean, 0.0)
        yv = (acc - mean) * lax.rsqrt(var + BN_EPS)
        return jnp.maximum(yv * gamma + beta, 0.0)

    h1, h2, h3 = img // 2, img // 4, img // 8
    a = conv_bn_relu(a, w2_ref, 1, h1, n * (h1 // 2) ** 2, n * (h1 // 2) ** 2)
    a = conv_bn_relu(a, w3_ref, 3, h2, n * (h2 // 2) ** 2, n * (h2 // 2) ** 2)
    a = conv_bn_relu(a, w4_ref, 5, h3, o_ref.shape[0], n)   # rows padded to >= 8

    # ---- fc (1x1 conv, Cout=1): lane-dense [8,128] store; column 0 = logit.
    # Rows >= n (and lanes > 0, which are exact zeros) are never consumed.
    o_ref[...] = (jnp.dot(a, wfc_ref[...], preferred_element_type=f32)
                  + pv_ref[7:8, :])


# ----------------------------------------------------------------------------
# Wrapper-side preparation (weight repacking done once, outside the hot path)
# ----------------------------------------------------------------------------
def _im2col_input(x):
    """NCHW network input -> conv1 patches [N*OH*OW, Cin*K*K] (cols = (c, kh, kw)).
    Only the tiny network input is rearranged here; all later layers gather
    their patches from VMEM-resident activations inside the kernel."""
    n, c, h, w = x.shape
    oh = (h + 2 * PAD - K) // STRIDE + 1
    ow = (w + 2 * PAD - K) // STRIDE + 1
    xp = jnp.pad(x, ((0, 0), (0, 0), (PAD, PAD), (PAD, PAD)))
    cols = [xp[:, :, kh:kh + STRIDE * (oh - 1) + 1:STRIDE,
                     kw:kw + STRIDE * (ow - 1) + 1:STRIDE]
            for kh in range(K) for kw in range(K)]            # 16 x [n, c, oh, ow]
    p = jnp.stack(cols, axis=2)                               # [n, c, 16, oh, ow]
    p = p.transpose(0, 3, 4, 1, 2).reshape(n * oh * ow, c * K * K)
    return p


def prepare_inputs(params):
    cd = params["conv1"]["w"].shape[0]
    assert 8 * cd <= 128, "packed param rows assume conv_dim * 8 <= 128"
    assert params["fc"]["w"].shape[-1] == 1, "kernel assumes image_size == 16 (1x1 fc)"

    def w_stack(w):        # [Cout, Cin, 4, 4] -> [16*Cin, Cout], row = (kh*4+kw)*Cin + c
        co, ci = w.shape[0], w.shape[1]
        return jnp.transpose(w, (2, 3, 1, 0)).reshape(K * K * ci, co).astype(MXU_DTYPE)

    wfc = params["fc"]["w"].reshape(1, -1).T                  # [8cd, 1]
    wfc_p = jnp.zeros((wfc.shape[0], 128), jnp.float32).at[:, :1].set(wfc)

    pv = jnp.zeros((8, 128), jnp.float32)                     # packed small params
    pv = pv.at[0, :cd].set(params["conv1"]["b"])
    pv = pv.at[1, :2 * cd].set(params["conv2"]["gamma"])
    pv = pv.at[2, :2 * cd].set(params["conv2"]["beta"])
    pv = pv.at[3, :4 * cd].set(params["conv3"]["gamma"])
    pv = pv.at[4, :4 * cd].set(params["conv3"]["beta"])
    pv = pv.at[5, :8 * cd].set(params["conv4"]["gamma"])
    pv = pv.at[6, :8 * cd].set(params["conv4"]["beta"])
    pv = pv.at[7, 0].set(params["fc"]["b"][0])
    # conv2..conv4 biases are intentionally dropped: BatchNorm cancels them exactly.

    return {
        "w1m": params["conv1"]["w"].reshape(cd, -1).T,        # [3*16, cd] f32
        "w2s": w_stack(params["conv2"]["w"]),                 # [16*cd,  2cd] bf16
        "w3s": w_stack(params["conv3"]["w"]),                 # [16*2cd, 4cd] bf16
        "w4s": w_stack(params["conv4"]["w"]),                 # [16*4cd, 8cd] bf16
        "wfc": wfc_p,                                         # [8cd, 128] f32
        "pv": pv,                                             # [8, 128]  f32
    }


def discriminator_forward(prep, x):
    n, _, img, _ = x.shape
    cd = prep["w1m"].shape[1]
    patches1 = _im2col_input(x)                               # [n*(img/2)^2, 3*16]
    r4p = max(8, ((n + 7) // 8) * 8)                          # conv4 rows padded to >=8
    rows_scr = max(n * (img // 4) ** 2, r4p)                  # relayout scratch extents
    cols_scr = K * K * 4 * cd
    kern = functools.partial(_discriminator_kernel, n=n, img=img)
    out = pl.pallas_call(
        kern,
        out_shape=jax.ShapeDtypeStruct((r4p, 128), jnp.float32),
        scratch_shapes=[pltpu.VMEM((rows_scr, cols_scr), MXU_DTYPE)],
        # no grid: single invocation, everything (a few hundred KiB) VMEM-resident
    )(patches1, prep["w1m"], prep["w2s"], prep["w3s"], prep["w4s"],
      prep["wfc"], prep["pv"])
    return out[:n, 0]                                         # == fc(...).squeeze()


# ----------------------------------------------------------------------------
# Parameters + pure-JAX references (numerical sanity checks)
# ----------------------------------------------------------------------------
def init_params(key, image_size=16, conv_dim=8):
    def conv_params(key, c_in, c_out, k, bn):
        kw, kb = jax.random.split(key)
        return {
            "w": 0.05 * jax.random.normal(kw, (c_out, c_in, k, k), jnp.float32),
            "b": 0.01 * jax.random.normal(kb, (c_out,), jnp.float32),
            "gamma": jnp.ones((c_out,), jnp.float32),
            "beta": jnp.zeros((c_out,), jnp.float32),
            "bn": bn,
        }

    keys = jax.random.split(key, 5)
    return {
        "conv1": conv_params(keys[0], 3, conv_dim, 4, bn=False),
        "conv2": conv_params(keys[1], conv_dim, conv_dim * 2, 4, bn=True),
        "conv3": conv_params(keys[2], conv_dim * 2, conv_dim * 4, 4, bn=True),
        "conv4": conv_params(keys[3], conv_dim * 4, conv_dim * 8, 4, bn=True),
        "fc": conv_params(keys[4], conv_dim * 8, 1, image_size // 16, bn=False),
    }


def _ref_forward(params, x, mxu_dtype=jnp.float32):
    """Pure-JAX reference.  With mxu_dtype=bfloat16 the conv2..conv4 MXU operands
    are rounded exactly like the kernel's (accumulation stays f32 in both)."""
    def conv(x, p, stride, pad, cast):
        w = p["w"]
        if cast:
            x = x.astype(mxu_dtype).astype(jnp.float32)
            w = w.astype(mxu_dtype).astype(jnp.float32)
        y = lax.conv_general_dilated(
            x, w, (stride, stride), [(pad, pad), (pad, pad)],
            dimension_numbers=("NCHW", "OIHW", "NCHW"),
            precision=lax.Precision.HIGHEST)
        y = y + p["b"].reshape(1, -1, 1, 1)
        if p["bn"]:
            mean = jnp.mean(y, axis=(0, 2, 3), keepdims=True)
            var = jnp.mean(jnp.square(y - mean), axis=(0, 2, 3), keepdims=True)
            y = (y - mean) * lax.rsqrt(var + BN_EPS)
            y = y * p["gamma"].reshape(1, -1, 1, 1) + p["beta"].reshape(1, -1, 1, 1)
        return y

    out = jax.nn.relu(conv(x, params["conv1"], 2, 1, cast=False))
    out = jax.nn.relu(conv(out, params["conv2"], 2, 1, cast=True))
    out = jax.nn.relu(conv(out, params["conv3"], 2, 1, cast=True))
    out = jax.nn.relu(conv(out, params["conv4"], 2, 1, cast=True))
    out = conv(out, params["fc"], 1, 0, cast=False)
    return jnp.squeeze(out)


if __name__ == "__main__":
    image_size, conv_dim, batch = 16, 8, 2
    kp, kx = jax.random.split(jax.random.PRNGKey(0))
    params = init_params(kp, image_size, conv_dim)
    x = jax.random.normal(kx, (batch, 3, image_size, image_size), jnp.float32)

    prep = prepare_inputs(params)
    fwd = jax.jit(discriminator_forward)
    out = jax.block_until_ready(fwd(prep, x))
    assert out.shape == (batch,), out.shape

    # (1) tight check vs a reference that rounds conv2..conv4 MXU operands to
    #     bf16 exactly like the kernel (f32 accumulation in both).
    ref_bf16 = _ref_forward(params, x, mxu_dtype=MXU_DTYPE)
    assert jnp.allclose(out, ref_bf16, atol=2e-3, rtol=2e-3), (out, ref_bf16)
    # (2) ballpark check vs the pure-f32 reference (differences are only the
    #     bf16 rounding of conv2..conv4 MXU operands).
    ref_f32 = _ref_forward(params, x, mxu_dtype=jnp.float32)
    assert jnp.allclose(out, ref_f32, atol=5e-2, rtol=5e-2), (out, ref_f32)
    print("KERNEL_OK")
</pallas_src>

<mosaic_0001>
module attributes {stable_mosaic.version = 11 : i64} {
  func.func @_discriminator_kernel(%arg0: memref<128x48xf32, #tpu.memory_space<vmem>>, %arg1: memref<48x8xf32, #tpu.memory_space<vmem>>, %arg2: memref<128x16xbf16, #tpu.memory_space<vmem>>, %arg3: memref<256x32xbf16, #tpu.memory_space<vmem>>, %arg4: memref<512x64xbf16, #tpu.memory_space<vmem>>, %arg5: memref<64x128xf32, #tpu.memory_space<vmem>>, %arg6: memref<8x128xf32, #tpu.memory_space<vmem>>, %arg7: memref<8x128xf32, #tpu.memory_space<vmem>>, %arg8: memref<32x512xbf16, #tpu.memory_space<vmem>>) attributes {dimension_semantics = [], scalar_prefetch = 0 : i64, scratch_operands = 1 : i64, tpu.core_type = #tpu.core_type<tc>} {
    %c0 = arith.constant 0 : index
    %c0_0 = arith.constant 0 : index
    %0 = vector.load %arg0[%c0, %c0_0] : memref<128x48xf32, #tpu.memory_space<vmem>>, vector<128x48xf32>
    %c0_1 = arith.constant 0 : index
    %c0_2 = arith.constant 0 : index
    %1 = vector.load %arg1[%c0_1, %c0_2] : memref<48x8xf32, #tpu.memory_space<vmem>>, vector<48x8xf32>
    %cst = arith.constant dense<0.000000e+00> : vector<128x8xf32>
    %2 = tpu.matmul %0, %1, %cst {dimension_numbers = #tpu.dot_dimension_numbers<[1], [0], [0], [1], [0, 0, 1, 1], [], []>} : vector<128x48xf32>, vector<48x8xf32>, vector<128x8xf32> -> vector<128x8xf32>
    %c0_3 = arith.constant 0 : index
    %c0_4 = arith.constant 0 : index
    %3 = vector.load %arg6[%c0_3, %c0_4] : memref<8x128xf32, #tpu.memory_space<vmem>>, vector<1x8xf32>
    %4 = vector.broadcast %3 : vector<1x8xf32> to vector<128x8xf32>
    %5 = arith.addf %2, %4 : vector<128x8xf32>
    %cst_5 = arith.constant 0.000000e+00 : f32
    %6 = vector.broadcast %cst_5 : f32 to vector<128x8xf32>
    %7 = arith.maximumf %5, %6 : vector<128x8xf32>
    %8 = tpu.iota {dimensions = array<i32: 0>} : vector<512x1xi32>
    %c5_i32 = arith.constant 5 : i32
    %9 = vector.broadcast %c5_i32 : i32 to vector<512x1xi32>
    %10 = arith.shrsi %8, %9 : vector<512x1xi32>
    %c31_i32 = arith.constant 31 : i32
    %11 = vector.broadcast %c31_i32 : i32 to vector<512x1xi32>
    %12 = arith.andi %8, %11 : vector<512x1xi32>
    %c2_i32 = arith.constant 2 : i32
    %13 = vector.broadcast %c2_i32 : i32 to vector<512x1xi32>
    %14 = arith.shrsi %10, %13 : vector<512x1xi32>
    %c3_i32 = arith.constant 3 : i32
    %15 = vector.broadcast %c3_i32 : i32 to vector<512x1xi32>
    %16 = arith.andi %10, %15 : vector<512x1xi32>
    %c4_i32 = arith.constant 4 : i32
    %17 = vector.broadcast %c4_i32 : i32 to vector<512x1xi32>
    %18 = arith.shrsi %12, %17 : vector<512x1xi32>
    %c15_i32 = arith.constant 15 : i32
    %19 = vector.broadcast %c15_i32 : i32 to vector<512x1xi32>
    %20 = arith.andi %12, %19 : vector<512x1xi32>
    %c2_i32_6 = arith.constant 2 : i32
    %21 = vector.broadcast %c2_i32_6 : i32 to vector<512x1xi32>
    %22 = arith.shrsi %20, %21 : vector<512x1xi32>
    %c3_i32_7 = arith.constant 3 : i32
    %23 = vector.broadcast %c3_i32_7 : i32 to vector<512x1xi32>
    %24 = arith.andi %20, %23 : vector<512x1xi32>
    %c2_i32_8 = arith.constant 2 : i32
    %25 = vector.broadcast %c2_i32_8 : i32 to vector<512x1xi32>
    %26 = arith.muli %25, %22 : vector<512x1xi32>
    %27 = arith.addi %26, %14 : vector<512x1xi32>
    %c1_i32 = arith.constant 1 : i32
    %28 = vector.broadcast %c1_i32 : i32 to vector<512x1xi32>
    %29 = arith.subi %27, %28 : vector<512x1xi32>
    %c2_i32_9 = arith.constant 2 : i32
    %30 = vector.broadcast %c2_i32_9 : i32 to vector<512x1xi32>
    %31 = arith.muli %30, %24 : vector<512x1xi32>
    %32 = arith.addi %31, %16 : vector<512x1xi32>
    %c1_i32_10 = arith.constant 1 : i32
    %33 = vector.broadcast %c1_i32_10 : i32 to vector<512x1xi32>
    %34 = arith.subi %32, %33 : vector<512x1xi32>
    %c8_i32 = arith.constant 8 : i32
    %35 = vector.broadcast %c8_i32 : i32 to vector<512x1xi32>
    %36 = arith.muli %18, %35 : vector<512x1xi32>
    %37 = arith.addi %36, %29 : vector<512x1xi32>
    %c8_i32_11 = arith.constant 8 : i32
    %38 = vector.broadcast %c8_i32_11 : i32 to vector<512x1xi32>
    %39 = arith.muli %37, %38 : vector<512x1xi32>
    %40 = arith.addi %39, %34 : vector<512x1xi32>
    %c0_i32 = arith.constant 0 : i32
    %41 = vector.broadcast %c0_i32 : i32 to vector<512x1xi32>
    %42 = arith.cmpi sge, %29, %41 : vector<512x1xi32>
    %c8_i32_12 = arith.constant 8 : i32
    %43 = vector.broadcast %c8_i32_12 : i32 to vector<512x1xi32>
    %44 = arith.cmpi slt, %29, %43 : vector<512x1xi32>
    %45 = arith.andi %42, %44 : vector<512x1xi1>
    %c0_i32_13 = arith.constant 0 : i32
    %46 = vector.broadcast %c0_i32_13 : i32 to vector<512x1xi32>
    %47 = arith.cmpi sge, %34, %46 : vector<512x1xi32>
    %48 = arith.andi %45, %47 : vector<512x1xi1>
    %c8_i32_14 = arith.constant 8 : i32
    %49 = vector.broadcast %c8_i32_14 : i32 to vector<512x1xi32>
    %50 = arith.cmpi slt, %34, %49 : vector<512x1xi32>
    %51 = arith.andi %48, %50 : vector<512x1xi1>
    %c32_i32 = arith.constant 32 : i32
    %52 = vector.broadcast %c32_i32 : i32 to vector<512x1xi32>
    %53 = arith.cmpi slt, %12, %52 : vector<512x1xi32>
    %54 = arith.andi %51, %53 : vector<512x1xi1>
    %55 = tpu.iota {dimensions = array<i32: 1>} : vector<1x128xi32>
    %56 = vector.broadcast %55 : vector<1x128xi32> to vector<512x128xi32>
    %57 = vector.broadcast %40 : vector<512x1xi32> to vector<512x128xi32>
    %58 = arith.cmpi eq, %56, %57 : vector<512x128xi32>
    %59 = vector.broadcast %54 : vector<512x1xi1> to vector<512x128xi1>
    %60 = arith.andi %59, %58 : vector<512x128xi1>
    %cst_15 = arith.constant 1.000000e+00 : f32
    %cst_16 = arith.constant 0.000000e+00 : f32
    %61 = vector.broadcast %cst_15 : f32 to vector<512x128xf32>
    %62 = vector.broadcast %cst_16 : f32 to vector<512x128xf32>
    %63 = arith.select %60, %61, %62 : vector<512x128xi1>, vector<512x128xf32>
    %64 = arith.truncf %63 : vector<512x128xf32> to vector<512x128xbf16>
    %65 = arith.truncf %7 : vector<128x8xf32> to vector<128x8xbf16>
    %cst_17 = arith.constant dense<0.000000e+00> : vector<512x8xf32>
    %66 = tpu.matmul %64, %65, %cst_17 {dimension_numbers = #tpu.dot_dimension_numbers<[1], [0], [0], [1], [0, 0, 1, 1], [], []>} : vector<512x128xbf16>, vector<128x8xbf16>, vector<512x8xf32> -> vector<512x8xf32>
    %67 = arith.truncf %66 : vector<512x8xf32> to vector<512x8xbf16>
    %68 = vector.extract_strided_slice %67 {offsets = [0, 0], sizes = [32, 8], strides = [1, 1]} : vector<512x8xbf16> to vector<32x8xbf16>
    %c0_18 = arith.constant 0 : index
    %c0_19 = arith.constant 0 : index
    %69 = vector.load %arg8[%c0_18, %c0_19] : memref<32x512xbf16, #tpu.memory_space<vmem>>, vector<32x8xbf16>
    tpu.vector_store %arg8[%c0_18, %c0_19], %68 {strides = array<i32>} : memref<32x512xbf16, #tpu.memory_space<vmem>>, vector<32x8xbf16>,
    %70 = vector.extract_strided_slice %67 {offsets = [32, 0], sizes = [32, 8], strides = [1, 1]} : vector<512x8xbf16> to vector<32x8xbf16>
    %c0_20 = arith.constant 0 : index
    %c8 = arith.constant 8 : index
    %71 = vector.load %arg8[%c0_20, %c8] : memref<32x512xbf16, #tpu.memory_space<vmem>>, vector<32x8xbf16>
    tpu.vector_store %arg8[%c0_20, %c8], %70 {strides = array<i32>} : memref<32x512xbf16, #tpu.memory_space<vmem>>, vector<32x8xbf16>,
    %72 = vector.extract_strided_slice %67 {offsets = [64, 0], sizes = [32, 8], strides = [1, 1]} : vector<512x8xbf16> to vector<32x8xbf16>
    %c0_21 = arith.constant 0 : index
    %c16 = arith.constant 16 : index
    %73 = vector.load %arg8[%c0_21, %c16] : memref<32x512xbf16, #tpu.memory_space<vmem>>, vector<32x8xbf16>
    tpu.vector_store %arg8[%c0_21, %c16], %72 {strides = array<i32>} : memref<32x512xbf16, #tpu.memory_space<vmem>>, vector<32x8xbf16>,
    %74 = vector.extract_strided_slice %67 {offsets = [96, 0], sizes = [32, 8], strides = [1, 1]} : vector<512x8xbf16> to vector<32x8xbf16>
    %c0_22 = arith.constant 0 : index
    %c24 = arith.constant 24 : index
    %75 = vector.load %arg8[%c0_22, %c24] : memref<32x512xbf16, #tpu.memory_space<vmem>>, vector<32x8xbf16>
    tpu.vector_store %arg8[%c0_22, %c24], %74 {strides = array<i32>} : memref<32x512xbf16, #tpu.memory_space<vmem>>, vector<32x8xbf16>,
    %76 = vector.extract_strided_slice %67 {offsets = [128, 0], sizes = [32, 8], strides = [1, 1]} : vector<512x8xbf16> to vector<32x8xbf16>
    %c0_23 = arith.constant 0 : index
    %c32 = arith.constant 32 : index
    %77 = vector.load %arg8[%c0_23, %c32] : memref<32x512xbf16, #tpu.memory_space<vmem>>, vector<32x8xbf16>
    tpu.vector_store %arg8[%c0_23, %c32], %76 {strides = array<i32>} : memref<32x512xbf16, #tpu.memory_space<vmem>>, vector<32x8xbf16>,
    %78 = vector.extract_strided_slice %67 {offsets = [160, 0], sizes = [32, 8], strides = [1, 1]} : vector<512x8xbf16> to vector<32x8xbf16>
    %c0_24 = arith.constant 0 : index
    %c40 = arith.constant 40 : index
    %79 = vector.load %arg8[%c0_24, %c40] : memref<32x512xbf16, #tpu.memory_space<vmem>>, vector<32x8xbf16>
    tpu.vector_store %arg8[%c0_24, %c40], %78 {strides = array<i32>} : memref<32x512xbf16, #tpu.memory_space<vmem>>, vector<32x8xbf16>,
    %80 = vector.extract_strided_slice %67 {offsets = [192, 0], sizes = [32, 8], strides = [1, 1]} : vector<512x8xbf16> to vector<32x8xbf16>
    %c0_25 = arith.constant 0 : index
    %c48 = arith.constant 48 : index
    %81 = vector.load %arg8[%c0_25, %c48] : memref<32x512xbf16, #tpu.memory_space<vmem>>, vector<32x8xbf16>
    tpu.vector_store %arg8[%c0_25, %c48], %80 {strides = array<i32>} : memref<32x512xbf16, #tpu.memory_space<vmem>>, vector<32x8xbf16>,
    %82 = vector.extract_strided_slice %67 {offsets = [224, 0], sizes = [32, 8], strides = [1, 1]} : vector<512x8xbf16> to vector<32x8xbf16>
    %c0_26 = arith.constant 0 : index
    %c56 = arith.constant 56 : index
    %83 = vector.load %arg8[%c0_26, %c56] : memref<32x512xbf16, #tpu.memory_space<vmem>>, vector<32x8xbf16>
    tpu.vector_store %arg8[%c0_26, %c56], %82 {strides = array<i32>} : memref<32x512xbf16, #tpu.memory_space<vmem>>, vector<32x8xbf16>,
    %84 = vector.extract_strided_slice %67 {offsets = [256, 0], sizes = [32, 8], strides = [1, 1]} : vector<512x8xbf16> to vector<32x8xbf16>
    %c0_27 = arith.constant 0 : index
    %c64 = arith.constant 64 : index
    %85 = vector.load %arg8[%c0_27, %c64] : memref<32x512xbf16, #tpu.memory_space<vmem>>, vector<32x8xbf16>
    tpu.vector_store %arg8[%c0_27, %c64], %84 {strides = array<i32>} : memref<32x512xbf16, #tpu.memory_space<vmem>>, vector<32x8xbf16>,
    %86 = vector.extract_strided_slice %67 {offsets = [288, 0], sizes = [32, 8], strides = [1, 1]} : vector<512x8xbf16> to vector<32x8xbf16>
    %c0_28 = arith.constant 0 : index
    %c72 = arith.constant 72 : index
    %87 = vector.load %arg8[%c0_28, %c72] : memref<32x512xbf16, #tpu.memory_space<vmem>>, vector<32x8xbf16>
    tpu.vector_store %arg8[%c0_28, %c72], %86 {strides = array<i32>} : memref<32x512xbf16, #tpu.memory_space<vmem>>, vector<32x8xbf16>,
    %88 = vector.extract_strided_slice %67 {offsets = [320, 0], sizes = [32, 8], strides = [1, 1]} : vector<512x8xbf16> to vector<32x8xbf16>
    %c0_29 = arith.constant 0 : index
    %c80 = arith.constant 80 : index
    %89 = vector.load %arg8[%c0_29, %c80] : memref<32x512xbf16, #tpu.memory_space<vmem>>, vector<32x8xbf16>
    tpu.vector_store %arg8[%c0_29, %c80], %88 {strides = array<i32>} : memref<32x512xbf16, #tpu.memory_space<vmem>>, vector<32x8xbf16>,
    %90 = vector.extract_strided_slice %67 {offsets = [352, 0], sizes = [32, 8], strides = [1, 1]} : vector<512x8xbf16> to vector<32x8xbf16>
    %c0_30 = arith.constant 0 : index
    %c88 = arith.constant 88 : index
    %91 = vector.load %arg8[%c0_30, %c88] : memref<32x512xbf16, #tpu.memory_space<vmem>>, vector<32x8xbf16>
    tpu.vector_store %arg8[%c0_30, %c88], %90 {strides = array<i32>} : memref<32x512xbf16, #tpu.memory_space<vmem>>, vector<32x8xbf16>,
    %92 = vector.extract_strided_slice %67 {offsets = [384, 0], sizes = [32, 8], strides = [1, 1]} : vector<512x8xbf16> to vector<32x8xbf16>
    %c0_31 = arith.constant 0 : index
    %c96 = arith.constant 96 : index
    %93 = vector.load %arg8[%c0_31, %c96] : memref<32x512xbf16, #tpu.memory_space<vmem>>, vector<32x8xbf16>
    tpu.vector_store %arg8[%c0_31, %c96], %92 {strides = array<i32>} : memref<32x512xbf16, #tpu.memory_space<vmem>>, vector<32x8xbf16>,
    %94 = vector.extract_strided_slice %67 {offsets = [416, 0], sizes = [32, 8], strides = [1, 1]} : vector<512x8xbf16> to vector<32x8xbf16>
    %c0_32 = arith.constant 0 : index
    %c104 = arith.constant 104 : index
    %95 = vector.load %arg8[%c0_32, %c104] : memref<32x512xbf16, #tpu.memory_space<vmem>>, vector<32x8xbf16>
    tpu.vector_store %arg8[%c0_32, %c104], %94 {strides = array<i32>} : memref<32x512xbf16, #tpu.memory_space<vmem>>, vector<32x8xbf16>,
    %96 = vector.extract_strided_slice %67 {offsets = [448, 0], sizes = [32, 8], strides = [1, 1]} : vector<512x8xbf16> to vector<32x8xbf16>
    %c0_33 = arith.constant 0 : index
    %c112 = arith.constant 112 : index
    %97 = vector.load %arg8[%c0_33, %c112] : memref<32x512xbf16, #tpu.memory_space<vmem>>, vector<32x8xbf16>
    tpu.vector_store %arg8[%c0_33, %c112], %96 {strides = array<i32>} : memref<32x512xbf16, #tpu.memory_space<vmem>>, vector<32x8xbf16>,
    %98 = vector.extract_strided_slice %67 {offsets = [480, 0], sizes = [32, 8], strides = [1, 1]} : vector<512x8xbf16> to vector<32x8xbf16>
    %c0_34 = arith.constant 0 : index
    %c120 = arith.constant 120 : index
    %99 = vector.load %arg8[%c0_34, %c120] : memref<32x512xbf16, #tpu.memory_space<vmem>>, vector<32x8xbf16>
    tpu.vector_store %arg8[%c0_34, %c120], %98 {strides = array<i32>} : memref<32x512xbf16, #tpu.memory_space<vmem>>, vector<32x8xbf16>,
    %c0_35 = arith.constant 0 : index
    %c0_36 = arith.constant 0 : index
    %100 = vector.load %arg8[%c0_35, %c0_36] : memref<32x512xbf16, #tpu.memory_space<vmem>>, vector<32x128xbf16>
    %c0_37 = arith.constant 0 : index
    %c0_38 = arith.constant 0 : index
    %101 = vector.load %arg2[%c0_37, %c0_38] : memref<128x16xbf16, #tpu.memory_space<vmem>>, vector<128x16xbf16>
    %cst_39 = arith.constant dense<0.000000e+00> : vector<32x16xf32>
    %102 = tpu.matmul %100, %101, %cst_39 {dimension_numbers = #tpu.dot_dimension_numbers<[1], [0], [0], [1], [0, 0, 1, 1], [], []>} : vector<32x128xbf16>, vector<128x16xbf16>, vector<32x16xf32> -> vector<32x16xf32>
    %c1 = arith.constant 1 : index
    %c0_40 = arith.constant 0 : index
    %103 = vector.load %arg6[%c1, %c0_40] : memref<8x128xf32, #tpu.memory_space<vmem>>, vector<1x16xf32>
    %c2 = arith.constant 2 : index
    %c0_41 = arith.constant 0 : index
    %104 = vector.load %arg6[%c2, %c0_41] : memref<8x128xf32, #tpu.memory_space<vmem>>, vector<1x16xf32>
    %cst_42 = arith.constant dense<0.000000e+00> : vector<16xf32>
    %105 = vector.multi_reduction <add>, %102, %cst_42 [0] : vector<32x16xf32> to vector<16xf32>
    %106 = vector.shape_cast %105 : vector<16xf32> to vector<1x16xf32>
    %cst_43 = arith.constant 3.125000e-02 : f32
    %107 = vector.broadcast %cst_43 : f32 to vector<1x16xf32>
    %108 = arith.mulf %106, %107 : vector<1x16xf32>
    %109 = arith.mulf %102, %102 : vector<32x16xf32>
    %cst_44 = arith.constant dense<0.000000e+00> : vector<16xf32>
    %110 = vector.multi_reduction <add>, %109, %cst_44 [0] : vector<32x16xf32> to vector<16xf32>
    %111 = vector.shape_cast %110 : vector<16xf32> to vector<1x16xf32>
    %cst_45 = arith.constant 3.125000e-02 : f32
    %112 = vector.broadcast %cst_45 : f32 to vector<1x16xf32>
    %113 = arith.mulf %111, %112 : vector<1x16xf32>
    %114 = arith.mulf %108, %108 : vector<1x16xf32>
    %115 = arith.subf %113, %114 : vector<1x16xf32>
    %cst_46 = arith.constant 0.000000e+00 : f32
    %116 = vector.broadcast %cst_46 : f32 to vector<1x16xf32>
    %117 = arith.maximumf %115, %116 : vector<1x16xf32>
    %118 = vector.broadcast %108 : vector<1x16xf32> to vector<32x16xf32>
    %119 = arith.subf %102, %118 : vector<32x16xf32>
    %cst_47 = arith.constant 9.99999974E-6 : f32
    %120 = vector.broadcast %cst_47 : f32 to vector<1x16xf32>
    %121 = arith.addf %117, %120 : vector<1x16xf32>
    %122 = math.rsqrt %121 : vector<1x16xf32>
    %123 = vector.broadcast %122 : vector<1x16xf32> to vector<32x16xf32>
    %124 = arith.mulf %119, %123 : vector<32x16xf32>
    %125 = vector.broadcast %103 : vector<1x16xf32> to vector<32x16xf32>
    %126 = arith.mulf %124, %125 : vector<32x16xf32>
    %127 = vector.broadcast %104 : vector<1x16xf32> to vector<32x16xf32>
    %128 = arith.addf %126, %127 : vector<32x16xf32>
    %cst_48 = arith.constant 0.000000e+00 : f32
    %129 = vector.broadcast %cst_48 : f32 to vector<32x16xf32>
    %130 = arith.maximumf %128, %129 : vector<32x16xf32>
    %131 = tpu.iota {dimensions = array<i32: 0>} : vector<128x1xi32>
    %c3_i32_49 = arith.constant 3 : i32
    %132 = vector.broadcast %c3_i32_49 : i32 to vector<128x1xi32>
    %133 = arith.shrsi %131, %132 : vector<128x1xi32>
    %c7_i32 = arith.constant 7 : i32
    %134 = vector.broadcast %c7_i32 : i32 to vector<128x1xi32>
    %135 = arith.andi %131, %134 : vector<128x1xi32>
    %c2_i32_50 = arith.constant 2 : i32
    %136 = vector.broadcast %c2_i32_50 : i32 to vector<128x1xi32>
    %137 = arith.shrsi %133, %136 : vector<128x1xi32>
    %c3_i32_51 = arith.constant 3 : i32
    %138 = vector.broadcast %c3_i32_51 : i32 to vector<128x1xi32>
    %139 = arith.andi %133, %138 : vector<128x1xi32>
    %c2_i32_52 = arith.constant 2 : i32
    %140 = vector.broadcast %c2_i32_52 : i32 to vector<128x1xi32>
    %141 = arith.shrsi %135, %140 : vector<128x1xi32>
    %c3_i32_53 = arith.constant 3 : i32
    %142 = vector.broadcast %c3_i32_53 : i32 to vector<128x1xi32>
    %143 = arith.andi %135, %142 : vector<128x1xi32>
    %c1_i32_54 = arith.constant 1 : i32
    %144 = vector.broadcast %c1_i32_54 : i32 to vector<128x1xi32>
    %145 = arith.shrsi %143, %144 : vector<128x1xi32>
    %c1_i32_55 = arith.constant 1 : i32
    %146 = vector.broadcast %c1_i32_55 : i32 to vector<128x1xi32>
    %147 = arith.andi %143, %146 : vector<128x1xi32>
    %c2_i32_56 = arith.constant 2 : i32
    %148 = vector.broadcast %c2_i32_56 : i32 to vector<128x1xi32>
    %149 = arith.muli %148, %145 : vector<128x1xi32>
    %150 = arith.addi %149, %137 : vector<128x1xi32>
    %c1_i32_57 = arith.constant 1 : i32
    %151 = vector.broadcast %c1_i32_57 : i32 to vector<128x1xi32>
    %152 = arith.subi %150, %151 : vector<128x1xi32>
    %c2_i32_58 = arith.constant 2 : i32
    %153 = vector.broadcast %c2_i32_58 : i32 to vector<128x1xi32>
    %154 = arith.muli %153, %147 : vector<128x1xi32>
    %155 = arith.addi %154, %139 : vector<128x1xi32>
    %c1_i32_59 = arith.constant 1 : i32
    %156 = vector.broadcast %c1_i32_59 : i32 to vector<128x1xi32>
    %157 = arith.subi %155, %156 : vector<128x1xi32>
    %c4_i32_60 = arith.constant 4 : i32
    %158 = vector.broadcast %c4_i32_60 : i32 to vector<128x1xi32>
    %159 = arith.muli %141, %158 : vector<128x1xi32>
    %160 = arith.addi %159, %152 : vector<128x1xi32>
    %c4_i32_61 = arith.constant 4 : i32
    %161 = vector.broadcast %c4_i32_61 : i32 to vector<128x1xi32>
    %162 = arith.muli %160, %161 : vector<128x1xi32>
    %163 = arith.addi %162, %157 : vector<128x1xi32>
    %c0_i32_62 = arith.constant 0 : i32
    %164 = vector.broadcast %c0_i32_62 : i32 to vector<128x1xi32>
    %165 = arith.cmpi sge, %152, %164 : vector<128x1xi32>
    %c4_i32_63 = arith.constant 4 : i32
    %166 = vector.broadcast %c4_i32_63 : i32 to vector<128x1xi32>
    %167 = arith.cmpi slt, %152, %166 : vector<128x1xi32>
    %168 = arith.andi %165, %167 : vector<128x1xi1>
    %c0_i32_64 = arith.constant 0 : i32
    %169 = vector.broadcast %c0_i32_64 : i32 to vector<128x1xi32>
    %170 = arith.cmpi sge, %157, %169 : vector<128x1xi32>
    %171 = arith.andi %168, %170 : vector<128x1xi1>
    %c4_i32_65 = arith.constant 4 : i32
    %172 = vector.broadcast %c4_i32_65 : i32 to vector<128x1xi32>
    %173 = arith.cmpi slt, %157, %172 : vector<128x1xi32>
    %174 = arith.andi %171, %173 : vector<128x1xi1>
    %c8_i32_66 = arith.constant 8 : i32
    %175 = vector.broadcast %c8_i32_66 : i32 to vector<128x1xi32>
    %176 = arith.cmpi slt, %135, %175 : vector<128x1xi32>
    %177 = arith.andi %174, %176 : vector<128x1xi1>
    %178 = tpu.iota {dimensions = array<i32: 1>} : vector<1x32xi32>
    %179 = vector.broadcast %178 : vector<1x32xi32> to vector<128x32xi32>
    %180 = vector.broadcast %163 : vector<128x1xi32> to vector<128x32xi32>
    %181 = arith.cmpi eq, %179, %180 : vector<128x32xi32>
    %182 = vector.broadcast %177 : vector<128x1xi1> to vector<128x32xi1>
    %183 = arith.andi %182, %181 : vector<128x32xi1>
    %cst_67 = arith.constant 1.000000e+00 : f32
    %cst_68 = arith.constant 0.000000e+00 : f32
    %184 = vector.broadcast %cst_67 : f32 to vector<128x32xf32>
    %185 = vector.broadcast %cst_68 : f32 to vector<128x32xf32>
    %186 = arith.select %183, %184, %185 : vector<128x32xi1>, vector<128x32xf32>
    %187 = arith.truncf %186 : vector<128x32xf32> to vector<128x32xbf16>
    %188 = arith.truncf %130 : vector<32x16xf32> to vector<32x16xbf16>
    %cst_69 = arith.constant dense<0.000000e+00> : vector<128x16xf32>
    %189 = tpu.matmul %187, %188, %cst_69 {dimension_numbers = #tpu.dot_dimension_numbers<[1], [0], [0], [1], [0, 0, 1, 1], [], []>} : vector<128x32xbf16>, vector<32x16xbf16>, vector<128x16xf32> -> vector<128x16xf32>
    %190 = arith.truncf %189 : vector<128x16xf32> to vector<128x16xbf16>
    %191 = vector.extract_strided_slice %190 {offsets = [0, 0], sizes = [8, 16], strides = [1, 1]} : vector<128x16xbf16> to vector<8x16xbf16>
    %c0_70 = arith.constant 0 : index
    %c0_71 = arith.constant 0 : index
    %192 = vector.load %arg8[%c0_70, %c0_71] : memref<32x512xbf16, #tpu.memory_space<vmem>>, vector<8x16xbf16>
    tpu.vector_store %arg8[%c0_70, %c0_71], %191 {strides = array<i32>} : memref<32x512xbf16, #tpu.memory_space<vmem>>, vector<8x16xbf16>,
    %193 = vector.extract_strided_slice %190 {offsets = [8, 0], sizes = [8, 16], strides = [1, 1]} : vector<128x16xbf16> to vector<8x16xbf16>
    %c0_72 = arith.constant 0 : index
    %c16_73 = arith.constant 16 : index
    %194 = vector.load %arg8[%c0_72, %c16_73] : memref<32x512xbf16, #tpu.memory_space<vmem>>, vector<8x16xbf16>
    tpu.vector_store %arg8[%c0_72, %c16_73], %193 {strides = array<i32>} : memref<32x512xbf16, #tpu.memory_space<vmem>>, vector<8x16xbf16>,
    %195 = vector.extract_strided_slice %190 {offsets = [16, 0], sizes = [8, 16], strides = [1, 1]} : vector<128x16xbf16> to vector<8x16xbf16>
    %c0_74 = arith.constant 0 : index
    %c32_75 = arith.constant 32 : index
    %196 = vector.load %arg8[%c0_74, %c32_75] : memref<32x512xbf16, #tpu.memory_space<vmem>>, vector<8x16xbf16>
    tpu.vector_store %arg8[%c0_74, %c32_75], %195 {strides = array<i32>} : memref<32x512xbf16, #tpu.memory_space<vmem>>, vector<8x16xbf16>,
    %197 = vector.extract_strided_slice %190 {offsets = [24, 0], sizes = [8, 16], strides = [1, 1]} : vector<128x16xbf16> to vector<8x16xbf16>
    %c0_76 = arith.constant 0 : index
    %c48_77 = arith.constant 48 : index
    %198 = vector.load %arg8[%c0_76, %c48_77] : memref<32x512xbf16, #tpu.memory_space<vmem>>, vector<8x16xbf16>
    tpu.vector_store %arg8[%c0_76, %c48_77], %197 {strides = array<i32>} : memref<32x512xbf16, #tpu.memory_space<vmem>>, vector<8x16xbf16>,
    %199 = vector.extract_strided_slice %190 {offsets = [32, 0], sizes = [8, 16], strides = [1, 1]} : vector<128x16xbf16> to vector<8x16xbf16>
    %c0_78 = arith.constant 0 : index
    %c64_79 = arith.constant 64 : index
    %200 = vector.load %arg8[%c0_78, %c64_79] : memref<32x512xbf16, #tpu.memory_space<vmem>>, vector<8x16xbf16>
    tpu.vector_store %arg8[%c0_78, %c64_79], %199 {strides = array<i32>} : memref<32x512xbf16, #tpu.memory_space<vmem>>, vector<8x16xbf16>,
    %201 = vector.extract_strided_slice %190 {offsets = [40, 0], sizes = [8, 16], strides = [1, 1]} : vector<128x16xbf16> to vector<8x16xbf16>
    %c0_80 = arith.constant 0 : index
    %c80_81 = arith.constant 80 : index
    %202 = vector.load %arg8[%c0_80, %c80_81] : memref<32x512xbf16, #tpu.memory_space<vmem>>, vector<8x16xbf16>
    tpu.vector_store %arg8[%c0_80, %c80_81], %201 {strides = array<i32>} : memref<32x512xbf16, #tpu.memory_space<vmem>>, vector<8x16xbf16>,
    %203 = vector.extract_strided_slice %190 {offsets = [48, 0], sizes = [8, 16], strides = [1, 1]} : vector<128x16xbf16> to vector<8x16xbf16>
    %c0_82 = arith.constant 0 : index
    %c96_83 = arith.constant 96 : index
    %204 = vector.load %arg8[%c0_82, %c96_83] : memref<32x512xbf16, #tpu.memory_space<vmem>>, vector<8x16xbf16>
    tpu.vector_store %arg8[%c0_82, %c96_83], %203 {strides = array<i32>} : memref<32x512xbf16, #tpu.memory_space<vmem>>, vector<8x16xbf16>,
    %205 = vector.extract_strided_slice %190 {offsets = [56, 0], sizes = [8, 16], strides = [1, 1]} : vector<128x16xbf16> to vector<8x16xbf16>
    %c0_84 = arith.constant 0 : index
    %c112_85 = arith.constant 112 : index
    %206 = vector.load %arg8[%c0_84, %c112_85] : memref<32x512xbf16, #tpu.memory_space<vmem>>, vector<8x16xbf16>
    tpu.vector_store %arg8[%c0_84, %c112_85], %205 {strides = array<i32>} : memref<32x512xbf16, #tpu.memory_space<vmem>>, vector<8x16xbf16>,
    %207 = vector.extract_strided_slice %190 {offsets = [64, 0], sizes = [8, 16], strides = [1, 1]} : vector<128x16xbf16> to vector<8x16xbf16>
    %c0_86 = arith.constant 0 : index
    %c128 = arith.constant 128 : index
    %208 = vector.load %arg8[%c0_86, %c128] : memref<32x512xbf16, #tpu.memory_space<vmem>>, vector<8x16xbf16>
    tpu.vector_store %arg8[%c0_86, %c128], %207 {strides = array<i32>} : memref<32x512xbf16, #tpu.memory_space<vmem>>, vector<8x16xbf16>,
    %209 = vector.extract_strided_slice %190 {offsets = [72, 0], sizes = [8, 16], strides = [1, 1]} : vector<128x16xbf16> to vector<8x16xbf16>
    %c0_87 = arith.constant 0 : index
    %c144 = arith.constant 144 : index
    %210 = vector.load %arg8[%c0_87, %c144] : memref<32x512xbf16, #tpu.memory_space<vmem>>, vector<8x16xbf16>
    tpu.vector_store %arg8[%c0_87, %c144], %209 {strides = array<i32>} : memref<32x512xbf16, #tpu.memory_space<vmem>>, vector<8x16xbf16>,
    %211 = vector.extract_strided_slice %190 {offsets = [80, 0], sizes = [8, 16], strides = [1, 1]} : vector<128x16xbf16> to vector<8x16xbf16>
    %c0_88 = arith.constant 0 : index
    %c160 = arith.constant 160 : index
    %212 = vector.load %arg8[%c0_88, %c160] : memref<32x512xbf16, #tpu.memory_space<vmem>>, vector<8x16xbf16>
    tpu.vector_store %arg8[%c0_88, %c160], %211 {strides = array<i32>} : memref<32x512xbf16, #tpu.memory_space<vmem>>, vector<8x16xbf16>,
    %213 = vector.extract_strided_slice %190 {offsets = [88, 0], sizes = [8, 16], strides = [1, 1]} : vector<128x16xbf16> to vector<8x16xbf16>
    %c0_89 = arith.constant 0 : index
    %c176 = arith.constant 176 : index
    %214 = vector.load %arg8[%c0_89, %c176] : memref<32x512xbf16, #tpu.memory_space<vmem>>, vector<8x16xbf16>
    tpu.vector_store %arg8[%c0_89, %c176], %213 {strides = array<i32>} : memref<32x512xbf16, #tpu.memory_space<vmem>>, vector<8x16xbf16>,
    %215 = vector.extract_strided_slice %190 {offsets = [96, 0], sizes = [8, 16], strides = [1, 1]} : vector<128x16xbf16> to vector<8x16xbf16>
    %c0_90 = arith.constant 0 : index
    %c192 = arith.constant 192 : index
    %216 = vector.load %arg8[%c0_90, %c192] : memref<32x512xbf16, #tpu.memory_space<vmem>>, vector<8x16xbf16>
    tpu.vector_store %arg8[%c0_90, %c192], %215 {strides = array<i32>} : memref<32x512xbf16, #tpu.memory_space<vmem>>, vector<8x16xbf16>,
    %217 = vector.extract_strided_slice %190 {offsets = [104, 0], sizes = [8, 16], strides = [1, 1]} : vector<128x16xbf16> to vector<8x16xbf16>
    %c0_91 = arith.constant 0 : index
    %c208 = arith.constant 208 : index
    %218 = vector.load %arg8[%c0_91, %c208] : memref<32x512xbf16, #tpu.memory_space<vmem>>, vector<8x16xbf16>
    tpu.vector_store %arg8[%c0_91, %c208], %217 {strides = array<i32>} : memref<32x512xbf16, #tpu.memory_space<vmem>>, vector<8x16xbf16>,
    %219 = vector.extract_strided_slice %190 {offsets = [112, 0], sizes = [8, 16], strides = [1, 1]} : vector<128x16xbf16> to vector<8x16xbf16>
    %c0_92 = arith.constant 0 : index
    %c224 = arith.constant 224 : index
    %220 = vector.load %arg8[%c0_92, %c224] : memref<32x512xbf16, #tpu.memory_space<vmem>>, vector<8x16xbf16>
    tpu.vector_store %arg8[%c0_92, %c224], %219 {strides = array<i32>} : memref<32x512xbf16, #tpu.memory_space<vmem>>, vector<8x16xbf16>,
    %221 = vector.extract_strided_slice %190 {offsets = [120, 0], sizes = [8, 16], strides = [1, 1]} : vector<128x16xbf16> to vector<8x16xbf16>
    %c0_93 = arith.constant 0 : index
    %c240 = arith.constant 240 : index
    %222 = vector.load %arg8[%c0_93, %c240] : memref<32x512xbf16, #tpu.memory_space<vmem>>, vector<8x16xbf16>
    tpu.vector_store %arg8[%c0_93, %c240], %221 {strides = array<i32>} : memref<32x512xbf16, #tpu.memory_space<vmem>>, vector<8x16xbf16>,
    %c0_94 = arith.constant 0 : index
    %c0_95 = arith.constant 0 : index
    %223 = vector.load %arg8[%c0_94, %c0_95] : memref<32x512xbf16, #tpu.memory_space<vmem>>, vector<8x256xbf16>
    %c0_96 = arith.constant 0 : index
    %c0_97 = arith.constant 0 : index
    %224 = vector.load %arg3[%c0_96, %c0_97] : memref<256x32xbf16, #tpu.memory_space<vmem>>, vector<256x32xbf16>
    %cst_98 = arith.constant dense<0.000000e+00> : vector<8x32xf32>
    %225 = tpu.matmul %223, %224, %cst_98 {dimension_numbers = #tpu.dot_dimension_numbers<[1], [0], [0], [1], [0, 0, 1, 1], [], []>} : vector<8x256xbf16>, vector<256x32xbf16>, vector<8x32xf32> -> vector<8x32xf32>
    %c3 = arith.constant 3 : index
    %c0_99 = arith.constant 0 : index
    %226 = vector.load %arg6[%c3, %c0_99] : memref<8x128xf32, #tpu.memory_space<vmem>>, vector<1x32xf32>
    %c4 = arith.constant 4 : index
    %c0_100 = arith.constant 0 : index
    %227 = vector.load %arg6[%c4, %c0_100] : memref<8x128xf32, #tpu.memory_space<vmem>>, vector<1x32xf32>
    %cst_101 = arith.constant dense<0.000000e+00> : vector<32xf32>
    %228 = vector.multi_reduction <add>, %225, %cst_101 [0] : vector<8x32xf32> to vector<32xf32>
    %229 = vector.shape_cast %228 : vector<32xf32> to vector<1x32xf32>
    %cst_102 = arith.constant 1.250000e-01 : f32
    %230 = vector.broadcast %cst_102 : f32 to vector<1x32xf32>
    %231 = arith.mulf %229, %230 : vector<1x32xf32>
    %232 = arith.mulf %225, %225 : vector<8x32xf32>
    %cst_103 = arith.constant dense<0.000000e+00> : vector<32xf32>
    %233 = vector.multi_reduction <add>, %232, %cst_103 [0] : vector<8x32xf32> to vector<32xf32>
    %234 = vector.shape_cast %233 : vector<32xf32> to vector<1x32xf32>
    %cst_104 = arith.constant 1.250000e-01 : f32
    %235 = vector.broadcast %cst_104 : f32 to vector<1x32xf32>
    %236 = arith.mulf %234, %235 : vector<1x32xf32>
    %237 = arith.mulf %231, %231 : vector<1x32xf32>
    %238 = arith.subf %236, %237 : vector<1x32xf32>
    %cst_105 = arith.constant 0.000000e+00 : f32
    %239 = vector.broadcast %cst_105 : f32 to vector<1x32xf32>
    %240 = arith.maximumf %238, %239 : vector<1x32xf32>
    %241 = vector.broadcast %231 : vector<1x32xf32> to vector<8x32xf32>
    %242 = arith.subf %225, %241 : vector<8x32xf32>
    %cst_106 = arith.constant 9.99999974E-6 : f32
    %243 = vector.broadcast %cst_106 : f32 to vector<1x32xf32>
    %244 = arith.addf %240, %243 : vector<1x32xf32>
    %245 = math.rsqrt %244 : vector<1x32xf32>
    %246 = vector.broadcast %245 : vector<1x32xf32> to vector<8x32xf32>
    %247 = arith.mulf %242, %246 : vector<8x32xf32>
    %248 = vector.broadcast %226 : vector<1x32xf32> to vector<8x32xf32>
    %249 = arith.mulf %247, %248 : vector<8x32xf32>
    %250 = vector.broadcast %227 : vector<1x32xf32> to vector<8x32xf32>
    %251 = arith.addf %249, %250 : vector<8x32xf32>
    %cst_107 = arith.constant 0.000000e+00 : f32
    %252 = vector.broadcast %cst_107 : f32 to vector<8x32xf32>
    %253 = arith.maximumf %251, %252 : vector<8x32xf32>
    %254 = tpu.iota {dimensions = array<i32: 0>} : vector<128x1xi32>
    %c3_i32_108 = arith.constant 3 : i32
    %255 = vector.broadcast %c3_i32_108 : i32 to vector<128x1xi32>
    %256 = arith.shrsi %254, %255 : vector<128x1xi32>
    %c7_i32_109 = arith.constant 7 : i32
    %257 = vector.broadcast %c7_i32_109 : i32 to vector<128x1xi32>
    %258 = arith.andi %254, %257 : vector<128x1xi32>
    %c2_i32_110 = arith.constant 2 : i32
    %259 = vector.broadcast %c2_i32_110 : i32 to vector<128x1xi32>
    %260 = arith.shrsi %256, %259 : vector<128x1xi32>
    %c3_i32_111 = arith.constant 3 : i32
    %261 = vector.broadcast %c3_i32_111 : i32 to vector<128x1xi32>
    %262 = arith.andi %256, %261 : vector<128x1xi32>
    %c0_i32_112 = arith.constant 0 : i32
    %263 = vector.broadcast %c0_i32_112 : i32 to vector<128x1xi32>
    %264 = arith.shrsi %258, %263 : vector<128x1xi32>
    %c0_i32_113 = arith.constant 0 : i32
    %265 = vector.broadcast %c0_i32_113 : i32 to vector<128x1xi32>
    %266 = arith.andi %258, %265 : vector<128x1xi32>
    %c0_i32_114 = arith.constant 0 : i32
    %267 = vector.broadcast %c0_i32_114 : i32 to vector<128x1xi32>
    %268 = arith.shrsi %266, %267 : vector<128x1xi32>
    %c0_i32_115 = arith.constant 0 : i32
    %269 = vector.broadcast %c0_i32_115 : i32 to vector<128x1xi32>
    %270 = arith.andi %266, %269 : vector<128x1xi32>
    %c2_i32_116 = arith.constant 2 : i32
    %271 = vector.broadcast %c2_i32_116 : i32 to vector<128x1xi32>
    %272 = arith.muli %271, %268 : vector<128x1xi32>
    %273 = arith.addi %272, %260 : vector<128x1xi32>
    %c1_i32_117 = arith.constant 1 : i32
    %274 = vector.broadcast %c1_i32_117 : i32 to vector<128x1xi32>
    %275 = arith.subi %273, %274 : vector<128x1xi32>
    %c2_i32_118 = arith.constant 2 : i32
    %276 = vector.broadcast %c2_i32_118 : i32 to vector<128x1xi32>
    %277 = arith.muli %276, %270 : vector<128x1xi32>
    %278 = arith.addi %277, %262 : vector<128x1xi32>
    %c1_i32_119 = arith.constant 1 : i32
    %279 = vector.broadcast %c1_i32_119 : i32 to vector<128x1xi32>
    %280 = arith.subi %278, %279 : vector<128x1xi32>
    %c2_i32_120 = arith.constant 2 : i32
    %281 = vector.broadcast %c2_i32_120 : i32 to vector<128x1xi32>
    %282 = arith.muli %264, %281 : vector<128x1xi32>
    %283 = arith.addi %282, %275 : vector<128x1xi32>
    %c2_i32_121 = arith.constant 2 : i32
    %284 = vector.broadcast %c2_i32_121 : i32 to vector<128x1xi32>
    %285 = arith.muli %283, %284 : vector<128x1xi32>
    %286 = arith.addi %285, %280 : vector<128x1xi32>
    %c0_i32_122 = arith.constant 0 : i32
    %287 = vector.broadcast %c0_i32_122 : i32 to vector<128x1xi32>
    %288 = arith.cmpi sge, %275, %287 : vector<128x1xi32>
    %c2_i32_123 = arith.constant 2 : i32
    %289 = vector.broadcast %c2_i32_123 : i32 to vector<128x1xi32>
    %290 = arith.cmpi slt, %275, %289 : vector<128x1xi32>
    %291 = arith.andi %288, %290 : vector<128x1xi1>
    %c0_i32_124 = arith.constant 0 : i32
    %292 = vector.broadcast %c0_i32_124 : i32 to vector<128x1xi32>
    %293 = arith.cmpi sge, %280, %292 : vector<128x1xi32>
    %294 = arith.andi %291, %293 : vector<128x1xi1>
    %c2_i32_125 = arith.constant 2 : i32
    %295 = vector.broadcast %c2_i32_125 : i32 to vector<128x1xi32>
    %296 = arith.cmpi slt, %280, %295 : vector<128x1xi32>
    %297 = arith.andi %294, %296 : vector<128x1xi1>
    %c2_i32_126 = arith.constant 2 : i32
    %298 = vector.broadcast %c2_i32_126 : i32 to vector<128x1xi32>
    %299 = arith.cmpi slt, %258, %298 : vector<128x1xi32>
    %300 = arith.andi %297, %299 : vector<128x1xi1>
    %301 = tpu.iota {dimensions = array<i32: 1>} : vector<1x8xi32>
    %302 = vector.broadcast %301 : vector<1x8xi32> to vector<128x8xi32>
    %303 = vector.broadcast %286 : vector<128x1xi32> to vector<128x8xi32>
    %304 = arith.cmpi eq, %302, %303 : vector<128x8xi32>
    %305 = vector.broadcast %300 : vector<128x1xi1> to vector<128x8xi1>
    %306 = arith.andi %305, %304 : vector<128x8xi1>
    %cst_127 = arith.constant 1.000000e+00 : f32
    %cst_128 = arith.constant 0.000000e+00 : f32
    %307 = vector.broadcast %cst_127 : f32 to vector<128x8xf32>
    %308 = vector.broadcast %cst_128 : f32 to vector<128x8xf32>
    %309 = arith.select %306, %307, %308 : vector<128x8xi1>, vector<128x8xf32>
    %310 = arith.truncf %309 : vector<128x8xf32> to vector<128x8xbf16>
    %311 = arith.truncf %253 : vector<8x32xf32> to vector<8x32xbf16>
    %cst_129 = arith.constant dense<0.000000e+00> : vector<128x32xf32>
    %312 = tpu.matmul %310, %311, %cst_129 {dimension_numbers = #tpu.dot_dimension_numbers<[1], [0], [0], [1], [0, 0, 1, 1], [], []>} : vector<128x8xbf16>, vector<8x32xbf16>, vector<128x32xf32> -> vector<128x32xf32>
    %313 = arith.truncf %312 : vector<128x32xf32> to vector<128x32xbf16>
    %314 = vector.extract_strided_slice %313 {offsets = [0, 0], sizes = [8, 32], strides = [1, 1]} : vector<128x32xbf16> to vector<8x32xbf16>
    %c0_130 = arith.constant 0 : index
    %c0_131 = arith.constant 0 : index
    %315 = vector.load %arg8[%c0_130, %c0_131] : memref<32x512xbf16, #tpu.memory_space<vmem>>, vector<8x32xbf16>
    tpu.vector_store %arg8[%c0_130, %c0_131], %314 {strides = array<i32>} : memref<32x512xbf16, #tpu.memory_space<vmem>>, vector<8x32xbf16>,
    %316 = vector.extract_strided_slice %313 {offsets = [8, 0], sizes = [8, 32], strides = [1, 1]} : vector<128x32xbf16> to vector<8x32xbf16>
    %c0_132 = arith.constant 0 : index
    %c32_133 = arith.constant 32 : index
    %317 = vector.load %arg8[%c0_132, %c32_133] : memref<32x512xbf16, #tpu.memory_space<vmem>>, vector<8x32xbf16>
    tpu.vector_store %arg8[%c0_132, %c32_133], %316 {strides = array<i32>} : memref<32x512xbf16, #tpu.memory_space<vmem>>, vector<8x32xbf16>,
    %318 = vector.extract_strided_slice %313 {offsets = [16, 0], sizes = [8, 32], strides = [1, 1]} : vector<128x32xbf16> to vector<8x32xbf16>
    %c0_134 = arith.constant 0 : index
    %c64_135 = arith.constant 64 : index
    %319 = vector.load %arg8[%c0_134, %c64_135] : memref<32x512xbf16, #tpu.memory_space<vmem>>, vector<8x32xbf16>
    tpu.vector_store %arg8[%c0_134, %c64_135], %318 {strides = array<i32>} : memref<32x512xbf16, #tpu.memory_space<vmem>>, vector<8x32xbf16>,
    %320 = vector.extract_strided_slice %313 {offsets = [24, 0], sizes = [8, 32], strides = [1, 1]} : vector<128x32xbf16> to vector<8x32xbf16>
    %c0_136 = arith.constant 0 : index
    %c96_137 = arith.constant 96 : index
    %321 = vector.load %arg8[%c0_136, %c96_137] : memref<32x512xbf16, #tpu.memory_space<vmem>>, vector<8x32xbf16>
    tpu.vector_store %arg8[%c0_136, %c96_137], %320 {strides = array<i32>} : memref<32x512xbf16, #tpu.memory_space<vmem>>, vector<8x32xbf16>,
    %322 = vector.extract_strided_slice %313 {offsets = [32, 0], sizes = [8, 32], strides = [1, 1]} : vector<128x32xbf16> to vector<8x32xbf16>
    %c0_138 = arith.constant 0 : index
    %c128_139 = arith.constant 128 : index
    %323 = vector.load %arg8[%c0_138, %c128_139] : memref<32x512xbf16, #tpu.memory_space<vmem>>, vector<8x32xbf16>
    tpu.vector_store %arg8[%c0_138, %c128_139], %322 {strides = array<i32>} : memref<32x512xbf16, #tpu.memory_space<vmem>>, vector<8x32xbf16>,
    %324 = vector.extract_strided_slice %313 {offsets = [40, 0], sizes = [8, 32], strides = [1, 1]} : vector<128x32xbf16> to vector<8x32xbf16>
    %c0_140 = arith.constant 0 : index
    %c160_141 = arith.constant 160 : index
    %325 = vector.load %arg8[%c0_140, %c160_141] : memref<32x512xbf16, #tpu.memory_space<vmem>>, vector<8x32xbf16>
    tpu.vector_store %arg8[%c0_140, %c160_141], %324 {strides = array<i32>} : memref<32x512xbf16, #tpu.memory_space<vmem>>, vector<8x32xbf16>,
    %326 = vector.extract_strided_slice %313 {offsets = [48, 0], sizes = [8, 32], strides = [1, 1]} : vector<128x32xbf16> to vector<8x32xbf16>
    %c0_142 = arith.constant 0 : index
    %c192_143 = arith.constant 192 : index
    %327 = vector.load %arg8[%c0_142, %c192_143] : memref<32x512xbf16, #tpu.memory_space<vmem>>, vector<8x32xbf16>
    tpu.vector_store %arg8[%c0_142, %c192_143], %326 {strides = array<i32>} : memref<32x512xbf16, #tpu.memory_space<vmem>>, vector<8x32xbf16>,
    %328 = vector.extract_strided_slice %313 {offsets = [56, 0], sizes = [8, 32], strides = [1, 1]} : vector<128x32xbf16> to vector<8x32xbf16>
    %c0_144 = arith.constant 0 : index
    %c224_145 = arith.constant 224 : index
    %329 = vector.load %arg8[%c0_144, %c224_145] : memref<32x512xbf16, #tpu.memory_space<vmem>>, vector<8x32xbf16>
    tpu.vector_store %arg8[%c0_144, %c224_145], %328 {strides = array<i32>} : memref<32x512xbf16, #tpu.memory_space<vmem>>, vector<8x32xbf16>,
    %330 = vector.extract_strided_slice %313 {offsets = [64, 0], sizes = [8, 32], strides = [1, 1]} : vector<128x32xbf16> to vector<8x32xbf16>
    %c0_146 = arith.constant 0 : index
    %c256 = arith.constant 256 : index
    %331 = vector.load %arg8[%c0_146, %c256] : memref<32x512xbf16, #tpu.memory_space<vmem>>, vector<8x32xbf16>
    tpu.vector_store %arg8[%c0_146, %c256], %330 {strides = array<i32>} : memref<32x512xbf16, #tpu.memory_space<vmem>>, vector<8x32xbf16>,
    %332 = vector.extract_strided_slice %313 {offsets = [72, 0], sizes = [8, 32], strides = [1, 1]} : vector<128x32xbf16> to vector<8x32xbf16>
    %c0_147 = arith.constant 0 : index
    %c288 = arith.constant 288 : index
    %333 = vector.load %arg8[%c0_147, %c288] : memref<32x512xbf16, #tpu.memory_space<vmem>>, vector<8x32xbf16>
    tpu.vector_store %arg8[%c0_147, %c288], %332 {strides = array<i32>} : memref<32x512xbf16, #tpu.memory_space<vmem>>, vector<8x32xbf16>,
    %334 = vector.extract_strided_slice %313 {offsets = [80, 0], sizes = [8, 32], strides = [1, 1]} : vector<128x32xbf16> to vector<8x32xbf16>
    %c0_148 = arith.constant 0 : index
    %c320 = arith.constant 320 : index
    %335 = vector.load %arg8[%c0_148, %c320] : memref<32x512xbf16, #tpu.memory_space<vmem>>, vector<8x32xbf16>
    tpu.vector_store %arg8[%c0_148, %c320], %334 {strides = array<i32>} : memref<32x512xbf16, #tpu.memory_space<vmem>>, vector<8x32xbf16>,
    %336 = vector.extract_strided_slice %313 {offsets = [88, 0], sizes = [8, 32], strides = [1, 1]} : vector<128x32xbf16> to vector<8x32xbf16>
    %c0_149 = arith.constant 0 : index
    %c352 = arith.constant 352 : index
    %337 = vector.load %arg8[%c0_149, %c352] : memref<32x512xbf16, #tpu.memory_space<vmem>>, vector<8x32xbf16>
    tpu.vector_store %arg8[%c0_149, %c352], %336 {strides = array<i32>} : memref<32x512xbf16, #tpu.memory_space<vmem>>, vector<8x32xbf16>,
    %338 = vector.extract_strided_slice %313 {offsets = [96, 0], sizes = [8, 32], strides = [1, 1]} : vector<128x32xbf16> to vector<8x32xbf16>
    %c0_150 = arith.constant 0 : index
    %c384 = arith.constant 384 : index
    %339 = vector.load %arg8[%c0_150, %c384] : memref<32x512xbf16, #tpu.memory_space<vmem>>, vector<8x32xbf16>
    tpu.vector_store %arg8[%c0_150, %c384], %338 {strides = array<i32>} : memref<32x512xbf16, #tpu.memory_space<vmem>>, vector<8x32xbf16>,
    %340 = vector.extract_strided_slice %313 {offsets = [104, 0], sizes = [8, 32], strides = [1, 1]} : vector<128x32xbf16> to vector<8x32xbf16>
    %c0_151 = arith.constant 0 : index
    %c416 = arith.constant 416 : index
    %341 = vector.load %arg8[%c0_151, %c416] : memref<32x512xbf16, #tpu.memory_space<vmem>>, vector<8x32xbf16>
    tpu.vector_store %arg8[%c0_151, %c416], %340 {strides = array<i32>} : memref<32x512xbf16, #tpu.memory_space<vmem>>, vector<8x32xbf16>,
    %342 = vector.extract_strided_slice %313 {offsets = [112, 0], sizes = [8, 32], strides = [1, 1]} : vector<128x32xbf16> to vector<8x32xbf16>
    %c0_152 = arith.constant 0 : index
    %c448 = arith.constant 448 : index
    %343 = vector.load %arg8[%c0_152, %c448] : memref<32x512xbf16, #tpu.memory_space<vmem>>, vector<8x32xbf16>
    tpu.vector_store %arg8[%c0_152, %c448], %342 {strides = array<i32>} : memref<32x512xbf16, #tpu.memory_space<vmem>>, vector<8x32xbf16>,
    %344 = vector.extract_strided_slice %313 {offsets = [120, 0], sizes = [8, 32], strides = [1, 1]} : vector<128x32xbf16> to vector<8x32xbf16>
    %c0_153 = arith.constant 0 : index
    %c480 = arith.constant 480 : index
    %345 = vector.load %arg8[%c0_153, %c480] : memref<32x512xbf16, #tpu.memory_space<vmem>>, vector<8x32xbf16>
    tpu.vector_store %arg8[%c0_153, %c480], %344 {strides = array<i32>} : memref<32x512xbf16, #tpu.memory_space<vmem>>, vector<8x32xbf16>,
    %c0_154 = arith.constant 0 : index
    %c0_155 = arith.constant 0 : index
    %346 = vector.load %arg8[%c0_154, %c0_155] : memref<32x512xbf16, #tpu.memory_space<vmem>>, vector<8x512xbf16>
    %c0_156 = arith.constant 0 : index
    %c0_157 = arith.constant 0 : index
    %347 = vector.load %arg4[%c0_156, %c0_157] : memref<512x64xbf16, #tpu.memory_space<vmem>>, vector<512x64xbf16>
    %cst_158 = arith.constant dense<0.000000e+00> : vector<8x64xf32>
    %348 = tpu.matmul %346, %347, %cst_158 {dimension_numbers = #tpu.dot_dimension_numbers<[1], [0], [0], [1], [0, 0, 1, 1], [], []>} : vector<8x512xbf16>, vector<512x64xbf16>, vector<8x64xf32> -> vector<8x64xf32>
    %c5 = arith.constant 5 : index
    %c0_159 = arith.constant 0 : index
    %349 = vector.load %arg6[%c5, %c0_159] : memref<8x128xf32, #tpu.memory_space<vmem>>, vector<1x64xf32>
    %c6 = arith.constant 6 : index
    %c0_160 = arith.constant 0 : index
    %350 = vector.load %arg6[%c6, %c0_160] : memref<8x128xf32, #tpu.memory_space<vmem>>, vector<1x64xf32>
    %cst_161 = arith.constant dense<0.000000e+00> : vector<64xf32>
    %351 = vector.multi_reduction <add>, %348, %cst_161 [0] : vector<8x64xf32> to vector<64xf32>
    %352 = vector.shape_cast %351 : vector<64xf32> to vector<1x64xf32>
    %cst_162 = arith.constant 5.000000e-01 : f32
    %353 = vector.broadcast %cst_162 : f32 to vector<1x64xf32>
    %354 = arith.mulf %352, %353 : vector<1x64xf32>
    %355 = arith.mulf %348, %348 : vector<8x64xf32>
    %cst_163 = arith.constant dense<0.000000e+00> : vector<64xf32>
    %356 = vector.multi_reduction <add>, %355, %cst_163 [0] : vector<8x64xf32> to vector<64xf32>
    %357 = vector.shape_cast %356 : vector<64xf32> to vector<1x64xf32>
    %cst_164 = arith.constant 5.000000e-01 : f32
    %358 = vector.broadcast %cst_164 : f32 to vector<1x64xf32>
    %359 = arith.mulf %357, %358 : vector<1x64xf32>
    %360 = arith.mulf %354, %354 : vector<1x64xf32>
    %361 = arith.subf %359, %360 : vector<1x64xf32>
    %cst_165 = arith.constant 0.000000e+00 : f32
    %362 = vector.broadcast %cst_165 : f32 to vector<1x64xf32>
    %363 = arith.maximumf %361, %362 : vector<1x64xf32>
    %364 = vector.broadcast %354 : vector<1x64xf32> to vector<8x64xf32>
    %365 = arith.subf %348, %364 : vector<8x64xf32>
    %cst_166 = arith.constant 9.99999974E-6 : f32
    %366 = vector.broadcast %cst_166 : f32 to vector<1x64xf32>
    %367 = arith.addf %363, %366 : vector<1x64xf32>
    %368 = math.rsqrt %367 : vector<1x64xf32>
    %369 = vector.broadcast %368 : vector<1x64xf32> to vector<8x64xf32>
    %370 = arith.mulf %365, %369 : vector<8x64xf32>
    %371 = vector.broadcast %349 : vector<1x64xf32> to vector<8x64xf32>
    %372 = arith.mulf %370, %371 : vector<8x64xf32>
    %373 = vector.broadcast %350 : vector<1x64xf32> to vector<8x64xf32>
    %374 = arith.addf %372, %373 : vector<8x64xf32>
    %cst_167 = arith.constant 0.000000e+00 : f32
    %375 = vector.broadcast %cst_167 : f32 to vector<8x64xf32>
    %376 = arith.maximumf %374, %375 : vector<8x64xf32>
    %c0_168 = arith.constant 0 : index
    %c0_169 = arith.constant 0 : index
    %377 = vector.load %arg5[%c0_168, %c0_169] : memref<64x128xf32, #tpu.memory_space<vmem>>, vector<64x128xf32>
    %cst_170 = arith.constant dense<0.000000e+00> : vector<8x128xf32>
    %378 = tpu.matmul %376, %377, %cst_170 {dimension_numbers = #tpu.dot_dimension_numbers<[1], [0], [0], [1], [0, 0, 1, 1], [], []>} : vector<8x64xf32>, vector<64x128xf32>, vector<8x128xf32> -> vector<8x128xf32>
    %c7 = arith.constant 7 : index
    %c0_171 = arith.constant 0 : index
    %379 = vector.load %arg6[%c7, %c0_171] : memref<8x128xf32, #tpu.memory_space<vmem>>, vector<1x128xf32>
    %380 = vector.broadcast %379 : vector<1x128xf32> to vector<8x128xf32>
    %381 = arith.addf %378, %380 : vector<8x128xf32>
    %c0_172 = arith.constant 0 : index
    %c0_173 = arith.constant 0 : index
    %382 = vector.load %arg7[%c0_172, %c0_173] : memref<8x128xf32, #tpu.memory_space<vmem>>, vector<8x128xf32>
    tpu.vector_store %arg7[%c0_172, %c0_173], %381 {strides = array<i32>} : memref<8x128xf32, #tpu.memory_space<vmem>>, vector<8x128xf32>,
    return
  }
}

</mosaic_0001>

<bundles_post_ra>
// kernel: discriminator_forward.1
= control target key start
LH: loop header
LB: loop body
LE: loop exit
PB: predicated region body
PF: predicated region fallthrough
CT: control target
= control target key end

     0   :  { %vm54_vm0 = vcmask 392192   ;;  %v264_v25 = vlaneseq  ;;  %s5790_s21 = smov 8   ;;  %s5791_s22 = smov 16   ;;  %s8191_s1 = inlined_call_operand.vmem [shape: f32[48,8], index: 1, kind: input, shape index: {}]   ;;  %s8192_s0 = inlined_call_operand.vmem [shape: f32[128,48], index: 0, kind: input, shape index: {}]   ;;  %s8193_s6 = inlined_call_operand.vmem [shape: f32[8,128], index: 6, kind: input, shape index: {}]   ;;  %s8194_s2 = inlined_call_operand.vmem [shape: bf16[128,16], index: 2, kind: input, shape index: {}]   ;;  %s8195_s3 = inlined_call_operand.vmem [shape: bf16[256,32], index: 3, kind: input, shape index: {}]   ;;  %s8196_s4 = inlined_call_operand.vmem [shape: bf16[512,64], index: 4, kind: input, shape index: {}]   ;;  %s8197_s5 = inlined_call_operand.vmem [shape: f32[64,128], index: 5, kind: input, shape index: {}]   ;;  %s8198_s7 = inlined_call_operand.vmem [shape: f32[8,128], index: 7, kind: output, shape index: {}]  }
   0x1   :  { %v43_v0 = vld [vmem:[%s8191_s1] sm:$0xff]  ;;  %v44_v1 = vld [vmem:[%s8191_s1 + $0x8] sm:$0xff]  ;;  %v45_v2 = vld [vmem:[%s8191_s1 + $0x10] sm:$0xff]  ;;  %s5792_s23 = smov 24   ;;  %s5793_s24 = smov 32  }
   0x2   :  { %v5683_v3 = vpack.c.bf16 %v44_v1, %v43_v0  ;;  %v46_v4 = vld [vmem:[%s8191_s1 + $0x18] sm:$0xff]  ;;  %v47_v6 = vld [vmem:[%s8191_s1 + $0x20] sm:$0xff]  ;;  %v48_v7 = vld [vmem:[%s8191_s1 + $0x28] sm:$0xff]  ;;  %v5931_v26 = vshrl.u32 %v264_v25, 7  ;;  %s5794_s25 = smov 40   ;;  %s5795_s26 = smov 48  }
   0x3   :  { %v5687_v5 = vpack.c.bf16 %v46_v4, %v45_v2  ;;  %v27_v8 = vld [vmem:[%s8192_s0] sm:$0xff]  ;;  %v5691_v9 = vpack.c.bf16 %v48_v7, %v47_v6  ;;  %v28_v10 = vld [vmem:[%s8192_s0 + $0x8] sm:$0xff]  ;;  %v29_v11 = vld [vmem:[%s8192_s0 + $0x10] sm:$0xff]  ;;  %s5796_s27 = smov 56   ;;  %s5797_s28 = smov 64  }
   0x4   :  { %5684 = vmatprep.subr.bf16.mxu0 %v5683_v3  ;;  %5502 = vmatprep.mubr.msk.f32.mxu0 %vm54_vm0, %v27_v8  ;;  %v30_v12 = vld [vmem:[%s8192_s0 + $0x18] sm:$0xff]  ;;  %v31_v13 = vld [vmem:[%s8192_s0 + $0x20] sm:$0xff]  ;;  %v32_v14 = vld [vmem:[%s8192_s0 + $0x28] sm:$0xff]  ;;  %v5934_v27 = vadd.s32 8, %v5931_v26  ;;  %v5937_v28 = vadd.s32 16, %v5931_v26  ;;  %v5940_v29 = vadd.s32 24, %v5931_v26 }
   0x5   :  { %5686 = vmatpush3.bf16.msra.mxu0 %v5683_v3  ;;  %v33_v15 = vld [vmem:[%s8192_s0 + $0x30] sm:$0xff]  ;;  %v34_v16 = vld [vmem:[%s8192_s0 + $0x38] sm:$0xff]  ;;  %v35_v17 = vld [vmem:[%s8192_s0 + $0x40] sm:$0xff]  ;;  %v393_v30 = vand.u32 31, %v5931_v26  ;;  %v329_v38 = vshra.s32 %v5931_v26, 5  ;;  %s5798_s29 = smov 72  }
   0x6   :  { %5688 = vmatprep.subr.bf16.mxu0 %v5687_v5  ;;  %v36_v18 = vld [vmem:[%s8192_s0 + $0x48] sm:$0xff]  ;;  %v37_v19 = vld [vmem:[%s8192_s0 + $0x50] sm:$0xff]  ;;  %v38_v20 = vld [vmem:[%s8192_s0 + $0x58] sm:$0xff]  ;;  %v394_v31 = vand.u32 31, %v5934_v27  ;;  %v395_v32 = vand.u32 31, %v5937_v28  ;;  %v396_v33 = vand.u32 31, %v5940_v29 }
   0x7   :  { %v39_v21 = vld [vmem:[%s8192_s0 + $0x60] sm:$0xff]  ;;  %v40_v22 = vld [vmem:[%s8192_s0 + $0x68] sm:$0xff]  ;;  %v41_v23 = vld [vmem:[%s8192_s0 + $0x70] sm:$0xff]  ;;  %v649_v34 = vand.u32 15, %v393_v30  ;;  %v330_v39 = vshra.s32 %v5934_v27, 5  ;;  %v331_v42 = vshra.s32 %v5937_v28, 5 }
   0x8   :  { %v42_v24 = vld [vmem:[%s8192_s0 + $0x78] sm:$0xff]  ;;  %v650_v35 = vand.u32 15, %v394_v31  ;;  %v5946_v36 = vand.u32 15, %v395_v32  ;;  %v5948_v37 = vand.u32 15, %v396_v33  ;;  %v332_v43 = vshra.s32 %v5940_v29, 5  ;;  %s5799_s30 = smov 80  }
   0x9   :  { %5690 = vmatpush3.bf16.msra.mxu0 %v5687_v5  ;;  %v713_v40 = vshra.s32 %v649_v34, 2  ;;  %v457_v46 = vshra.s32 %v329_v38, 2  ;;  %v458_v47 = vshra.s32 %v330_v39, 2  ;;  %v459_v50 = vshra.s32 %v331_v42, 2  ;;  %s5800_s8 = smov 88   ;;  %s5801_s13 = smov 96  }
   0xa   :  { %5692 = vmatprep.subr.bf16.mxu0 %v5691_v9  ;;  %v714_v41 = vshra.s32 %v650_v35, 2  ;;  %v715_v44 = vshra.s32 %v5946_v36, 2  ;;  %v716_v45 = vshra.s32 %v5948_v37, 2  ;;  %v460_v51 = vshra.s32 %v332_v43, 2  ;;  %s5802_s18 = smov 104  }
   0xb   :  { %v841_v48 = vmul.u32 2, %v713_v40  ;;  %v585_v54 = vshra.s32 %v393_v30, 4  ;;  %v586_v55 = vshra.s32 %v394_v31, 4  ;;  %v777_v56 = vand.u32 3, %v649_v34 }
   0xc   :  { %v842_v49 = vmul.u32 2, %v714_v41  ;;  %v843_v52 = vmul.u32 2, %v715_v44  ;;  %v778_v57 = vand.u32 3, %v650_v35  ;;  %v587_v60 = vshra.s32 %v395_v32, 4 }
   0xd   :  { %5694 = vmatpush3.bf16.msra.mxu0 %v5691_v9  ;;  %v844_v53 = vmul.u32 2, %v716_v45  ;;  %v905_v58 = vadd.s32 %v841_v48, %v457_v46  ;;  %v588_v61 = vshra.s32 %v396_v33, 4  ;;  %v521_v62 = vand.u32 3, %v329_v38 }
   0xe   :  { %v906_v59 = vadd.s32 %v842_v49, %v458_v47  ;;  %v522_v63 = vand.u32 3, %v330_v39  ;;  %v1033_v0 = vmul.u32 2, %v777_v56  ;;  %v1034_v1 = vmul.u32 2, %v778_v57 }
   0xf   :  { %v5052_v2 = vadd.s32 4294967295, %v905_v58  ;;  %v1225_v4 = vmul.u32 8, %v585_v54  ;;  %v1226_v5 = vmul.u32 8, %v586_v55  ;;  %v523_v8 = vand.u32 3, %v331_v42 }
  0x10   :  { %5503 = vmatmul.mubr.msk.f32.vlgmr.msra.gmra.mrb[0].mxu0 %vm54_vm0, %v28_v10  ;;  %v5053_v3 = vadd.s32 4294967295, %v906_v59  ;;  %v1097_v6 = vadd.s32 %v1033_v0, %v521_v62  ;;  %v1098_v7 = vadd.s32 %v1034_v1, %v522_v63  ;;  %v524_v9 = vand.u32 3, %v332_v43 }
  0x11   :  { %5505 = vmatprep.mubr.msk.f32.mxu0 %vm54_vm0, %v29_v11  ;;  %v1289_v10 = vadd.s32 %v5052_v2, %v1225_v4  ;;  %vm1481_vm1 = vcmp.ge.s32.totalorder %v5052_v2, 0  ;;  %vm1545_vm3 = vcmp.lt.s32.totalorder %v5052_v2, 8  ;;  %v1227_v32 = vmul.u32 8, %v587_v60 }
  0x12   :  { %v1290_v11 = vadd.s32 %v5053_v3, %v1226_v5  ;;  %vm1482_vm2 = vcmp.ge.s32.totalorder %v5053_v3, 0  ;;  %vm1546_vm4 = vcmp.lt.s32.totalorder %v5053_v3, 8  ;;  %vm1609_vm7 = vmand %vm1481_vm1, %vm1545_vm3  ;;  %v5962_v33 = vadd.s32 32, %v5931_v26 }
  0x13   :  { %vm1610_vm10 = vmand %vm1482_vm2, %vm1546_vm4  ;;  %v1228_v35 = vmul.u32 8, %v588_v61  ;;  %v5970_v41 = vadd.s32 40, %v5931_v26  ;;  %v8199_v43 = vmov 0.0   ;;  %v5988_v61 = vadd.s32 48, %v5931_v26 }
  0x14   :  { %5506 = vmatmul.mubr.msk.f32.gmra.mrb[2].mxu0 %vm54_vm0, %v30_v12  ;;  %v779_v12 = vand.u32 3, %v5946_v36  ;;  %v333_v42 = vshra.s32 %v5962_v33, 5  ;;  %v5992_v63 = vadd.s32 56, %v5931_v26  ;;  %v5995_v0 = vadd.s32 64, %v5931_v26 }
  0x15   :  { %5508 = vmatprep.mubr.msk.f32.mxu0 %vm54_vm0, %v31_v13  ;;  %v780_v13 = vand.u32 3, %v5948_v37  ;;  %v5998_v1 = vadd.s32 72, %v5931_v26 }
  0x16   :  { %v1035_v30 = vmul.u32 2, %v779_v12  ;;  %v525_v54 = vand.u32 3, %v333_v42 }
  0x17   :  { %v1036_v31 = vmul.u32 2, %v780_v13  ;;  %v399_v13 = vand.u32 31, %v5988_v61 }
  0x18   :  { %5509 = vmatmul.mubr.msk.f32.gmra.mrb[4].mxu0 %vm54_vm0, %v32_v14  ;;  %v5116_v14 = vadd.s32 4294967295, %v1097_v6  ;;  %v1099_v34 = vadd.s32 %v1035_v30, %v523_v8  ;;  %v335_v8 = vshra.s32 %v5988_v61, 5 }
  0x19   :  { %5511 = vmatprep.mubr.msk.f32.mxu0 %vm54_vm0, %v33_v15  ;;  %v5117_v15 = vadd.s32 4294967295, %v1098_v7 }
  0x1a   :  { %vm1673_vm5 = vcmp.ge.s32.totalorder %v5116_v14, 0  ;;  %vm1801_vm8 = vcmp.lt.s32.totalorder %v5116_v14, 8  ;;  %v5118_v37 = vadd.s32 4294967295, %v1099_v34  ;;  %v527_v30 = vand.u32 3, %v335_v8 }
  0x1b   :  { %vm1674_vm6 = vcmp.ge.s32.totalorder %v5117_v15, 0  ;;  %vm1802_vm9 = vcmp.lt.s32.totalorder %v5117_v15, 8  ;;  %vm1737_vm11 = vmand %vm1609_vm7, %vm1673_vm5 }
  0x1c   :  { %5512 = vmatmul.mubr.msk.f32.gmra.mrb[6].mxu0 %vm54_vm0, %v34_v16  ;;  %v907_v16 = vadd.s32 %v843_v52, %v459_v50  ;;  %vm1738_vm12 = vmand %vm1610_vm10, %vm1674_vm6  ;;  %vm1675_vm7 = vcmp.ge.s32.totalorder %v5118_v37, 0  ;;  %v334_v50 = vshra.s32 %v5970_v41, 5  ;;  %v398_v52 = vand.u32 31, %v5970_v41 }
  0x1d   :  { %5514 = vmatprep.mubr.msk.f32.mxu0 %vm54_vm0, %v35_v17  ;;  %v908_v17 = vadd.s32 %v844_v53, %v460_v51  ;;  %vm1865_vm15 = vmand %vm1737_vm11, %vm1801_vm8  ;;  %vm1803_vm8 = vcmp.lt.s32.totalorder %v5118_v37, 8  ;;  %v397_v51 = vand.u32 31, %v5962_v33  ;;  %v461_v53 = vshra.s32 %v333_v42, 2 }
  0x1e   :  { %vm1866_vm2 = vmand %vm1738_vm12, %vm1802_vm9  ;;  %v462_v55 = vshra.s32 %v334_v50, 2  ;;  %v526_v56 = vand.u32 3, %v334_v50  ;;  %v590_v58 = vshra.s32 %v398_v52, 4  ;;  %v654_v60 = vand.u32 15, %v398_v52 }
  0x1f   :  { %v589_v57 = vshra.s32 %v397_v51, 4  ;;  %v653_v59 = vand.u32 15, %v397_v51 }
  0x20   :  { %5515 = vmatmul.mubr.msk.f32.gmra.mrb[8].mxu0 %vm54_vm0, %v36_v18  ;;  %v1353_v18 = vmul.u32 8, %v1289_v10  ;;  %v718_v3 = vshra.s32 %v654_v60, 2  ;;  %v782_v5 = vand.u32 3, %v654_v60  ;;  %v1230_v7 = vmul.u32 8, %v590_v58 }
  0x21   :  { %5517 = vmatprep.mubr.msk.f32.mxu0 %vm54_vm0, %v37_v19  ;;  %v1354_v19 = vmul.u32 8, %v1290_v11  ;;  %v1229_v62 = vmul.u32 8, %v589_v57  ;;  %v717_v2 = vshra.s32 %v653_v59, 2  ;;  %v781_v4 = vand.u32 3, %v653_v59 }
  0x22   :  { %v846_v12 = vmul.u32 2, %v718_v3  ;;  %v338_v57 = vshra.s32 %v5998_v1, 5  ;;  %v402_v3 = vand.u32 31, %v5998_v1 }
  0x23   :  { %v845_v11 = vmul.u32 2, %v717_v2  ;;  %v401_v2 = vand.u32 31, %v5995_v0 }
  0x24   :  { %5518 = vmatmul.mubr.msk.f32.gmra.mrb[10].mxu0 %vm54_vm0, %v38_v20  ;;  %v1417_v20 = vadd.s32 %v5116_v14, %v1353_v18 }
  0x25   :  { %5520 = vmatprep.mubr.msk.f32.mxu0 %vm54_vm0, %v39_v21  ;;  %v1418_v21 = vadd.s32 %v5117_v15, %v1354_v19  ;;  %v1037_v15 = vmul.u32 2, %v781_v4  ;;  %v909_v18 = vadd.s32 %v845_v11, %v461_v53  ;;  %v910_v19 = vadd.s32 %v846_v12, %v462_v55 }
  0x27   :  { %v5057_v34 = vadd.s32 4294967295, %v910_v19 }
  0x28   :  { %5521 = vmatmul.mubr.msk.f32.gmra.mrb[12].mxu0 %vm54_vm0, %v40_v22  ;;  %v5959_v22 = vand.u32 127, %v264_v25  ;;  %v1100_v25 = vadd.s32 %v1036_v31, %v524_v9  ;;  %v336_v9 = vshra.s32 %v5992_v63, 5 }
  0x29   :  { %5523 = vmatprep.mubr.msk.f32.mxu0 %vm54_vm0, %v41_v23  ;;  %v5054_v23 = vadd.s32 4294967295, %v907_v16  ;;  %v1038_v16 = vmul.u32 2, %v782_v5  ;;  %v1294_v42 = vadd.s32 %v5057_v34, %v1230_v7 }
  0x2a   :  { %vm2059_vm13 = vcmp.eq.s32.totalorder %v5959_v22, %v1417_v20  ;;  %vm2060_vm14 = vcmp.eq.s32.totalorder %v5959_v22, %v1418_v21  ;;  %v5119_v39 = vadd.s32 4294967295, %v1100_v25  ;;  %v463_v20 = vshra.s32 %v335_v8, 2 }
  0x2b   :  { %v1291_v36 = vadd.s32 %v5054_v23, %v1227_v32  ;;  %vm1547_vm3 = vcmp.lt.s32.totalorder %v5054_v23, 8  ;;  %vm2251_vm5 = vmand %vm1865_vm15, %vm2059_vm13  ;;  %v464_v21 = vshra.s32 %v336_v9, 2  ;;  %v528_v31 = vand.u32 3, %v336_v9 }
  0x2c   :  { %5524 = vmatmul.mubr.msk.f32.gmra.mrb[14].mxu0 %vm54_vm0, %v42_v24  ;;  %v5055_v24 = vadd.s32 4294967295, %v908_v17  ;;  %vm1483_vm0 = vcmp.ge.s32.totalorder %v5054_v23, 0  ;;  %vm2252_vm6 = vmand %vm1866_vm2, %vm2060_vm14  ;;  %v2315_v44 = vsel %vm2251_vm5, 1.0, %v8199_v43  ;;  %vm1676_vm10 = vcmp.ge.s32.totalorder %v5119_v39, 0 }
  0x2d   :  { %v1355_v40 = vmul.u32 8, %v1291_v36  ;;  %v2316_v46 = vsel %vm2252_vm6, 1.0, %v8199_v43  ;;  %vm1611_vm9 = vmand %vm1483_vm0, %vm1547_vm3  ;;  %vm1804_vm11 = vcmp.lt.s32.totalorder %v5119_v39, 8  ;;  %v400_v17 = vand.u32 31, %v5992_v63 }
  0x2e   :  { %vm1484_vm1 = vcmp.ge.s32.totalorder %v5055_v24, 0  ;;  %v1292_v38 = vadd.s32 %v5055_v24, %v1228_v35  ;;  %vm1548_vm4 = vcmp.lt.s32.totalorder %v5055_v24, 8  ;;  %v2379_v48 = vpack.c.bf16 %v2316_v46, %v2315_v44  ;;  %vm1739_vm13 = vmand %vm1611_vm9, %vm1675_vm7 }
  0x2f   :  { %v1419_v47 = vadd.s32 %v5118_v37, %v1355_v40  ;;  %vm1612_vm12 = vmand %vm1484_vm1, %vm1548_vm4  ;;  %v1101_v23 = vadd.s32 %v1037_v15, %v525_v54  ;;  %v1102_v24 = vadd.s32 %v1038_v16, %v526_v56  ;;  %v5056_v32 = vadd.s32 4294967295, %v909_v18 }
  0x30   :  { %v1356_v45 = vmul.u32 8, %v1292_v38  ;;  %5542 = vmatprep.mubr.bf16.mxu1 %v2379_v48  ;;  %vm1740_vm15 = vmand %vm1612_vm12, %vm1676_vm10  ;;  %v591_v35 = vshra.s32 %v399_v13, 4  ;;  %v592_v25 = vshra.s32 %v400_v17, 4  ;;  %v655_v38 = vand.u32 15, %v399_v13 }
  0x31   :  { %vm2061_vm14 = vcmp.eq.s32.totalorder %v5959_v22, %v1419_v47  ;;  %vm1867_vm1 = vmand %vm1739_vm13, %vm1803_vm8  ;;  %v5120_v36 = vadd.s32 4294967295, %v1101_v23  ;;  %v5121_v37 = vadd.s32 4294967295, %v1102_v24  ;;  %v1293_v40 = vadd.s32 %v5056_v32, %v1229_v62 }
  0x32   :  { %v1420_v49 = vadd.s32 %v5119_v39, %v1356_v45  ;;  %vm1868_vm2 = vmand %vm1740_vm15, %vm1804_vm11  ;;  %v656_v39 = vand.u32 15, %v400_v17  ;;  %vm1485_vm5 = vcmp.ge.s32.totalorder %v5056_v32, 0  ;;  %vm1486_vm6 = vcmp.ge.s32.totalorder %v5057_v34, 0 }
  0x33   :  { %vm2253_vm3 = vmand %vm1867_vm1, %vm2061_vm14  ;;  %vm1549_vm7 = vcmp.lt.s32.totalorder %v5056_v32, 8  ;;  %vm1550_vm8 = vcmp.lt.s32.totalorder %v5057_v34, 8  ;;  %vm1677_vm9 = vcmp.ge.s32.totalorder %v5120_v36, 0  ;;  %vm1678_vm10 = vcmp.ge.s32.totalorder %v5121_v37, 0 }
  0x34   :  { %vm2062_vm0 = vcmp.eq.s32.totalorder %v5959_v22, %v1420_v49  ;;  %v6005_v6 = vsel %vm2253_vm3, 1.0, %v8199_v43  ;;  %v1357_v44 = vmul.u32 8, %v1293_v40  ;;  %v1358_v45 = vmul.u32 8, %v1294_v42  ;;  %vm1613_vm11 = vmand %vm1485_vm5, %vm1549_vm7 }
  0x35   :  { %vm2254_vm4 = vmand %vm1868_vm2, %vm2062_vm0  ;;  %vm1805_vm12 = vcmp.lt.s32.totalorder %v5120_v36, 8  ;;  %vm1806_vm13 = vcmp.lt.s32.totalorder %v5121_v37, 8  ;;  %v719_v46 = vshra.s32 %v655_v38, 2  ;;  %v720_v47 = vshra.s32 %v656_v39, 2 }
  0x36   :  { %v6010_v10 = vsel %vm2254_vm4, 1.0, %v8199_v43  ;;  %vm1614_vm14 = vmand %vm1486_vm6, %vm1550_vm8  ;;  %v783_v48 = vand.u32 3, %v655_v38  ;;  %v784_v49 = vand.u32 3, %v656_v39  ;;  %v1421_v50 = vadd.s32 %v5120_v36, %v1357_v44 }
  0x37   :  { %v1422_v51 = vadd.s32 %v5121_v37, %v1358_v45  ;;  %vm1741_vm15 = vmand %vm1613_vm11, %vm1677_vm9  ;;  %v1231_v52 = vmul.u32 8, %v591_v35  ;;  %v1232_v53 = vmul.u32 8, %v592_v25  ;;  %v337_v56 = vshra.s32 %v5995_v0, 5 }
  0x38   :  { %vm1742_vm0 = vmand %vm1614_vm14, %vm1678_vm10  ;;  %v847_v54 = vmul.u32 2, %v719_v46  ;;  %v848_v55 = vmul.u32 2, %v720_v47  ;;  %vm2063_vm2 = vcmp.eq.s32.totalorder %v5959_v22, %v1421_v50  ;;  %v466_v8 = vshra.s32 %v338_v57, 2 }
  0x39   :  { %vm1869_vm1 = vmand %vm1741_vm15, %vm1805_vm12  ;;  %vm2064_vm3 = vcmp.eq.s32.totalorder %v5959_v22, %v1422_v51  ;;  %v1039_v58 = vmul.u32 2, %v783_v48  ;;  %v1040_v59 = vmul.u32 2, %v784_v49  ;;  %v465_v7 = vshra.s32 %v337_v56, 2 }
  0x3a   :  { %vm1870_vm4 = vmand %vm1742_vm0, %vm1806_vm13  ;;  %v911_v60 = vadd.s32 %v847_v54, %v463_v20  ;;  %v912_v62 = vadd.s32 %v848_v55, %v464_v21  ;;  %v529_v13 = vand.u32 3, %v337_v56  ;;  %v530_v18 = vand.u32 3, %v338_v57 }
  0x3b   :  { %vm2255_vm5 = vmand %vm1869_vm1, %vm2063_vm2  ;;  %v1103_v4 = vadd.s32 %v1039_v58, %v527_v30  ;;  %v1104_v5 = vadd.s32 %v1040_v59, %v528_v31  ;;  %v593_v30 = vshra.s32 %v401_v2, 4  ;;  %v594_v31 = vshra.s32 %v402_v3, 4 }
  0x3c   :  { %vm2256_vm6 = vmand %vm1870_vm4, %vm2064_vm3  ;;  %v6026_v9 = vsel %vm2255_vm5, 1.0, %v8199_v43  ;;  %v5058_v11 = vadd.s32 4294967295, %v911_v60  ;;  %v5059_v12 = vadd.s32 4294967295, %v912_v62  ;;  %v657_v32 = vand.u32 15, %v401_v2 }
  0x3d   :  { %v6029_v15 = vsel %vm2256_vm6, 1.0, %v8199_v43  ;;  %v5122_v16 = vadd.s32 4294967295, %v1103_v4  ;;  %v5123_v17 = vadd.s32 4294967295, %v1104_v5  ;;  %v658_v25 = vand.u32 15, %v402_v3 }
  0x3e   :  { %v1295_v20 = vadd.s32 %v5058_v11, %v1231_v52  ;;  %v1296_v21 = vadd.s32 %v5059_v12, %v1232_v53  ;;  %vm1487_vm7 = vcmp.ge.s32.totalorder %v5058_v11, 0  ;;  %vm1488_vm8 = vcmp.ge.s32.totalorder %v5059_v12, 0 }
  0x3f   :  { %vm1551_vm9 = vcmp.lt.s32.totalorder %v5058_v11, 8  ;;  %vm1552_vm10 = vcmp.lt.s32.totalorder %v5059_v12, 8  ;;  %vm1679_vm11 = vcmp.ge.s32.totalorder %v5122_v16, 0  ;;  %vm1680_vm13 = vcmp.ge.s32.totalorder %v5123_v17, 0 }
  0x40   :  { %v1359_v23 = vmul.u32 8, %v1295_v20  ;;  %v1360_v24 = vmul.u32 8, %v1296_v21  ;;  %vm1615_vm12 = vmand %vm1487_vm7, %vm1551_vm9  ;;  %vm1807_vm14 = vcmp.lt.s32.totalorder %v5122_v16, 8  ;;  %vm1808_vm0 = vcmp.lt.s32.totalorder %v5123_v17, 8 }
  0x41   :  { %vm1616_vm15 = vmand %vm1488_vm8, %vm1552_vm10  ;;  %v6034_v36 = vadd.s32 80, %v5931_v26  ;;  %v721_v37 = vshra.s32 %v657_v32, 2  ;;  %v785_v38 = vand.u32 3, %v657_v32  ;;  %v1233_v39 = vmul.u32 8, %v593_v30 }
  0x42   :  { %v1423_v34 = vadd.s32 %v5122_v16, %v1359_v23  ;;  %v1424_v35 = vadd.s32 %v5123_v17, %v1360_v24  ;;  %vm1743_vm1 = vmand %vm1615_vm12, %vm1679_vm11  ;;  %v1234_v40 = vmul.u32 8, %v594_v31  ;;  %v722_v42 = vshra.s32 %v658_v25, 2 }
  0x43   :  { %vm1744_vm2 = vmand %vm1616_vm15, %vm1680_vm13  ;;  %v786_v44 = vand.u32 3, %v658_v25  ;;  %v849_v45 = vmul.u32 2, %v721_v37  ;;  %v1041_v46 = vmul.u32 2, %v785_v38  ;;  %v6041_v47 = vadd.s32 88, %v5931_v26 }
  0x44   :  { %vm1871_vm3 = vmand %vm1743_vm1, %vm1807_vm14  ;;  %vm2065_vm4 = vcmp.eq.s32.totalorder %v5959_v22, %v1423_v34  ;;  %vm2066_vm5 = vcmp.eq.s32.totalorder %v5959_v22, %v1424_v35  ;;  %v339_v48 = vshra.s32 %v6034_v36, 5  ;;  %v850_v49 = vmul.u32 2, %v722_v42 }
  0x45   :  { %vm1872_vm6 = vmand %vm1744_vm2, %vm1808_vm0  ;;  %v1042_v50 = vmul.u32 2, %v786_v44  ;;  %v403_v51 = vand.u32 31, %v6034_v36  ;;  %v6046_v52 = vadd.s32 96, %v5931_v26  ;;  %v913_v54 = vadd.s32 %v849_v45, %v465_v7 }
  0x46   :  { %vm2257_vm7 = vmand %vm1871_vm3, %vm2065_vm4  ;;  %v1105_v55 = vadd.s32 %v1041_v46, %v529_v13  ;;  %v340_v56 = vshra.s32 %v6041_v47, 5  ;;  %v914_v58 = vadd.s32 %v850_v49, %v466_v8  ;;  %v404_v60 = vand.u32 31, %v6041_v47 }
  0x47   :  { %8254 = vst [vmem:[#allocation3_spill] sm:$0xff] %v6046_v52  ;;  %vm2258_vm8 = vmand %vm1872_vm6, %vm2066_vm5  ;;  %v6049_v53 = vsel %vm2257_vm7, 1.0, %v8199_v43  ;;  %v1106_v59 = vadd.s32 %v1042_v50, %v530_v18  ;;  %v5060_v2 = vadd.s32 4294967295, %v913_v54  ;;  %v467_v4 = vshra.s32 %v339_v48, 2 }
  0x48   :  { %v6053_v57 = vsel %vm2258_vm8, 1.0, %v8199_v43  ;;  %v5124_v3 = vadd.s32 4294967295, %v1105_v55  ;;  %v5061_v5 = vadd.s32 4294967295, %v914_v58  ;;  %v468_v12 = vshra.s32 %v340_v56, 2 }
  0x49   :  { %v5125_v11 = vadd.s32 4294967295, %v1106_v59  ;;  %v531_v7 = vand.u32 3, %v339_v48  ;;  %v1297_v13 = vadd.s32 %v5060_v2, %v1233_v39  ;;  %vm1489_vm9 = vcmp.ge.s32.totalorder %v5060_v2, 0 }
  0x4a   :  { %vm1553_vm10 = vcmp.lt.s32.totalorder %v5060_v2, 8  ;;  %vm1681_vm11 = vcmp.ge.s32.totalorder %v5124_v3, 0  ;;  %v1298_v16 = vadd.s32 %v5061_v5, %v1234_v40  ;;  %vm1490_vm12 = vcmp.ge.s32.totalorder %v5061_v5, 0 }
  0x4b   :  { %vm1554_vm13 = vcmp.lt.s32.totalorder %v5061_v5, 8  ;;  %vm1617_vm14 = vmand %vm1489_vm9, %vm1553_vm10  ;;  %vm1682_vm15 = vcmp.ge.s32.totalorder %v5125_v11, 0  ;;  %v1361_v8 = vmul.u32 8, %v1297_v13  ;;  %vm1809_vm1 = vcmp.lt.s32.totalorder %v5124_v3, 8 }
  0x4c   :  { %vm1618_vm0 = vmand %vm1490_vm12, %vm1554_vm13  ;;  %vm1810_vm2 = vcmp.lt.s32.totalorder %v5125_v11, 8  ;;  %v532_v17 = vand.u32 3, %v340_v56  ;;  %v1362_v18 = vmul.u32 8, %v1298_v16  ;;  %v595_v20 = vshra.s32 %v403_v51, 4 }
  0x4d   :  { %vm1745_vm3 = vmand %vm1617_vm14, %vm1681_vm11  ;;  %v596_v21 = vshra.s32 %v404_v60, 4  ;;  %v659_v23 = vand.u32 15, %v403_v51  ;;  %v1425_v24 = vadd.s32 %v5124_v3, %v1361_v8  ;;  %v660_v30 = vand.u32 15, %v404_v60 }
  0x4e   :  { %vm1746_vm4 = vmand %vm1618_vm0, %vm1682_vm15  ;;  %v6059_v31 = vadd.s32 104, %v5931_v26  ;;  %v341_v32 = vshra.s32 %v6046_v52, 5  ;;  %v1426_v34 = vadd.s32 %v5125_v11, %v1362_v18  ;;  %v1235_v37 = vmul.u32 8, %v595_v20 }
  0x4f   :  { %vm1873_vm5 = vmand %vm1745_vm3, %vm1809_vm1  ;;  %v723_v35 = vshra.s32 %v659_v23, 2  ;;  %v787_v25 = vand.u32 3, %v659_v23  ;;  %vm2067_vm7 = vcmp.eq.s32.totalorder %v5959_v22, %v1425_v24  ;;  %v724_v38 = vshra.s32 %v660_v30, 2 }
  0x50   :  { %8255 = vst [vmem:[#allocation4_spill] sm:$0xff] %v6059_v31  ;;  %vm1874_vm6 = vmand %vm1746_vm4, %vm1810_vm2  ;;  %v788_v39 = vand.u32 3, %v660_v30  ;;  %v1236_v40 = vmul.u32 8, %v596_v21  ;;  %vm2068_vm8 = vcmp.eq.s32.totalorder %v5959_v22, %v1426_v34  ;;  %v342_v45 = vshra.s32 %v6059_v31, 5 }
  0x51   :  { %vm2259_vm9 = vmand %vm1873_vm5, %vm2067_vm7  ;;  %v851_v42 = vmul.u32 2, %v723_v35  ;;  %v1043_v44 = vmul.u32 2, %v787_v25  ;;  %v405_v50 = vand.u32 31, %v6046_v52  ;;  %v406_v56 = vand.u32 31, %v6059_v31 }
  0x52   :  { %vm2260_vm10 = vmand %vm1874_vm6, %vm2068_vm8  ;;  %v6067_v46 = vsel %vm2259_vm9, 1.0, %v8199_v43  ;;  %v852_v48 = vmul.u32 2, %v724_v38  ;;  %v1044_v49 = vmul.u32 2, %v788_v39  ;;  %v469_v2 = vshra.s32 %v341_v32, 2 }
  0x53   :  { %v6071_v51 = vsel %vm2260_vm10, 1.0, %v8199_v43  ;;  %v915_v54 = vadd.s32 %v851_v42, %v467_v4  ;;  %v1107_v55 = vadd.s32 %v1043_v44, %v531_v7  ;;  %v470_v11 = vshra.s32 %v342_v45, 2 }
  0x54   :  { %v916_v59 = vadd.s32 %v852_v48, %v468_v12  ;;  %v1108_v60 = vadd.s32 %v1044_v49, %v532_v17  ;;  %v533_v13 = vand.u32 3, %v341_v32  ;;  %v534_v18 = vand.u32 3, %v342_v45 }
  0x55   :  { %v5062_v3 = vadd.s32 4294967295, %v915_v54  ;;  %v5126_v5 = vadd.s32 4294967295, %v1107_v55  ;;  %v597_v20 = vshra.s32 %v405_v50, 4  ;;  %v598_v7 = vshra.s32 %v406_v56, 4 }
  0x56   :  { %v5063_v16 = vadd.s32 4294967295, %v916_v59  ;;  %v5127_v8 = vadd.s32 4294967295, %v1108_v60  ;;  %v661_v23 = vand.u32 15, %v405_v50  ;;  %v662_v24 = vand.u32 15, %v406_v56 }
  0x57   :  { %v1299_v21 = vadd.s32 %v5062_v3, %v1235_v37  ;;  %vm1491_vm11 = vcmp.ge.s32.totalorder %v5062_v3, 0  ;;  %vm1555_vm12 = vcmp.lt.s32.totalorder %v5062_v3, 8  ;;  %vm1683_vm13 = vcmp.ge.s32.totalorder %v5126_v5, 0 }
  0x58   :  { %v1300_v4 = vadd.s32 %v5063_v16, %v1236_v40  ;;  %vm1492_vm14 = vcmp.ge.s32.totalorder %v5063_v16, 0  ;;  %vm1556_vm15 = vcmp.lt.s32.totalorder %v5063_v16, 8  ;;  %vm1619_vm0 = vmand %vm1491_vm11, %vm1555_vm12  ;;  %vm1684_vm1 = vcmp.ge.s32.totalorder %v5127_v8, 0 }
  0x59   :  { %v1363_v12 = vmul.u32 8, %v1299_v21  ;;  %vm1620_vm2 = vmand %vm1492_vm14, %vm1556_vm15  ;;  %vm1811_vm3 = vcmp.lt.s32.totalorder %v5126_v5, 8  ;;  %vm1812_vm4 = vcmp.lt.s32.totalorder %v5127_v8, 8  ;;  %v1237_v30 = vmul.u32 8, %v597_v20 }
  0x5a   :  { %v1364_v17 = vmul.u32 8, %v1300_v4  ;;  %vm1747_vm5 = vmand %vm1619_vm0, %vm1683_vm13  ;;  %v1238_v34 = vmul.u32 8, %v598_v7  ;;  %v6077_v35 = vadd.s32 112, %v5931_v26  ;;  %v6080_v25 = vadd.s32 120, %v5931_v26 }
  0x5b   :  { %v1427_v32 = vadd.s32 %v5126_v5, %v1363_v12  ;;  %vm1748_vm6 = vmand %vm1620_vm2, %vm1684_vm1  ;;  %v725_v38 = vshra.s32 %v661_v23, 2  ;;  %v726_v39 = vshra.s32 %v662_v24, 2  ;;  %v789_v40 = vand.u32 3, %v661_v23 }
  0x5c   :  { %8256 = vst [vmem:[#allocation5_spill] sm:$0xff] %v6077_v35  ;;  %8257 = vst [vmem:[#allocation6_spill] sm:$0xff] %v6080_v25  ;;  %v1428_v37 = vadd.s32 %v5127_v8, %v1364_v17  ;;  %v790_v42 = vand.u32 3, %v662_v24  ;;  %v343_v44 = vshra.s32 %v6077_v35, 5  ;;  %v344_v45 = vshra.s32 %v6080_v25, 5 }
  0x5d   :  { %vm1875_vm7 = vmand %vm1747_vm5, %vm1811_vm3  ;;  %vm2069_vm9 = vcmp.eq.s32.totalorder %v5959_v22, %v1427_v32  ;;  %v853_v48 = vmul.u32 2, %v725_v38  ;;  %v854_v49 = vmul.u32 2, %v726_v39  ;;  %v407_v50 = vand.u32 31, %v6077_v35 }
  0x5e   :  { %vm1876_vm8 = vmand %vm1748_vm6, %vm1812_vm4  ;;  %vm2070_vm10 = vcmp.eq.s32.totalorder %v5959_v22, %v1428_v37  ;;  %v1045_v55 = vmul.u32 2, %v789_v40  ;;  %v1046_v56 = vmul.u32 2, %v790_v42  ;;  %v408_v59 = vand.u32 31, %v6080_v25 }
  0x5f   :  { %vm2261_vm11 = vmand %vm1875_vm7, %vm2069_vm9  ;;  %v917_v3 = vadd.s32 %v853_v48, %v469_v2  ;;  %v918_v5 = vadd.s32 %v854_v49, %v470_v11  ;;  %v471_v16 = vshra.s32 %v343_v44, 2  ;;  %v472_v4 = vshra.s32 %v344_v45, 2 }
  0x60   :  { %vm2262_vm12 = vmand %vm1876_vm8, %vm2070_vm10  ;;  %v6089_v54 = vsel %vm2261_vm11, 1.0, %v8199_v43  ;;  %v1109_v20 = vadd.s32 %v1045_v55, %v533_v13  ;;  %v1110_v21 = vadd.s32 %v1046_v56, %v534_v18  ;;  %v535_v17 = vand.u32 3, %v343_v44 }
  0x61   :  { %v6093_v60 = vsel %vm2262_vm12, 1.0, %v8199_v43  ;;  %v5064_v12 = vadd.s32 4294967295, %v917_v3  ;;  %v5065_v7 = vadd.s32 4294967295, %v918_v5  ;;  %v536_v23 = vand.u32 3, %v344_v45 }
  0x62   :  { %v5128_v24 = vadd.s32 4294967295, %v1109_v20  ;;  %v5129_v32 = vadd.s32 4294967295, %v1110_v21  ;;  %v6097_v37 = vshra.s32 %v407_v50, 4  ;;  %v6099_v38 = vshra.s32 %v408_v59, 4 }
  0x63   :  { %v1301_v39 = vadd.s32 %v5064_v12, %v1237_v30  ;;  %v1302_v2 = vadd.s32 %v5065_v7, %v1238_v34  ;;  %vm1493_vm13 = vcmp.ge.s32.totalorder %v5064_v12, 0  ;;  %vm1494_vm14 = vcmp.ge.s32.totalorder %v5065_v7, 0 }
  0x64   :  { %vm1557_vm15 = vcmp.lt.s32.totalorder %v5064_v12, 8  ;;  %vm1558_vm0 = vcmp.lt.s32.totalorder %v5065_v7, 8  ;;  %vm1685_vm1 = vcmp.ge.s32.totalorder %v5128_v24, 0  ;;  %vm1686_vm2 = vcmp.ge.s32.totalorder %v5129_v32, 0 }
  0x65   :  { %v1365_v11 = vmul.u32 8, %v1301_v39  ;;  %v1366_v13 = vmul.u32 8, %v1302_v2  ;;  %vm1621_vm3 = vmand %vm1493_vm13, %vm1557_vm15  ;;  %vm1813_vm4 = vcmp.lt.s32.totalorder %v5128_v24, 8  ;;  %vm1814_vm5 = vcmp.lt.s32.totalorder %v5129_v32, 8 }
  0x66   :  { %vm1622_vm6 = vmand %vm1494_vm14, %vm1558_vm0  ;;  %v663_v18 = vand.u32 15, %v407_v50  ;;  %v664_v40 = vand.u32 15, %v408_v59  ;;  %v1239_v42 = vmul.u32 8, %v6097_v37  ;;  %v1240_v44 = vmul.u32 8, %v6099_v38 }
  0x67   :  { %v1429_v30 = vadd.s32 %v5128_v24, %v1365_v11  ;;  %v1430_v34 = vadd.s32 %v5129_v32, %v1366_v13  ;;  %vm1749_vm7 = vmand %vm1621_vm3, %vm1685_vm1  ;;  %v281_v45 = vadd.s32 128, %v5931_v26  ;;  %v282_v48 = vadd.s32 136, %v5931_v26 }
  0x68   :  { %vm1750_vm8 = vmand %vm1622_vm6, %vm1686_vm2  ;;  %v727_v49 = vshra.s32 %v663_v18, 2  ;;  %v728_v55 = vshra.s32 %v664_v40, 2  ;;  %v791_v56 = vand.u32 3, %v663_v18  ;;  %v792_v3 = vand.u32 3, %v664_v40 }
  0x69   :  { %vm1877_vm9 = vmand %vm1749_vm7, %vm1813_vm4  ;;  %vm2071_vm10 = vcmp.eq.s32.totalorder %v5959_v22, %v1429_v30  ;;  %vm2072_vm11 = vcmp.eq.s32.totalorder %v5959_v22, %v1430_v34  ;;  %v345_v50 = vshra.s32 %v281_v45, 5  ;;  %v346_v59 = vshra.s32 %v282_v48, 5 }
  0x6a   :  { %vm1878_vm12 = vmand %vm1750_vm8, %vm1814_vm5  ;;  %v855_v5 = vmul.u32 2, %v727_v49  ;;  %v856_v20 = vmul.u32 2, %v728_v55  ;;  %v409_v21 = vand.u32 31, %v281_v45  ;;  %v410_v12 = vand.u32 31, %v282_v48 }
  0x6b   :  { %vm2263_vm13 = vmand %vm1877_vm9, %vm2071_vm10  ;;  %v1047_v7 = vmul.u32 2, %v791_v56  ;;  %v1048_v37 = vmul.u32 2, %v792_v3  ;;  %v473_v38 = vshra.s32 %v345_v50, 2  ;;  %v6110_v39 = vshra.s32 %v346_v59, 2 }
  0x6c   :  { %vm2264_vm14 = vmand %vm1878_vm12, %vm2072_vm11  ;;  %v6113_v24 = vsel %vm2263_vm13, 1.0, %v8199_v43  ;;  %v919_v2 = vadd.s32 %v855_v5, %v471_v16  ;;  %v920_v11 = vadd.s32 %v856_v20, %v472_v4  ;;  %v537_v13 = vand.u32 3, %v345_v50 }
  0x6d   :  { %v6116_v32 = vsel %vm2264_vm14, 1.0, %v8199_v43  ;;  %v1111_v18 = vadd.s32 %v1047_v7, %v535_v17  ;;  %v1112_v40 = vadd.s32 %v1048_v37, %v536_v23  ;;  %v538_v30 = vand.u32 3, %v346_v59 }
  0x6e   :  { %v5066_v45 = vadd.s32 4294967295, %v919_v2  ;;  %v5067_v48 = vadd.s32 4294967295, %v920_v11  ;;  %v6120_v49 = vshra.s32 %v409_v21, 4  ;;  %v6122_v3 = vshra.s32 %v410_v12, 4 }
  0x6f   :  { %v5130_v55 = vadd.s32 4294967295, %v1111_v18  ;;  %v5131_v56 = vadd.s32 4294967295, %v1112_v40  ;;  %v665_v16 = vand.u32 15, %v409_v21  ;;  %v666_v59 = vand.u32 15, %v410_v12 }
  0x70   :  { %v1303_v4 = vadd.s32 %v5066_v45, %v1239_v42  ;;  %v1304_v50 = vadd.s32 %v5067_v48, %v1240_v44  ;;  %vm1495_vm15 = vcmp.ge.s32.totalorder %v5066_v45, 0  ;;  %vm1496_vm0 = vcmp.ge.s32.totalorder %v5067_v48, 0 }
  0x71   :  { %vm1559_vm1 = vcmp.lt.s32.totalorder %v5066_v45, 8  ;;  %vm1560_vm2 = vcmp.lt.s32.totalorder %v5067_v48, 8  ;;  %vm1687_vm3 = vcmp.ge.s32.totalorder %v5130_v55, 0  ;;  %vm1688_vm4 = vcmp.ge.s32.totalorder %v5131_v56, 0 }
  0x72   :  { %v1367_v17 = vmul.u32 8, %v1303_v4  ;;  %v1368_v23 = vmul.u32 8, %v1304_v50  ;;  %vm1623_vm5 = vmand %vm1495_vm15, %vm1559_vm1  ;;  %vm1815_vm6 = vcmp.lt.s32.totalorder %v5130_v55, 8  ;;  %vm1816_vm7 = vcmp.lt.s32.totalorder %v5131_v56, 8 }
  0x73   :  { %vm1624_vm8 = vmand %vm1496_vm0, %vm1560_vm2  ;;  %v729_v5 = vshra.s32 %v665_v16, 2  ;;  %v793_v20 = vand.u32 3, %v665_v16  ;;  %v1241_v7 = vmul.u32 8, %v6120_v49  ;;  %v1242_v44 = vmul.u32 8, %v6122_v3 }
  0x74   :  { %v1431_v21 = vadd.s32 %v5130_v55, %v1367_v17  ;;  %v1432_v42 = vadd.s32 %v5131_v56, %v1368_v23  ;;  %vm1751_vm9 = vmand %vm1623_vm5, %vm1687_vm3  ;;  %v6127_v37 = vadd.s32 144, %v5931_v26  ;;  %v730_v2 = vshra.s32 %v666_v59, 2  ;;  %v6141_v55 = vld [vmem:[%s8193_s6] ss:$0 sm:$0xff] }
  0x75   :  { %vm1752_vm10 = vmand %vm1624_vm8, %vm1688_vm4  ;;  %v794_v11 = vand.u32 3, %v666_v59  ;;  %v857_v18 = vmul.u32 2, %v729_v5  ;;  %v1049_v40 = vmul.u32 2, %v793_v20  ;;  %v6134_v12 = vadd.s32 152, %v5931_v26 }
  0x76   :  { %vm1879_vm11 = vmand %vm1751_vm9, %vm1815_vm6  ;;  %vm2073_vm12 = vcmp.eq.s32.totalorder %v5959_v22, %v1431_v21  ;;  %vm2074_vm13 = vcmp.eq.s32.totalorder %v5959_v22, %v1432_v42  ;;  %v347_v45 = vshra.s32 %v6127_v37, 5  ;;  %v858_v48 = vmul.u32 2, %v730_v2 }
  0x77   :  { %vm1880_vm14 = vmand %vm1752_vm10, %vm1816_vm7  ;;  %v921_v49 = vadd.s32 %v857_v18, %v473_v38  ;;  %v1050_v3 = vmul.u32 2, %v794_v11  ;;  %v1113_v16 = vadd.s32 %v1049_v40, %v537_v13  ;;  %v348_v4 = vshra.s32 %v6134_v12, 5 }
  0x78   :  { %vm2265_vm15 = vmand %vm1879_vm11, %vm2073_vm12  ;;  %v411_v50 = vand.u32 31, %v6127_v37  ;;  %v412_v17 = vand.u32 31, %v6134_v12  ;;  %v6146_v23 = vshra.s32 %v347_v45, 2  ;;  %v922_v38 = vadd.s32 %v858_v48, %v6110_v39 }
  0x79   :  { %vm2266_vm0 = vmand %vm1880_vm14, %vm2074_vm13  ;;  %v6149_v56 = vsel %vm2265_vm15, 1.0, %v8199_v43  ;;  %v5068_v13 = vadd.s32 4294967295, %v921_v49  ;;  %v1114_v59 = vadd.s32 %v1050_v3, %v538_v30  ;;  %v5132_v21 = vadd.s32 4294967295, %v1113_v16 }
  0x7a   :  { %v6153_v20 = vsel %vm2266_vm0, 1.0, %v8199_v43  ;;  %v6155_v42 = vshra.s32 %v348_v4, 2  ;;  %v6157_v37 = vand.u32 3, %v347_v45  ;;  %v5069_v40 = vadd.s32 4294967295, %v922_v38 }
  0x7b   :  { %v5133_v12 = vadd.s32 4294967295, %v1114_v59  ;;  %v1305_v30 = vadd.s32 %v5068_v13, %v1241_v7  ;;  %vm1497_vm1 = vcmp.ge.s32.totalorder %v5068_v13, 0  ;;  %vm1561_vm2 = vcmp.lt.s32.totalorder %v5068_v13, 8 }
  0x7c   :  { %v1306_v49 = vadd.s32 %v5069_v40, %v1242_v44  ;;  %vm1498_vm3 = vcmp.ge.s32.totalorder %v5069_v40, 0  ;;  %vm1562_vm4 = vcmp.lt.s32.totalorder %v5069_v40, 8  ;;  %vm1625_vm5 = vmand %vm1497_vm1, %vm1561_vm2  ;;  %vm1689_vm7 = vcmp.ge.s32.totalorder %v5132_v21, 0 }
  0x7d   :  { %v1369_v16 = vmul.u32 8, %v1305_v30  ;;  %vm1626_vm6 = vmand %vm1498_vm3, %vm1562_vm4  ;;  %vm1690_vm8 = vcmp.ge.s32.totalorder %v5133_v12, 0  ;;  %vm1817_vm10 = vcmp.lt.s32.totalorder %v5132_v21, 8  ;;  %vm1818_vm11 = vcmp.lt.s32.totalorder %v5133_v12, 8 }
  0x7e   :  { %v1370_v59 = vmul.u32 8, %v1306_v49  ;;  %vm1753_vm9 = vmand %vm1625_vm5, %vm1689_vm7  ;;  %v604_v30 = vshra.s32 %v412_v17, 4  ;;  %v667_v49 = vand.u32 15, %v411_v50 }
  0x7f   :  { %v1433_v44 = vadd.s32 %v5132_v21, %v1369_v16  ;;  %vm1754_vm12 = vmand %vm1626_vm6, %vm1690_vm8 }
  0x80   :  { %v1434_v40 = vadd.s32 %v5133_v12, %v1370_v59  ;;  %vm1881_vm13 = vmand %vm1753_vm9, %vm1817_vm10  ;;  %v1244_v21 = vmul.u32 8, %v604_v30  ;;  %v731_v16 = vshra.s32 %v667_v49, 2 }
  0x81   :  { %vm1882_vm14 = vmand %vm1754_vm12, %vm1818_vm11  ;;  %vm2075_vm15 = vcmp.eq.s32.totalorder %v5959_v22, %v1433_v44 }
  0x82   :  { %vm2076_vm0 = vcmp.eq.s32.totalorder %v5959_v22, %v1434_v40  ;;  %vm2267_vm1 = vmand %vm1881_vm13, %vm2075_vm15  ;;  %v859_v44 = vmul.u32 2, %v731_v16  ;;  %v6186_v16 = vadd.s32 168, %v5931_v26 }
  0x83   :  { %vm2268_vm2 = vmand %vm1882_vm14, %vm2076_vm0 }
  0xe3   :  { %v5504_v5 = vpop.f32.mrb[0].mxu0 }
  0xe4   :  { %v175_v2 = vadd.f32 %v5504_v5, %v6141_v55  ;;  %v169_v11 = vpop.f32.mrb[1].mxu0 }
  0xe5   :  { %v170_v39 = vadd.f32 %v6141_v55, %v169_v11 }
  0xe6   :  { %v249_v48 = vmax.f32 %v175_v2, 0.0  ;;  %v540_v2 = vand.u32 3, %v348_v4 }
  0xe7   :  { %v248_v45 = vmax.f32 %v170_v39, 0.0  ;;  %v5507_v3 = vpop.f32.mrb[2].mxu0  ;;  %v603_v39 = vshra.s32 %v411_v50, 4  ;;  %v6173_v50 = vsel %vm2268_vm2, 1.0, %v8199_v43 }
  0xe8   :  { %v185_v5 = vadd.f32 %v5507_v3, %v6141_v55  ;;  %v179_v38 = vpop.f32.mrb[3].mxu0  ;;  %v668_v3 = vand.u32 15, %v412_v17  ;;  %v795_v17 = vand.u32 3, %v667_v49 }
  0xe9   :  { %v180_v7 = vadd.f32 %v6141_v55, %v179_v38  ;;  %v2411_v13 = vpack.c.bf16 %v249_v48, %v248_v45  ;;  %v1243_v4 = vmul.u32 8, %v603_v39  ;;  %v6170_v45 = vsel %vm2267_vm1, 1.0, %v8199_v43 }
  0xea   :  { %v251_v11 = vmax.f32 %v185_v5, 0.0  ;;  %v1051_v30 = vmul.u32 2, %v795_v17 }
  0xeb   :  { %v250_v18 = vmax.f32 %v180_v7, 0.0  ;;  %v5510_v34 = vpop.f32.mrb[4].mxu0  ;;  %5526 = vmatprep.subr.bf16.mxu1 %v2411_v13 }
  0xec   :  { %v195_v8 = vadd.f32 %v5510_v34, %v6141_v55  ;;  %v189_v38 = vpop.f32.mrb[5].mxu0  ;;  %5527 = vmatpush3.bf16.msra.mxu1 %v2411_v13  ;;  %v732_v34 = vshra.s32 %v668_v3, 2 }
  0xed   :  { %v2412_v12 = vpack.c.bf16 %v251_v11, %v250_v18  ;;  %v190_v48 = vadd.f32 %v6141_v55, %v189_v38  ;;  %v796_v18 = vand.u32 3, %v668_v3  ;;  %v1115_v3 = vadd.s32 %v1051_v30, %v6157_v37 }
  0xee   :  { %v253_v5 = vmax.f32 %v195_v8, 0.0  ;;  %v860_v39 = vmul.u32 2, %v732_v34  ;;  %v6179_v8 = vadd.s32 160, %v5931_v26 }
  0xef   :  { %v252_v59 = vmax.f32 %v190_v48, 0.0  ;;  %v5513_v7 = vpop.f32.mrb[6].mxu0  ;;  %5528 = vmatprep.subr.bf16.mxu1 %v2412_v12  ;;  %v923_v48 = vadd.s32 %v859_v44, %v6146_v23  ;;  %v1052_v58 = vmul.u32 2, %v796_v18  ;;  %v5134_v18 = vadd.s32 4294967295, %v1115_v3 }
  0xf0   :  { %v205_v11 = vadd.f32 %v5513_v7, %v6141_v55  ;;  %v199_v40 = vpop.f32.mrb[7].mxu0  ;;  %5529 = vmatpush3.bf16.msra.mxu1 %v2412_v12  ;;  %v924_v13 = vadd.s32 %v860_v39, %v6155_v42  ;;  %v350_v42 = vshra.s32 %v6186_v16, 5 }
  0xf1   :  { %v2413_v38 = vpack.c.bf16 %v253_v5, %v252_v59  ;;  %v200_v49 = vadd.f32 %v6141_v55, %v199_v40  ;;  %v5070_v17 = vadd.s32 4294967295, %v923_v48  ;;  %v1116_v7 = vadd.s32 %v1052_v58, %v540_v2 }
  0xf2   :  { %v255_v62 = vmax.f32 %v205_v11, 0.0  ;;  %v349_v5 = vshra.s32 %v6179_v8, 5  ;;  %v5071_v23 = vadd.s32 4294967295, %v924_v13  ;;  %vm1691_vm8 = vcmp.ge.s32.totalorder %v5134_v18, 0 }
  0xf3   :  { %v254_v12 = vmax.f32 %v200_v49, 0.0  ;;  %v5516_v34 = vpop.f32.mrb[8].mxu0  ;;  %5530 = vmatprep.subr.bf16.mxu1 %v2413_v38  ;;  %v5135_v11 = vadd.s32 4294967295, %v1116_v7  ;;  %v1307_v39 = vadd.s32 %v5070_v17, %v1243_v4  ;;  %vm1499_vm3 = vcmp.ge.s32.totalorder %v5070_v17, 0 }
  0xf4   :  { %v215_v59 = vadd.f32 %v5516_v34, %v6141_v55  ;;  %v209_v40 = vpop.f32.mrb[9].mxu0  ;;  %5531 = vmatpush3.bf16.msra.mxu1 %v2413_v38  ;;  %v1308_v49 = vadd.s32 %v5071_v23, %v1244_v21  ;;  %vm1500_vm4 = vcmp.ge.s32.totalorder %v5071_v23, 0  ;;  %vm1563_vm5 = vcmp.lt.s32.totalorder %v5070_v17, 8 }
  0xf5   :  { %v2414_v44 = vpack.c.bf16 %v255_v62, %v254_v12  ;;  %v210_v37 = vadd.f32 %v6141_v55, %v209_v40  ;;  %v1371_v48 = vmul.u32 8, %v1307_v39  ;;  %vm1564_vm6 = vcmp.lt.s32.totalorder %v5071_v23, 8  ;;  %vm1627_vm7 = vmand %vm1499_vm3, %vm1563_vm5 }
  0xf6   :  { %v257_v30 = vmax.f32 %v215_v59, 0.0  ;;  %v1372_v3 = vmul.u32 8, %v1308_v49  ;;  %vm1692_vm9 = vcmp.ge.s32.totalorder %v5135_v11, 0  ;;  %vm1628_vm10 = vmand %vm1500_vm4, %vm1564_vm6  ;;  %vm1819_vm11 = vcmp.lt.s32.totalorder %v5134_v18, 8 }
  0xf7   :  { %v256_v58 = vmax.f32 %v210_v37, 0.0  ;;  %v5519_v2 = vpop.f32.mrb[10].mxu0  ;;  %5532 = vmatprep.subr.bf16.mxu1 %v2414_v44  ;;  %v1435_v21 = vadd.s32 %v5134_v18, %v1371_v48  ;;  %vm1755_vm12 = vmand %vm1627_vm7, %vm1691_vm8  ;;  %vm1820_vm13 = vcmp.lt.s32.totalorder %v5135_v11, 8  ;;  %v413_v17 = vand.u32 31, %v6179_v8 }
  0xf8   :  { %v225_v13 = vadd.f32 %v5519_v2, %v6141_v55  ;;  %v219_v38 = vpop.f32.mrb[11].mxu0  ;;  %5533 = vmatpush3.bf16.msra.mxu1 %v2414_v44  ;;  %v1436_v34 = vadd.s32 %v5135_v11, %v1372_v3  ;;  %vm1756_vm14 = vmand %vm1628_vm10, %vm1692_vm9  ;;  %v414_v40 = vand.u32 31, %v6186_v16  ;;  %v477_v44 = vshra.s32 %v349_v5, 2 }
  0xf9   :  { %v2415_v62 = vpack.c.bf16 %v257_v30, %v256_v58  ;;  %v220_v4 = vadd.f32 %v6141_v55, %v219_v38  ;;  %vm2077_vm15 = vcmp.eq.s32.totalorder %v5959_v22, %v1435_v21  ;;  %vm1883_vm0 = vmand %vm1755_vm12, %vm1819_vm11  ;;  %v478_v39 = vshra.s32 %v350_v42, 2 }
  0xfa   :  { %v259_v12 = vmax.f32 %v225_v13, 0.0  ;;  %vm2078_vm1 = vcmp.eq.s32.totalorder %v5959_v22, %v1436_v34  ;;  %v541_v30 = vand.u32 3, %v349_v5  ;;  %vm1884_vm2 = vmand %vm1756_vm14, %vm1820_vm13  ;;  %v542_v58 = vand.u32 3, %v350_v42 }
  0xfb   :  { %v258_v7 = vmax.f32 %v220_v4, 0.0  ;;  %v5522_v59 = vpop.f32.mrb[12].mxu0  ;;  %5534 = vmatprep.subr.bf16.mxu1 %v2415_v62  ;;  %v605_v2 = vshra.s32 %v413_v17, 4  ;;  %vm2269_vm3 = vmand %vm1883_vm0, %vm2077_vm15  ;;  %v606_v16 = vshra.s32 %v414_v40, 4  ;;  %v669_v13 = vand.u32 15, %v413_v17 }
  0xfc   :  { %v235_v37 = vadd.f32 %v5522_v59, %v6141_v55  ;;  %v229_v23 = vpop.f32.mrb[13].mxu0  ;;  %5535 = vmatpush3.bf16.msra.mxu1 %v2415_v62  ;;  %v670_v38 = vand.u32 15, %v414_v40  ;;  %vm2270_vm4 = vmand %vm1884_vm2, %vm2078_vm1  ;;  %v6208_v5 = vsel %vm2269_vm3, 1.0, %v8199_v43  ;;  %v287_v42 = vadd.s32 176, %v5931_v26 }
  0xfd   :  { %v2416_v8 = vpack.c.bf16 %v259_v12, %v258_v7  ;;  %v230_v49 = vadd.f32 %v6141_v55, %v229_v23  ;;  %v1245_v11 = vmul.u32 8, %v605_v2  ;;  %v6213_v21 = vsel %vm2270_vm4, 1.0, %v8199_v43 }
  0xfe   :  { %v261_v48 = vmax.f32 %v235_v37, 0.0  ;;  %v733_v12 = vshra.s32 %v669_v13, 2  ;;  %v734_v17 = vshra.s32 %v670_v38, 2  ;;  %v797_v40 = vand.u32 3, %v669_v13 }
  0xff   :  { %v260_v18 = vmax.f32 %v230_v49, 0.0  ;;  %v5525_v3 = vpop.f32.mrb[14].mxu0  ;;  %5536 = vmatprep.subr.bf16.mxu1 %v2416_v8  ;;  %v798_v23 = vand.u32 3, %v670_v38  ;;  %v288_v43 = vadd.s32 184, %v5931_v26  ;;  %v415_v34 = vand.u32 31, %v287_v42 }
 0x100   :  { %v245_v62 = vadd.f32 %v5525_v3, %v6141_v55  ;;  %v239_v4 = vpop.f32.mrb[15].mxu0  ;;  %5537 = vmatpush3.bf16.msra.mxu1 %v2416_v8  ;;  %v861_v49 = vmul.u32 2, %v733_v12  ;;  %v862_v2 = vmul.u32 2, %v734_v17 }
 0x101   :  { %v2417_v7 = vpack.c.bf16 %v261_v48, %v260_v18  ;;  %v240_v59 = vadd.f32 %v6141_v55, %v239_v4  ;;  %v1053_v3 = vmul.u32 2, %v797_v40  ;;  %v1246_v8 = vmul.u32 8, %v606_v16 }
 0x102   :  { %v263_v37 = vmax.f32 %v245_v62, 0.0  ;;  %v925_v14 = vadd.s32 %v861_v49, %v477_v44  ;;  %v926_v25 = vadd.s32 %v862_v2, %v478_v39  ;;  %v1054_v48 = vmul.u32 2, %v798_v23 }
 0x103   :  { %v262_v19 = vmax.f32 %v240_v59, 0.0  ;;  %5538 = vmatprep.subr.bf16.mxu1 %v2417_v7  ;;  %v351_v18 = vshra.s32 %v287_v42, 5  ;;  %v1117_v4 = vadd.s32 %v1053_v3, %v541_v30  ;;  %v352_v35 = vshra.s32 %v288_v43, 5 }
 0x104   :  { %5539 = vmatpush3.bf16.msra.mxu1 %v2417_v7  ;;  %v5072_v13 = vadd.s32 4294967295, %v925_v14  ;;  %v5073_v62 = vadd.s32 4294967295, %v926_v25  ;;  %v1118_v38 = vadd.s32 %v1054_v48, %v542_v58  ;;  %v416_v12 = vand.u32 31, %v288_v43 }
 0x105   :  { %v2418_v55 = vpack.c.bf16 %v263_v37, %v262_v19  ;;  %v5136_v17 = vadd.s32 4294967295, %v1117_v4  ;;  %v479_v59 = vshra.s32 %v351_v18, 2  ;;  %v480_v40 = vshra.s32 %v352_v35, 2 }
 0x106   :  { %v543_v16 = vand.u32 3, %v351_v18  ;;  %v5137_v31 = vadd.s32 4294967295, %v1118_v38  ;;  %v1309_v7 = vadd.s32 %v5072_v13, %v1245_v11  ;;  %v1310_v44 = vadd.s32 %v5073_v62, %v1246_v8 }
 0x107   :  { %5540 = vmatprep.subr.bf16.mxu1 %v2418_v55  ;;  %vm1501_vm5 = vcmp.ge.s32.totalorder %v5072_v13, 0  ;;  %vm1502_vm6 = vcmp.ge.s32.totalorder %v5073_v62, 0  ;;  %vm1565_vm7 = vcmp.lt.s32.totalorder %v5072_v13, 8  ;;  %vm1566_vm8 = vcmp.lt.s32.totalorder %v5073_v62, 8 }
 0x108   :  { %5541 = vmatpush3.bf16.msra.mxu1 %v2418_v55  ;;  %vm1693_vm9 = vcmp.ge.s32.totalorder %v5136_v17, 0  ;;  %v1373_v19 = vmul.u32 8, %v1309_v7  ;;  %v1374_v39 = vmul.u32 8, %v1310_v44  ;;  %vm1629_vm10 = vmand %vm1501_vm5, %vm1565_vm7  ;;  %vm1694_vm11 = vcmp.ge.s32.totalorder %v5137_v31, 0 }
 0x109   :  { %vm1821_vm12 = vcmp.lt.s32.totalorder %v5136_v17, 8  ;;  %v8258_v43 = vpack.c.bf16 %v6010_v10, %v6005_v6  ;;  %vm1630_vm13 = vmand %vm1502_vm6, %vm1566_vm8  ;;  %vm1822_vm14 = vcmp.lt.s32.totalorder %v5137_v31, 8  ;;  %v544_v14 = vand.u32 3, %v352_v35 }
 0x10a   :  { %v607_v25 = vshra.s32 %v415_v34, 4  ;;  %v608_v30 = vshra.s32 %v416_v12, 4  ;;  %v8259_v58 = vpack.c.bf16 %v6029_v15, %v6026_v9  ;;  %v1437_v11 = vadd.s32 %v5136_v17, %v1373_v19  ;;  %vm1757_vm15 = vmand %vm1629_vm10, %vm1693_vm9 }
 0x10b   :  { %5543 = vmatmul.mubr.bf16.vlgmr.msra.gmra.mrb[0].mxu1 %v8258_v43  ;;  %v1438_v42 = vadd.s32 %v5137_v31, %v1374_v39  ;;  %v671_v37 = vand.u32 15, %v415_v34  ;;  %v672_v23 = vand.u32 15, %v416_v12  ;;  %vm1758_vm0 = vmand %vm1630_vm13, %vm1694_vm11  ;;  %v289_v6 = vadd.s32 192, %v5931_v26 }
 0x10c   :  { %5546 = vmatprep.mubr.bf16.mxu1 %v8259_v58  ;;  %v1247_v49 = vmul.u32 8, %v607_v25  ;;  %v1248_v2 = vmul.u32 8, %v608_v30  ;;  %v290_v10 = vadd.s32 200, %v5931_v26  ;;  %vm1885_vm1 = vmand %vm1757_vm15, %vm1821_vm12  ;;  %vm2079_vm2 = vcmp.eq.s32.totalorder %v5959_v22, %v1437_v11 }
 0x10d   :  { %vm2080_vm3 = vcmp.eq.s32.totalorder %v5959_v22, %v1438_v42  ;;  %v735_v9 = vshra.s32 %v671_v37, 2  ;;  %v736_v15 = vshra.s32 %v672_v23, 2  ;;  %vm1886_vm4 = vmand %vm1758_vm0, %vm1822_vm14  ;;  %v799_v35 = vand.u32 3, %v671_v37 }
 0x10e   :  { %v800_v34 = vand.u32 3, %v672_v23  ;;  %v353_v3 = vshra.s32 %v289_v6, 5  ;;  %v354_v8 = vshra.s32 %v290_v10, 5  ;;  %vm2271_vm5 = vmand %vm1885_vm1, %vm2079_vm2  ;;  %v417_v55 = vand.u32 31, %v289_v6 }
 0x10f   :  { %v863_v48 = vmul.u32 2, %v735_v9  ;;  %v864_v18 = vmul.u32 2, %v736_v15  ;;  %v418_v4 = vand.u32 31, %v290_v10  ;;  %vm2272_vm6 = vmand %vm1886_vm4, %vm2080_vm3  ;;  %v8260_v13 = vmov 0.0  }
 0x110   :  { %v6233_v62 = vsel %vm2271_vm5, 1.0, %v8260_v13  ;;  %v1055_v38 = vmul.u32 2, %v799_v35  ;;  %v1056_v12 = vmul.u32 2, %v800_v34  ;;  %v481_v17 = vshra.s32 %v353_v3, 2 }
 0x111   :  { %v6236_v7 = vsel %vm2272_vm6, 1.0, %v8260_v13  ;;  %v927_v31 = vadd.s32 %v863_v48, %v479_v59  ;;  %v928_v44 = vadd.s32 %v864_v18, %v480_v40  ;;  %v482_v19 = vshra.s32 %v354_v8, 2 }
 0x112   :  { %v8261_v39 = vpack.c.bf16 %v6053_v57, %v6049_v53  ;;  %v2389_v43 = vpack.c.bf16 %v6236_v7, %v6233_v62  ;;  %v1119_v25 = vadd.s32 %v1055_v38, %v543_v16  ;;  %v1120_v30 = vadd.s32 %v1056_v12, %v544_v14 }
 0x113   :  { %v545_v58 = vand.u32 3, %v353_v3  ;;  %v8262_v11 = vpack.c.bf16 %v6071_v51, %v6067_v46  ;;  %v5074_v42 = vadd.s32 4294967295, %v927_v31  ;;  %v5075_v37 = vadd.s32 4294967295, %v928_v44 }
 0x114   :  { %5547 = vmatmul.mubr.bf16.gmra.mrb[4].mxu1 %v8261_v39  ;;  %v546_v23 = vand.u32 3, %v354_v8  ;;  %v6246_v59 = vshra.s32 %v417_v55, 4  ;;  %v5138_v40 = vadd.s32 4294967295, %v1119_v25  ;;  %v5139_v6 = vadd.s32 4294967295, %v1120_v30 }
 0x115   :  { %5550 = vmatprep.mubr.bf16.mxu1 %v8262_v11  ;;  %v6248_v10 = vshra.s32 %v418_v4, 4  ;;  %v673_v53 = vand.u32 15, %v417_v55  ;;  %v1311_v57 = vadd.s32 %v5074_v42, %v1247_v49  ;;  %v1312_v9 = vadd.s32 %v5075_v37, %v1248_v2 }
 0x116   :  { %vm1503_vm7 = vcmp.ge.s32.totalorder %v5074_v42, 0  ;;  %vm1504_vm8 = vcmp.ge.s32.totalorder %v5075_v37, 0  ;;  %vm1567_vm9 = vcmp.lt.s32.totalorder %v5074_v42, 8  ;;  %vm1568_vm10 = vcmp.lt.s32.totalorder %v5075_v37, 8 }
 0x117   :  { %vm1695_vm11 = vcmp.ge.s32.totalorder %v5138_v40, 0  ;;  %vm1696_vm12 = vcmp.ge.s32.totalorder %v5139_v6, 0  ;;  %v1375_v46 = vmul.u32 8, %v1311_v57  ;;  %v1376_v51 = vmul.u32 8, %v1312_v9  ;;  %vm1631_vm13 = vmand %vm1503_vm7, %vm1567_vm9 }
 0x118   :  { %vm1823_vm14 = vcmp.lt.s32.totalorder %v5138_v40, 8  ;;  %vm1824_vm15 = vcmp.lt.s32.totalorder %v5139_v6, 8  ;;  %vm1632_vm0 = vmand %vm1504_vm8, %vm1568_vm10  ;;  %v674_v16 = vand.u32 15, %v418_v4  ;;  %v737_v14 = vshra.s32 %v673_v53, 2 }
 0x119   :  { %v801_v15 = vand.u32 3, %v673_v53  ;;  %v1249_v35 = vmul.u32 8, %v6246_v59  ;;  %v1439_v34 = vadd.s32 %v5138_v40, %v1375_v46  ;;  %v1440_v49 = vadd.s32 %v5139_v6, %v1376_v51  ;;  %vm1759_vm1 = vmand %vm1631_vm13, %vm1695_vm11 }
 0x11a   :  { %v1250_v2 = vmul.u32 8, %v6248_v10  ;;  %v291_v3 = vadd.s32 208, %v5931_v26  ;;  %v8263_v8 = vpack.c.bf16 %v6093_v60, %v6089_v54  ;;  %vm1760_vm2 = vmand %vm1632_vm0, %vm1696_vm12  ;;  %v738_v48 = vshra.s32 %v674_v16, 2 }
 0x11b   :  { %v802_v18 = vand.u32 3, %v674_v16  ;;  %v865_v55 = vmul.u32 2, %v737_v14  ;;  %v1057_v4 = vmul.u32 2, %v801_v15  ;;  %v8264_v38 = vpack.c.bf16 %v6116_v32, %v6113_v24  ;;  %vm1887_vm3 = vmand %vm1759_vm1, %vm1823_vm14 }
 0x11c   :  { %5551 = vmatmul.mubr.bf16.gmra.mrb[8].mxu1 %v8263_v8  ;;  %vm2081_vm4 = vcmp.eq.s32.totalorder %v5959_v22, %v1439_v34  ;;  %vm2082_vm5 = vcmp.eq.s32.totalorder %v5959_v22, %v1440_v49  ;;  %v292_v12 = vadd.s32 216, %v5931_v26  ;;  %v355_v54 = vshra.s32 %v291_v3, 5  ;;  %vm1888_vm6 = vmand %vm1760_vm2, %vm1824_vm15 }
 0x11d   :  { %5554 = vmatprep.mubr.bf16.mxu1 %v8264_v38  ;;  %v866_v60 = vmul.u32 2, %v738_v48  ;;  %v929_v31 = vadd.s32 %v865_v55, %v481_v17  ;;  %v1058_v44 = vmul.u32 2, %v802_v18  ;;  %v1121_v39 = vadd.s32 %v1057_v4, %v545_v58  ;;  %vm2273_vm7 = vmand %vm1887_vm3, %vm2081_vm4 }
 0x11e   :  { %v356_v25 = vshra.s32 %v292_v12, 5  ;;  %v419_v30 = vand.u32 31, %v291_v3  ;;  %v420_v24 = vand.u32 31, %v292_v12  ;;  %v483_v32 = vshra.s32 %v355_v54, 2  ;;  %vm2274_vm8 = vmand %vm1888_vm6, %vm2082_vm5 }
 0x11f   :  { %v6266_v11 = vsel %vm2273_vm7, 1.0, %v8260_v13  ;;  %v930_v42 = vadd.s32 %v866_v60, %v482_v19  ;;  %v5076_v37 = vadd.s32 4294967295, %v929_v31  ;;  %v1122_v59 = vadd.s32 %v1058_v44, %v546_v23 }
 0x120   :  { %v6269_v40 = vsel %vm2274_vm8, 1.0, %v8260_v13  ;;  %v5140_v6 = vadd.s32 4294967295, %v1121_v39  ;;  %v484_v10 = vshra.s32 %v356_v25, 2  ;;  %v547_v17 = vand.u32 3, %v355_v54 }
 0x121   :  { %v2390_v58 = vpack.c.bf16 %v6269_v40, %v6266_v11  ;;  %v5077_v53 = vadd.s32 4294967295, %v930_v42  ;;  %v5141_v57 = vadd.s32 4294967295, %v1122_v59  ;;  %v1313_v9 = vadd.s32 %v5076_v37, %v1249_v35 }
 0x122   :  { %vm1505_vm9 = vcmp.ge.s32.totalorder %v5076_v37, 0  ;;  %vm1569_vm10 = vcmp.lt.s32.totalorder %v5076_v37, 8  ;;  %vm1697_vm11 = vcmp.ge.s32.totalorder %v5140_v6, 0  ;;  %vm1825_vm12 = vcmp.lt.s32.totalorder %v5140_v6, 8 }
 0x123   :  { %v8265_v19 = vpack.c.bf16 %v6153_v20, %v6149_v56  ;;  %v1314_v23 = vadd.s32 %v5077_v53, %v1250_v2  ;;  %v1377_v46 = vmul.u32 8, %v1313_v9  ;;  %vm1506_vm13 = vcmp.ge.s32.totalorder %v5077_v53, 0  ;;  %vm1633_vm15 = vmand %vm1505_vm9, %vm1569_vm10 }
 0x124   :  { %vm1570_vm14 = vcmp.lt.s32.totalorder %v5077_v53, 8  ;;  %v8266_v51 = vpack.c.bf16 %v6173_v50, %v6170_v45  ;;  %vm1698_vm1 = vcmp.ge.s32.totalorder %v5141_v57, 0  ;;  %vm1826_vm2 = vcmp.lt.s32.totalorder %v5141_v57, 8  ;;  %vm1761_vm3 = vmand %vm1633_vm15, %vm1697_vm11 }
 0x125   :  { %5555 = vmatmul.mubr.bf16.gmra.mrb[12].mxu1 %v8265_v19  ;;  %vm1634_vm0 = vmand %vm1506_vm13, %vm1570_vm14  ;;  %v548_v16 = vand.u32 3, %v356_v25  ;;  %v611_v14 = vshra.s32 %v419_v30, 4  ;;  %v1378_v15 = vmul.u32 8, %v1314_v23  ;;  %v1441_v35 = vadd.s32 %v5140_v6, %v1377_v46 }
 0x126   :  { %5558 = vmatprep.mubr.bf16.mxu1 %v8266_v51  ;;  %v612_v56 = vshra.s32 %v420_v24, 4  ;;  %v675_v20 = vand.u32 15, %v419_v30  ;;  %vm1762_vm4 = vmand %vm1634_vm0, %vm1698_vm1  ;;  %v676_v34 = vand.u32 15, %v420_v24  ;;  %v293_v2 = vadd.s32 224, %v5931_v26 }
 0x127   :  { %v1251_v49 = vmul.u32 8, %v611_v14  ;;  %v294_v3 = vadd.s32 232, %v5931_v26  ;;  %v1442_v45 = vadd.s32 %v5141_v57, %v1378_v15  ;;  %vm1889_vm5 = vmand %vm1761_vm3, %vm1825_vm12  ;;  %vm2083_vm6 = vcmp.eq.s32.totalorder %v5959_v22, %v1441_v35 }
 0x128   :  { %v739_v50 = vshra.s32 %v675_v20, 2  ;;  %v803_v8 = vand.u32 3, %v675_v20  ;;  %vm1890_vm7 = vmand %vm1762_vm4, %vm1826_vm2  ;;  %v740_v48 = vshra.s32 %v676_v34, 2  ;;  %v804_v18 = vand.u32 3, %v676_v34 }
 0x129   :  { %v1252_v55 = vmul.u32 8, %v612_v56  ;;  %v357_v4 = vshra.s32 %v293_v2, 5  ;;  %vm2084_vm8 = vcmp.eq.s32.totalorder %v5959_v22, %v1442_v45  ;;  %vm2275_vm9 = vmand %vm1889_vm5, %vm2083_vm6  ;;  %v358_v54 = vshra.s32 %v294_v3, 5 }
 0x12a   :  { %v867_v38 = vmul.u32 2, %v739_v50  ;;  %v1059_v12 = vmul.u32 2, %v803_v8  ;;  %vm2276_vm10 = vmand %vm1890_vm7, %vm2084_vm8  ;;  %v2339_v60 = vsel %vm2275_vm9, 1.0, %v8260_v13  ;;  %v421_v39 = vand.u32 31, %v293_v2 }
 0x12b   :  { %v868_v31 = vmul.u32 2, %v740_v48  ;;  %v1060_v44 = vmul.u32 2, %v804_v18  ;;  %v8267_v25 = vpack.c.bf16 %v6213_v21, %v6208_v5  ;;  %v2340_v30 = vsel %vm2276_vm10, 1.0, %v8260_v13 }
 0x12c   :  { %v931_v24 = vadd.s32 %v867_v38, %v483_v32  ;;  %v1123_v42 = vadd.s32 %v1059_v12, %v547_v17  ;;  %v422_v37 = vand.u32 31, %v294_v3  ;;  %v2391_v59 = vpack.c.bf16 %v2340_v30, %v2339_v60 }
 0x12d   :  { %5559 = vmatmul.mubr.bf16.gmra.mrb[16].mxu1 %v8267_v25  ;;  %v932_v6 = vadd.s32 %v868_v31, %v484_v10  ;;  %v1124_v53 = vadd.s32 %v1060_v44, %v548_v16  ;;  %v485_v57 = vshra.s32 %v357_v4, 2  ;;  %v486_v23 = vshra.s32 %v358_v54, 2 }
 0x12e   :  { %5562 = vmatprep.mubr.bf16.mxu1 %v2389_v43  ;;  %v5078_v9 = vadd.s32 4294967295, %v931_v24  ;;  %v5142_v19 = vadd.s32 4294967295, %v1123_v42  ;;  %v549_v46 = vand.u32 3, %v357_v4  ;;  %v550_v21 = vand.u32 3, %v358_v54 }
 0x12f   :  { %v5079_v51 = vadd.s32 4294967295, %v932_v6  ;;  %v5143_v5 = vadd.s32 4294967295, %v1124_v53  ;;  %v6294_v14 = vshra.s32 %v421_v39, 4  ;;  %v614_v7 = vshra.s32 %v422_v37, 4 }
 0x130   :  { %v1315_v32 = vadd.s32 %v5078_v9, %v1251_v49  ;;  %vm1507_vm11 = vcmp.ge.s32.totalorder %v5078_v9, 0  ;;  %vm1571_vm12 = vcmp.lt.s32.totalorder %v5078_v9, 8  ;;  %vm1699_vm13 = vcmp.ge.s32.totalorder %v5142_v19, 0 }
 0x131   :  { %v1316_v17 = vadd.s32 %v5079_v51, %v1252_v55  ;;  %vm1508_vm14 = vcmp.ge.s32.totalorder %v5079_v51, 0  ;;  %vm1572_vm15 = vcmp.lt.s32.totalorder %v5079_v51, 8  ;;  %vm1635_vm0 = vmand %vm1507_vm11, %vm1571_vm12  ;;  %vm1700_vm1 = vcmp.ge.s32.totalorder %v5143_v5, 0 }
 0x132   :  { %v1379_v62 = vmul.u32 8, %v1315_v32  ;;  %vm1636_vm2 = vmand %vm1508_vm14, %vm1572_vm15  ;;  %vm1827_vm3 = vcmp.lt.s32.totalorder %v5142_v19, 8  ;;  %vm1828_vm4 = vcmp.lt.s32.totalorder %v5143_v5, 8  ;;  %v677_v10 = vand.u32 15, %v421_v39 }
 0x133   :  { %v1380_v43 = vmul.u32 8, %v1316_v17  ;;  %vm1763_vm5 = vmand %vm1635_vm0, %vm1699_vm13  ;;  %v678_v16 = vand.u32 15, %v422_v37  ;;  %v1253_v15 = vmul.u32 8, %v6294_v14  ;;  %v295_v20 = vadd.s32 240, %v5931_v26 }
 0x134   :  { %v1443_v35 = vadd.s32 %v5142_v19, %v1379_v62  ;;  %vm1764_vm6 = vmand %vm1636_vm2, %vm1700_vm1  ;;  %v1254_v56 = vmul.u32 8, %v614_v7  ;;  %v296_v34 = vadd.s32 248, %v5931_v26  ;;  %v741_v2 = vshra.s32 %v677_v10, 2 }
 0x135   :  { %5563 = vmatmul.mubr.bf16.gmra.mrb[20].mxu1 %v2390_v58  ;;  %v1444_v49 = vadd.s32 %v5143_v5, %v1380_v43  ;;  %vm1891_vm7 = vmand %vm1763_vm5, %vm1827_vm3  ;;  %v742_v3 = vshra.s32 %v678_v16, 2  ;;  %v805_v45 = vand.u32 3, %v677_v10  ;;  %v806_v11 = vand.u32 3, %v678_v16 }
 0x136   :  { %5566 = vmatprep.mubr.bf16.mxu1 %v2391_v59  ;;  %vm1892_vm8 = vmand %vm1764_vm6, %vm1828_vm4  ;;  %vm2085_vm9 = vcmp.eq.s32.totalorder %v5959_v22, %v1443_v35  ;;  %v359_v40 = vshra.s32 %v295_v20, 5  ;;  %v360_v58 = vshra.s32 %v296_v34, 5  ;;  %v869_v50 = vmul.u32 2, %v741_v2 }
 0x137   :  { %vm2086_vm10 = vcmp.eq.s32.totalorder %v5959_v22, %v1444_v49  ;;  %vm2277_vm11 = vmand %vm1891_vm7, %vm2085_vm9  ;;  %v870_v8 = vmul.u32 2, %v742_v3  ;;  %v423_v48 = vand.u32 31, %v295_v20  ;;  %v1061_v55 = vmul.u32 2, %v805_v45 }
 0x138   :  { %vm2278_vm12 = vmand %vm1892_vm8, %vm2086_vm10  ;;  %v2341_v18 = vsel %vm2277_vm11, 1.0, %v8260_v13  ;;  %v1062_v4 = vmul.u32 2, %v806_v11  ;;  %v424_v38 = vand.u32 31, %v296_v34  ;;  %v933_v54 = vadd.s32 %v869_v50, %v485_v57 }
 0x139   :  { %v2342_v12 = vsel %vm2278_vm12, 1.0, %v8260_v13  ;;  %v934_v60 = vadd.s32 %v870_v8, %v486_v23  ;;  %v487_v31 = vshra.s32 %v359_v40, 2  ;;  %v1125_v39 = vadd.s32 %v1061_v55, %v549_v46 }
 0x13a   :  { %v2392_v44 = vpack.c.bf16 %v2342_v12, %v2341_v18  ;;  %v1126_v25 = vadd.s32 %v1062_v4, %v550_v21  ;;  %v488_v30 = vshra.s32 %v360_v58, 2  ;;  %v5080_v24 = vadd.s32 4294967295, %v933_v54 }
 0x13b   :  { %v5081_v42 = vadd.s32 4294967295, %v934_v60  ;;  %v551_v37 = vand.u32 3, %v359_v40  ;;  %v552_v59 = vand.u32 3, %v360_v58  ;;  %v5144_v6 = vadd.s32 4294967295, %v1125_v39 }
 0x13c   :  { %v5145_v53 = vadd.s32 4294967295, %v1126_v25  ;;  %v6308_v9 = vshra.s32 %v423_v48, 4  ;;  %v6310_v19 = vshra.s32 %v424_v38, 4  ;;  %v1317_v51 = vadd.s32 %v5080_v24, %v1253_v15 }
 0x13d   :  { %5567 = vmatmul.mubr.bf16.gmra.mrb[24].mxu1 %v2392_v44  ;;  %v1318_v5 = vadd.s32 %v5081_v42, %v1254_v56  ;;  %vm1509_vm13 = vcmp.ge.s32.totalorder %v5080_v24, 0  ;;  %vm1510_vm14 = vcmp.ge.s32.totalorder %v5081_v42, 0  ;;  %vm1573_vm15 = vcmp.lt.s32.totalorder %v5080_v24, 8 }
 0x13e   :  { %vm1574_vm0 = vcmp.lt.s32.totalorder %v5081_v42, 8  ;;  %vm1701_vm1 = vcmp.ge.s32.totalorder %v5144_v6, 0  ;;  %vm1702_vm2 = vcmp.ge.s32.totalorder %v5145_v53, 0  ;;  %v1381_v57 = vmul.u32 8, %v1317_v51  ;;  %vm1637_vm3 = vmand %vm1509_vm13, %vm1573_vm15 }
 0x13f   :  { %v1382_v23 = vmul.u32 8, %v1318_v5  ;;  %vm1829_vm4 = vcmp.lt.s32.totalorder %v5144_v6, 8  ;;  %vm1830_vm5 = vcmp.lt.s32.totalorder %v5145_v53, 8  ;;  %vm1638_vm6 = vmand %vm1510_vm14, %vm1574_vm0  ;;  %v679_v46 = vand.u32 15, %v423_v48 }
 0x140   :  { %v680_v21 = vand.u32 15, %v424_v38  ;;  %v1255_v14 = vmul.u32 8, %v6308_v9  ;;  %v1256_v32 = vmul.u32 8, %v6310_v19  ;;  %v1445_v17 = vadd.s32 %v5144_v6, %v1381_v57  ;;  %vm1765_vm7 = vmand %vm1637_vm3, %vm1701_vm1 }
 0x141   :  { %v1446_v62 = vadd.s32 %v5145_v53, %v1382_v23  ;;  %v297_v7 = vadd.s32 256, %v5931_v26  ;;  %v298_v43 = vadd.s32 264, %v5931_v26  ;;  %vm1766_vm8 = vmand %vm1638_vm6, %vm1702_vm2  ;;  %v743_v10 = vshra.s32 %v679_v46, 2 }
 0x142   :  { %v744_v16 = vshra.s32 %v680_v21, 2  ;;  %v807_v15 = vand.u32 3, %v679_v46  ;;  %v808_v35 = vand.u32 3, %v680_v21  ;;  %vm1893_vm9 = vmand %vm1765_vm7, %vm1829_vm4  ;;  %vm2087_vm10 = vcmp.eq.s32.totalorder %v5959_v22, %v1445_v17 }
 0x143   :  { %vm2088_vm11 = vcmp.eq.s32.totalorder %v5959_v22, %v1446_v62  ;;  %v361_v56 = vshra.s32 %v297_v7, 5  ;;  %v362_v20 = vshra.s32 %v298_v43, 5  ;;  %vm1894_vm12 = vmand %vm1766_vm8, %vm1830_vm5  ;;  %v871_v34 = vmul.u32 2, %v743_v10 }
 0x144   :  { %v872_v49 = vmul.u32 2, %v744_v16  ;;  %v425_v2 = vand.u32 31, %v297_v7  ;;  %v426_v3 = vand.u32 31, %v298_v43  ;;  %vm2279_vm13 = vmand %vm1893_vm9, %vm2087_vm10  ;;  %v1063_v45 = vmul.u32 2, %v807_v15 }
 0x145   :  { %v1064_v11 = vmul.u32 2, %v808_v35  ;;  %v489_v40 = vshra.s32 %v361_v56, 2  ;;  %v6321_v58 = vshra.s32 %v362_v20, 2  ;;  %vm2280_vm14 = vmand %vm1894_vm12, %vm2088_vm11  ;;  %v2343_v50 = vsel %vm2279_vm13, 1.0, %v8260_v13 }
 0x146   :  { %v935_v8 = vadd.s32 %v871_v34, %v487_v31  ;;  %v936_v48 = vadd.s32 %v872_v49, %v488_v30  ;;  %v553_v18 = vand.u32 3, %v361_v56  ;;  %v2344_v55 = vsel %vm2280_vm14, 1.0, %v8260_v13 }
 0x147   :  { %v1127_v4 = vadd.s32 %v1063_v45, %v551_v37  ;;  %v1128_v38 = vadd.s32 %v1064_v11, %v552_v59  ;;  %v554_v12 = vand.u32 3, %v362_v20  ;;  %v2393_v54 = vpack.c.bf16 %v2344_v55, %v2343_v50 }
 0x148   :  { %v5082_v60 = vadd.s32 4294967295, %v935_v8  ;;  %v5083_v44 = vadd.s32 4294967295, %v936_v48  ;;  %v617_v39 = vshra.s32 %v425_v2, 4  ;;  %v6325_v42 = vshra.s32 %v426_v3, 4 }
 0x149   :  { %v5146_v25 = vadd.s32 4294967295, %v1127_v4  ;;  %v5147_v24 = vadd.s32 4294967295, %v1128_v38  ;;  %v681_v6 = vand.u32 15, %v425_v2  ;;  %5570 = vmatprep.mubr.bf16.mxu1 %v2393_v54  ;;  %v682_v37 = vand.u32 15, %v426_v3 }
 0x14a   :  { %v1319_v53 = vadd.s32 %v5082_v60, %v1255_v14  ;;  %v1320_v9 = vadd.s32 %v5083_v44, %v1256_v32  ;;  %vm1511_vm15 = vcmp.ge.s32.totalorder %v5082_v60, 0  ;;  %vm1512_vm0 = vcmp.ge.s32.totalorder %v5083_v44, 0 }
 0x14b   :  { %vm1575_vm1 = vcmp.lt.s32.totalorder %v5082_v60, 8  ;;  %vm1576_vm2 = vcmp.lt.s32.totalorder %v5083_v44, 8  ;;  %vm1703_vm3 = vcmp.ge.s32.totalorder %v5146_v25, 0  ;;  %vm1704_vm4 = vcmp.ge.s32.totalorder %v5147_v24, 0 }
 0x14c   :  { %v1383_v31 = vmul.u32 8, %v1319_v53  ;;  %v1384_v30 = vmul.u32 8, %v1320_v9  ;;  %vm1639_vm5 = vmand %vm1511_vm15, %vm1575_vm1  ;;  %vm1831_vm6 = vcmp.lt.s32.totalorder %v5146_v25, 8  ;;  %vm1832_vm7 = vcmp.lt.s32.totalorder %v5147_v24, 8 }
 0x14d   :  { %vm1640_vm8 = vmand %vm1512_vm0, %vm1576_vm2  ;;  %v745_v59 = vshra.s32 %v681_v6, 2  ;;  %v809_v19 = vand.u32 3, %v681_v6  ;;  %v1257_v51 = vmul.u32 8, %v617_v39  ;;  %v1258_v23 = vmul.u32 8, %v6325_v42 }
 0x14e   :  { %v1447_v5 = vadd.s32 %v5146_v25, %v1383_v31  ;;  %v1448_v57 = vadd.s32 %v5147_v24, %v1384_v30  ;;  %vm1767_vm9 = vmand %vm1639_vm5, %vm1703_vm3  ;;  %v299_v46 = vadd.s32 272, %v5931_v26  ;;  %v746_v21 = vshra.s32 %v682_v37, 2 }
 0x14f   :  { %vm1768_vm10 = vmand %vm1640_vm8, %vm1704_vm4  ;;  %v810_v14 = vand.u32 3, %v682_v37  ;;  %v873_v32 = vmul.u32 2, %v745_v59  ;;  %v1065_v17 = vmul.u32 2, %v809_v19  ;;  %v300_v62 = vadd.s32 280, %v5931_v26 }
 0x150   :  { %vm1895_vm11 = vmand %vm1767_vm9, %vm1831_vm6  ;;  %vm2089_vm12 = vcmp.eq.s32.totalorder %v5959_v22, %v1447_v5  ;;  %vm2090_vm13 = vcmp.eq.s32.totalorder %v5959_v22, %v1448_v57  ;;  %v363_v7 = vshra.s32 %v299_v46, 5  ;;  %v874_v43 = vmul.u32 2, %v746_v21 }
 0x151   :  { %vm1896_vm14 = vmand %vm1768_vm10, %vm1832_vm7  ;;  %v937_v10 = vadd.s32 %v873_v32, %v489_v40  ;;  %v1066_v16 = vmul.u32 2, %v810_v14  ;;  %v1129_v15 = vadd.s32 %v1065_v17, %v553_v18  ;;  %v364_v35 = vshra.s32 %v300_v62, 5 }
 0x152   :  { %vm2281_vm15 = vmand %vm1895_vm11, %vm2089_vm12  ;;  %v427_v56 = vand.u32 31, %v299_v46  ;;  %v428_v20 = vand.u32 31, %v300_v62  ;;  %v491_v34 = vshra.s32 %v363_v7, 2  ;;  %v938_v2 = vadd.s32 %v874_v43, %v6321_v58 }
 0x153   :  { %vm2282_vm0 = vmand %vm1896_vm14, %vm2090_vm13  ;;  %v2345_v49 = vsel %vm2281_vm15, 1.0, %v8260_v13  ;;  %v5084_v3 = vadd.s32 4294967295, %v937_v10  ;;  %v1130_v45 = vadd.s32 %v1066_v16, %v554_v12  ;;  %v5148_v50 = vadd.s32 4294967295, %v1129_v15 }
 0x154   :  { %v2346_v11 = vsel %vm2282_vm0, 1.0, %v8260_v13  ;;  %v492_v8 = vshra.s32 %v364_v35, 2  ;;  %v555_v48 = vand.u32 3, %v363_v7  ;;  %v5085_v55 = vadd.s32 4294967295, %v938_v2 }
 0x155   :  { %v2394_v40 = vpack.c.bf16 %v2346_v11, %v2345_v49  ;;  %v5149_v18 = vadd.s32 4294967295, %v1130_v45  ;;  %v1321_v4 = vadd.s32 %v5084_v3, %v1257_v51  ;;  %vm1513_vm1 = vcmp.ge.s32.totalorder %v5084_v3, 0 }
 0x156   :  { %vm1577_vm2 = vcmp.lt.s32.totalorder %v5084_v3, 8  ;;  %vm1705_vm3 = vcmp.ge.s32.totalorder %v5148_v50, 0  ;;  %vm1833_vm4 = vcmp.lt.s32.totalorder %v5148_v50, 8  ;;  %v1322_v38 = vadd.s32 %v5085_v55, %v1258_v23 }
 0x157   :  { %5571 = vmatmul.mubr.bf16.gmra.mrb[28].mxu1 %v2394_v40  ;;  %v1385_v54 = vmul.u32 8, %v1321_v4  ;;  %vm1514_vm5 = vcmp.ge.s32.totalorder %v5085_v55, 0  ;;  %vm1578_vm6 = vcmp.lt.s32.totalorder %v5085_v55, 8  ;;  %vm1641_vm7 = vmand %vm1513_vm1, %vm1577_vm2  ;;  %vm1706_vm9 = vcmp.ge.s32.totalorder %v5149_v18, 0 }
 0x158   :  { %vm1642_vm8 = vmand %vm1514_vm5, %vm1578_vm6  ;;  %vm1834_vm10 = vcmp.lt.s32.totalorder %v5149_v18, 8  ;;  %v556_v58 = vand.u32 3, %v364_v35  ;;  %v619_v12 = vshra.s32 %v427_v56, 4  ;;  %v1386_v60 = vmul.u32 8, %v1322_v38 }
 0x159   :  { %v1449_v44 = vadd.s32 %v5148_v50, %v1385_v54  ;;  %vm1769_vm11 = vmand %vm1641_vm7, %vm1705_vm3  ;;  %v620_v39 = vshra.s32 %v428_v20, 4  ;;  %v683_v25 = vand.u32 15, %v427_v56  ;;  %v684_v24 = vand.u32 15, %v428_v20 }
 0x15a   :  { %vm1770_vm12 = vmand %vm1642_vm8, %vm1706_vm9  ;;  %v1259_v42 = vmul.u32 8, %v619_v12  ;;  %v301_v6 = vadd.s32 288, %v5931_v26  ;;  %v302_v53 = vadd.s32 296, %v5931_v26  ;;  %v1450_v9 = vadd.s32 %v5149_v18, %v1386_v60 }
 0x15b   :  { %vm1897_vm13 = vmand %vm1769_vm11, %vm1833_vm4  ;;  %vm2091_vm14 = vcmp.eq.s32.totalorder %v5959_v22, %v1449_v44  ;;  %v747_v31 = vshra.s32 %v683_v25, 2  ;;  %v811_v30 = vand.u32 3, %v683_v25  ;;  %v748_v37 = vshra.s32 %v684_v24, 2 }
 0x15c   :  { %vm1898_vm15 = vmand %vm1770_vm12, %vm1834_vm10  ;;  %v812_v59 = vand.u32 3, %v684_v24  ;;  %v1260_v19 = vmul.u32 8, %v620_v39  ;;  %v365_v51 = vshra.s32 %v301_v6, 5  ;;  %vm2092_vm0 = vcmp.eq.s32.totalorder %v5959_v22, %v1450_v9 }
 0x15d   :  { %vm2283_vm1 = vmand %vm1897_vm13, %vm2091_vm14  ;;  %v875_v5 = vmul.u32 2, %v747_v31  ;;  %v1067_v57 = vmul.u32 2, %v811_v30  ;;  %v366_v23 = vshra.s32 %v302_v53, 5  ;;  %v429_v32 = vand.u32 31, %v301_v6 }
 0x15e   :  { %vm2284_vm2 = vmand %vm1898_vm15, %vm2092_vm0  ;;  %v2347_v46 = vsel %vm2283_vm1, 1.0, %v8260_v13  ;;  %v876_v21 = vmul.u32 2, %v748_v37  ;;  %v1068_v14 = vmul.u32 2, %v812_v59  ;;  %v430_v43 = vand.u32 31, %v302_v53 }
 0x15f   :  { %v2348_v17 = vsel %vm2284_vm2, 1.0, %v8260_v13  ;;  %v939_v62 = vadd.s32 %v875_v5, %v491_v34  ;;  %v1131_v7 = vadd.s32 %v1067_v57, %v555_v48  ;;  %v493_v35 = vshra.s32 %v365_v51, 2 }
 0x160   :  { %v2395_v10 = vpack.c.bf16 %v2348_v17, %v2347_v46  ;;  %v940_v16 = vadd.s32 %v876_v21, %v492_v8  ;;  %v1132_v15 = vadd.s32 %v1068_v14, %v556_v58  ;;  %v494_v49 = vshra.s32 %v366_v23, 2 }
 0x161   :  { %v5086_v56 = vadd.s32 4294967295, %v939_v62  ;;  %v5150_v20 = vadd.s32 4294967295, %v1131_v7  ;;  %v557_v2 = vand.u32 3, %v365_v51  ;;  %v558_v11 = vand.u32 3, %v366_v23 }
 0x162   :  { %5574 = vmatprep.mubr.bf16.mxu1 %v2395_v10  ;;  %v5087_v3 = vadd.s32 4294967295, %v940_v16  ;;  %v5151_v45 = vadd.s32 4294967295, %v1132_v15  ;;  %v6347_v50 = vshra.s32 %v429_v32, 4  ;;  %v622_v48 = vshra.s32 %v430_v43, 4 }
 0x163   :  { %v1323_v40 = vadd.s32 %v5086_v56, %v1259_v42  ;;  %vm1515_vm3 = vcmp.ge.s32.totalorder %v5086_v56, 0  ;;  %vm1579_vm4 = vcmp.lt.s32.totalorder %v5086_v56, 8  ;;  %vm1707_vm5 = vcmp.ge.s32.totalorder %v5150_v20, 0 }
 0x164   :  { %v1324_v34 = vadd.s32 %v5087_v3, %v1260_v19  ;;  %vm1516_vm6 = vcmp.ge.s32.totalorder %v5087_v3, 0  ;;  %vm1580_vm7 = vcmp.lt.s32.totalorder %v5087_v3, 8  ;;  %vm1643_vm8 = vmand %vm1515_vm3, %vm1579_vm4  ;;  %vm1708_vm9 = vcmp.ge.s32.totalorder %v5151_v45, 0 }
 0x165   :  { %v1387_v8 = vmul.u32 8, %v1323_v40  ;;  %vm1644_vm10 = vmand %vm1516_vm6, %vm1580_vm7  ;;  %vm1835_vm11 = vcmp.lt.s32.totalorder %v5150_v20, 8  ;;  %vm1836_vm12 = vcmp.lt.s32.totalorder %v5151_v45, 8  ;;  %v685_v18 = vand.u32 15, %v429_v32 }
 0x166   :  { %v1388_v55 = vmul.u32 8, %v1324_v34  ;;  %vm1771_vm13 = vmand %vm1643_vm8, %vm1707_vm5  ;;  %v686_v4 = vand.u32 15, %v430_v43  ;;  %v1261_v38 = vmul.u32 8, %v6347_v50  ;;  %v303_v12 = vadd.s32 304, %v5931_v26 }
 0x167   :  { %v1451_v54 = vadd.s32 %v5150_v20, %v1387_v8  ;;  %vm1772_vm14 = vmand %vm1644_vm10, %vm1708_vm9  ;;  %v1262_v58 = vmul.u32 8, %v622_v48  ;;  %v304_v60 = vadd.s32 312, %v5931_v26  ;;  %v749_v39 = vshra.s32 %v685_v18, 2 }
 0x168   :  { %v1452_v44 = vadd.s32 %v5151_v45, %v1388_v55  ;;  %vm1899_vm15 = vmand %vm1771_vm13, %vm1835_vm11  ;;  %v750_v25 = vshra.s32 %v686_v4, 2  ;;  %v813_v24 = vand.u32 3, %v685_v18  ;;  %v814_v42 = vand.u32 3, %v686_v4 }
 0x169   :  { %vm1900_vm0 = vmand %vm1772_vm14, %vm1836_vm12  ;;  %vm2093_vm1 = vcmp.eq.s32.totalorder %v5959_v22, %v1451_v54  ;;  %v367_v6 = vshra.s32 %v303_v12, 5  ;;  %v368_v53 = vshra.s32 %v304_v60, 5  ;;  %v877_v9 = vmul.u32 2, %v749_v39 }
 0x16a   :  { %vm2094_vm2 = vcmp.eq.s32.totalorder %v5959_v22, %v1452_v44  ;;  %vm2285_vm3 = vmand %vm1899_vm15, %vm2093_vm1  ;;  %v878_v31 = vmul.u32 2, %v750_v25  ;;  %v431_v30 = vand.u32 31, %v303_v12  ;;  %v1069_v59 = vmul.u32 2, %v813_v24 }
 0x16b   :  { %vm2286_vm4 = vmand %vm1900_vm0, %vm2094_vm2  ;;  %v2349_v37 = vsel %vm2285_vm3, 1.0, %v8260_v13  ;;  %v1070_v19 = vmul.u32 2, %v814_v42  ;;  %v432_v51 = vand.u32 31, %v304_v60  ;;  %v941_v57 = vadd.s32 %v877_v9, %v493_v35 }
 0x16c   :  { %v2350_v5 = vsel %vm2286_vm4, 1.0, %v8260_v13  ;;  %v942_v23 = vadd.s32 %v878_v31, %v494_v49  ;;  %v495_v46 = vshra.s32 %v367_v6, 2  ;;  %v1133_v14 = vadd.s32 %v1069_v59, %v557_v2 }
 0x16d   :  { %v2396_v21 = vpack.c.bf16 %v2350_v5, %v2349_v37  ;;  %v1134_v32 = vadd.s32 %v1070_v19, %v558_v11  ;;  %v496_v17 = vshra.s32 %v368_v53, 2  ;;  %v5088_v62 = vadd.s32 4294967295, %v941_v57 }
 0x16e   :  { %v5089_v7 = vadd.s32 4294967295, %v942_v23  ;;  %v559_v43 = vand.u32 3, %v367_v6  ;;  %v560_v10 = vand.u32 3, %v368_v53  ;;  %v5152_v16 = vadd.s32 4294967295, %v1133_v14 }
 0x16f   :  { %5575 = vmatmul.mubr.bf16.gmra.mrb[32].mxu1 %v2396_v21  ;;  %v5153_v15 = vadd.s32 4294967295, %v1134_v32  ;;  %v6357_v56 = vshra.s32 %v431_v30, 4  ;;  %v6359_v20 = vshra.s32 %v432_v51, 4  ;;  %v1325_v3 = vadd.s32 %v5088_v62, %v1261_v38 }
 0x170   :  { %v1326_v45 = vadd.s32 %v5089_v7, %v1262_v58  ;;  %vm1517_vm5 = vcmp.ge.s32.totalorder %v5088_v62, 0  ;;  %vm1518_vm6 = vcmp.ge.s32.totalorder %v5089_v7, 0  ;;  %vm1581_vm7 = vcmp.lt.s32.totalorder %v5088_v62, 8 }
 0x171   :  { %vm1582_vm8 = vcmp.lt.s32.totalorder %v5089_v7, 8  ;;  %vm1709_vm9 = vcmp.ge.s32.totalorder %v5152_v16, 0  ;;  %vm1710_vm10 = vcmp.ge.s32.totalorder %v5153_v15, 0  ;;  %v1389_v35 = vmul.u32 8, %v1325_v3  ;;  %vm1645_vm11 = vmand %vm1517_vm5, %vm1581_vm7 }
 0x172   :  { %v1390_v49 = vmul.u32 8, %v1326_v45  ;;  %vm1837_vm12 = vcmp.lt.s32.totalorder %v5152_v16, 8  ;;  %vm1838_vm13 = vcmp.lt.s32.totalorder %v5153_v15, 8  ;;  %vm1646_vm14 = vmand %vm1518_vm6, %vm1582_vm8  ;;  %v687_v2 = vand.u32 15, %v431_v30 }
 0x173   :  { %v688_v11 = vand.u32 15, %v432_v51  ;;  %v1263_v50 = vmul.u32 8, %v6357_v56  ;;  %v1264_v40 = vmul.u32 8, %v6359_v20  ;;  %v1453_v34 = vadd.s32 %v5152_v16, %v1389_v35  ;;  %vm1773_vm15 = vmand %vm1645_vm11, %vm1709_vm9 }
 0x174   :  { %v1454_v8 = vadd.s32 %v5153_v15, %v1390_v49  ;;  %v305_v48 = vadd.s32 320, %v5931_v26  ;;  %v306_v55 = vadd.s32 328, %v5931_v26  ;;  %vm1774_vm0 = vmand %vm1646_vm14, %vm1710_vm10  ;;  %v751_v18 = vshra.s32 %v687_v2, 2 }
 0x175   :  { %v752_v4 = vshra.s32 %v688_v11, 2  ;;  %v815_v38 = vand.u32 3, %v687_v2  ;;  %v816_v54 = vand.u32 3, %v688_v11  ;;  %vm1901_vm1 = vmand %vm1773_vm15, %vm1837_vm12  ;;  %vm2095_vm2 = vcmp.eq.s32.totalorder %v5959_v22, %v1453_v34 }
 0x176   :  { %vm2096_vm3 = vcmp.eq.s32.totalorder %v5959_v22, %v1454_v8  ;;  %v369_v58 = vshra.s32 %v305_v48, 5  ;;  %v370_v12 = vshra.s32 %v306_v55, 5  ;;  %vm1902_vm4 = vmand %vm1774_vm0, %vm1838_vm13  ;;  %v879_v60 = vmul.u32 2, %v751_v18 }
 0x177   :  { %v880_v44 = vmul.u32 2, %v752_v4  ;;  %v433_v39 = vand.u32 31, %v305_v48  ;;  %v434_v25 = vand.u32 31, %v306_v55  ;;  %vm2287_vm5 = vmand %vm1901_vm1, %vm2095_vm2  ;;  %v1071_v24 = vmul.u32 2, %v815_v38 }
 0x178   :  { %v1072_v42 = vmul.u32 2, %v816_v54  ;;  %v497_v6 = vshra.s32 %v369_v58, 2  ;;  %v6370_v53 = vshra.s32 %v370_v12, 2  ;;  %vm2288_vm6 = vmand %vm1902_vm4, %vm2096_vm3  ;;  %v2351_v9 = vsel %vm2287_vm5, 1.0, %v8260_v13 }
 0x179   :  { %v943_v31 = vadd.s32 %v879_v60, %v495_v46  ;;  %v944_v30 = vadd.s32 %v880_v44, %v496_v17  ;;  %v561_v37 = vand.u32 3, %v369_v58  ;;  %v2352_v59 = vsel %vm2288_vm6, 1.0, %v8260_v13 }
 0x17a   :  { %v1135_v19 = vadd.s32 %v1071_v24, %v559_v43  ;;  %v1136_v51 = vadd.s32 %v1072_v42, %v560_v10  ;;  %v562_v5 = vand.u32 3, %v370_v12  ;;  %v2397_v57 = vpack.c.bf16 %v2352_v59, %v2351_v9 }
 0x17b   :  { %v5090_v23 = vadd.s32 4294967295, %v943_v31  ;;  %v5091_v21 = vadd.s32 4294967295, %v944_v30  ;;  %v625_v14 = vshra.s32 %v433_v39, 4  ;;  %v6374_v7 = vshra.s32 %v434_v25, 4 }
 0x17c   :  { %v5154_v32 = vadd.s32 4294967295, %v1135_v19  ;;  %v5155_v62 = vadd.s32 4294967295, %v1136_v51  ;;  %v689_v16 = vand.u32 15, %v433_v39  ;;  %5578 = vmatprep.mubr.bf16.mxu1 %v2397_v57  ;;  %v690_v43 = vand.u32 15, %v434_v25 }
 0x17d   :  { %v1327_v15 = vadd.s32 %v5090_v23, %v1263_v50  ;;  %v1328_v56 = vadd.s32 %v5091_v21, %v1264_v40  ;;  %vm1519_vm7 = vcmp.ge.s32.totalorder %v5090_v23, 0  ;;  %vm1520_vm8 = vcmp.ge.s32.totalorder %v5091_v21, 0 }
 0x17e   :  { %vm1583_vm9 = vcmp.lt.s32.totalorder %v5090_v23, 8  ;;  %vm1584_vm10 = vcmp.lt.s32.totalorder %v5091_v21, 8  ;;  %vm1711_vm11 = vcmp.ge.s32.totalorder %v5154_v32, 0  ;;  %vm1712_vm12 = vcmp.ge.s32.totalorder %v5155_v62, 0 }
 0x17f   :  { %v1391_v46 = vmul.u32 8, %v1327_v15  ;;  %v1392_v17 = vmul.u32 8, %v1328_v56  ;;  %vm1647_vm13 = vmand %vm1519_vm7, %vm1583_vm9  ;;  %vm1839_vm14 = vcmp.lt.s32.totalorder %v5154_v32, 8  ;;  %vm1840_vm15 = vcmp.lt.s32.totalorder %v5155_v62, 8 }
 0x180   :  { %vm1648_vm0 = vmand %vm1520_vm8, %vm1584_vm10  ;;  %v753_v10 = vshra.s32 %v689_v16, 2  ;;  %v817_v20 = vand.u32 3, %v689_v16  ;;  %v1265_v3 = vmul.u32 8, %v625_v14  ;;  %v1266_v49 = vmul.u32 8, %v6374_v7 }
 0x181   :  { %v1455_v45 = vadd.s32 %v5154_v32, %v1391_v46  ;;  %v1456_v35 = vadd.s32 %v5155_v62, %v1392_v17  ;;  %vm1775_vm1 = vmand %vm1647_vm13, %vm1711_vm11  ;;  %v307_v2 = vadd.s32 336, %v5931_v26  ;;  %v754_v11 = vshra.s32 %v690_v43, 2 }
 0x182   :  { %vm1776_vm2 = vmand %vm1648_vm0, %vm1712_vm12  ;;  %v818_v50 = vand.u32 3, %v690_v43  ;;  %v881_v40 = vmul.u32 2, %v753_v10  ;;  %v1073_v34 = vmul.u32 2, %v817_v20  ;;  %v308_v8 = vadd.s32 344, %v5931_v26 }
 0x183   :  { %vm1903_vm3 = vmand %vm1775_vm1, %vm1839_vm14  ;;  %vm2097_vm4 = vcmp.eq.s32.totalorder %v5959_v22, %v1455_v45  ;;  %vm2098_vm5 = vcmp.eq.s32.totalorder %v5959_v22, %v1456_v35  ;;  %v371_v48 = vshra.s32 %v307_v2, 5  ;;  %v882_v55 = vmul.u32 2, %v754_v11 }
 0x184   :  { %vm1904_vm6 = vmand %vm1776_vm2, %vm1840_vm15  ;;  %v945_v18 = vadd.s32 %v881_v40, %v497_v6  ;;  %v1074_v4 = vmul.u32 2, %v818_v50  ;;  %v1137_v38 = vadd.s32 %v1073_v34, %v561_v37  ;;  %v372_v54 = vshra.s32 %v308_v8, 5 }
 0x185   :  { %vm2289_vm7 = vmand %vm1903_vm3, %vm2097_vm4  ;;  %v435_v58 = vand.u32 31, %v307_v2  ;;  %v436_v12 = vand.u32 31, %v308_v8  ;;  %v499_v60 = vshra.s32 %v371_v48, 2  ;;  %v946_v39 = vadd.s32 %v882_v55, %v6370_v53 }
 0x186   :  { %vm2290_vm8 = vmand %vm1904_vm6, %vm2098_vm5  ;;  %v2353_v44 = vsel %vm2289_vm7, 1.0, %v8260_v13  ;;  %v5092_v25 = vadd.s32 4294967295, %v945_v18  ;;  %v1138_v24 = vadd.s32 %v1074_v4, %v562_v5  ;;  %v5156_v9 = vadd.s32 4294967295, %v1137_v38 }
 0x187   :  { %v2354_v42 = vsel %vm2290_vm8, 1.0, %v8260_v13  ;;  %v500_v31 = vshra.s32 %v372_v54, 2  ;;  %v563_v30 = vand.u32 3, %v371_v48  ;;  %v5093_v59 = vadd.s32 4294967295, %v946_v39 }
 0x188   :  { %v2398_v6 = vpack.c.bf16 %v2354_v42, %v2353_v44  ;;  %v5157_v37 = vadd.s32 4294967295, %v1138_v24  ;;  %v1329_v19 = vadd.s32 %v5092_v25, %v1265_v3  ;;  %vm1521_vm9 = vcmp.ge.s32.totalorder %v5092_v25, 0 }
 0x189   :  { %vm1585_vm10 = vcmp.lt.s32.totalorder %v5092_v25, 8  ;;  %vm1713_vm11 = vcmp.ge.s32.totalorder %v5156_v9, 0  ;;  %vm1841_vm12 = vcmp.lt.s32.totalorder %v5156_v9, 8  ;;  %v1330_v51 = vadd.s32 %v5093_v59, %v1266_v49 }
 0x18a   :  { %5579 = vmatmul.mubr.bf16.gmra.mrb[36].mxu1 %v2398_v6  ;;  %v1393_v57 = vmul.u32 8, %v1329_v19  ;;  %vm1522_vm13 = vcmp.ge.s32.totalorder %v5093_v59, 0  ;;  %vm1586_vm14 = vcmp.lt.s32.totalorder %v5093_v59, 8  ;;  %vm1649_vm15 = vmand %vm1521_vm9, %vm1585_vm10  ;;  %vm1714_vm1 = vcmp.ge.s32.totalorder %v5157_v37, 0 }
 0x18b   :  { %vm1650_vm0 = vmand %vm1522_vm13, %vm1586_vm14  ;;  %vm1842_vm2 = vcmp.lt.s32.totalorder %v5157_v37, 8  ;;  %v564_v53 = vand.u32 3, %v372_v54  ;;  %v627_v5 = vshra.s32 %v435_v58, 4  ;;  %v1394_v23 = vmul.u32 8, %v1330_v51 }
 0x18c   :  { %v1457_v21 = vadd.s32 %v5156_v9, %v1393_v57  ;;  %vm1777_vm3 = vmand %vm1649_vm15, %vm1713_vm11  ;;  %v628_v14 = vshra.s32 %v436_v12, 4  ;;  %v691_v32 = vand.u32 15, %v435_v58  ;;  %v692_v62 = vand.u32 15, %v436_v12 }
 0x18d   :  { %vm1778_vm4 = vmand %vm1650_vm0, %vm1714_vm1  ;;  %v1267_v7 = vmul.u32 8, %v627_v5  ;;  %v309_v16 = vadd.s32 352, %v5931_v26  ;;  %v310_v15 = vadd.s32 360, %v5931_v26  ;;  %v1458_v56 = vadd.s32 %v5157_v37, %v1394_v23 }
 0x18e   :  { %vm1905_vm5 = vmand %vm1777_vm3, %vm1841_vm12  ;;  %vm2099_vm6 = vcmp.eq.s32.totalorder %v5959_v22, %v1457_v21  ;;  %v755_v46 = vshra.s32 %v691_v32, 2  ;;  %v819_v17 = vand.u32 3, %v691_v32  ;;  %v756_v43 = vshra.s32 %v692_v62, 2 }
 0x18f   :  { %vm1906_vm7 = vmand %vm1778_vm4, %vm1842_vm2  ;;  %v820_v10 = vand.u32 3, %v692_v62  ;;  %v1268_v20 = vmul.u32 8, %v628_v14  ;;  %v373_v3 = vshra.s32 %v309_v16, 5  ;;  %vm2100_vm8 = vcmp.eq.s32.totalorder %v5959_v22, %v1458_v56 }
 0x190   :  { %vm2291_vm9 = vmand %vm1905_vm5, %vm2099_vm6  ;;  %v883_v45 = vmul.u32 2, %v755_v46  ;;  %v1075_v35 = vmul.u32 2, %v819_v17  ;;  %v374_v49 = vshra.s32 %v310_v15, 5  ;;  %v437_v40 = vand.u32 31, %v309_v16 }
 0x191   :  { %vm2292_vm10 = vmand %vm1906_vm7, %vm2100_vm8  ;;  %v2355_v2 = vsel %vm2291_vm9, 1.0, %v8260_v13  ;;  %v884_v11 = vmul.u32 2, %v756_v43  ;;  %v1076_v50 = vmul.u32 2, %v820_v10  ;;  %v438_v55 = vand.u32 31, %v310_v15 }
 0x192   :  { %v2356_v34 = vsel %vm2292_vm10, 1.0, %v8260_v13  ;;  %v947_v8 = vadd.s32 %v883_v45, %v499_v60  ;;  %v1139_v48 = vadd.s32 %v1075_v35, %v563_v30  ;;  %v501_v54 = vshra.s32 %v373_v3, 2 }
 0x193   :  { %v2399_v18 = vpack.c.bf16 %v2356_v34, %v2355_v2  ;;  %v948_v4 = vadd.s32 %v884_v11, %v500_v31  ;;  %v1140_v38 = vadd.s32 %v1076_v50, %v564_v53  ;;  %v502_v44 = vshra.s32 %v374_v49, 2 }
 0x194   :  { %v5094_v58 = vadd.s32 4294967295, %v947_v8  ;;  %v5158_v12 = vadd.s32 4294967295, %v1139_v48  ;;  %v565_v39 = vand.u32 3, %v373_v3  ;;  %v566_v42 = vand.u32 3, %v374_v49 }
 0x195   :  { %5582 = vmatprep.mubr.bf16.mxu1 %v2399_v18  ;;  %v5095_v25 = vadd.s32 4294967295, %v948_v4  ;;  %v5159_v24 = vadd.s32 4294967295, %v1140_v38  ;;  %v6396_v9 = vshra.s32 %v437_v40, 4  ;;  %v630_v30 = vshra.s32 %v438_v55, 4 }
 0x196   :  { %v1331_v6 = vadd.s32 %v5094_v58, %v1267_v7  ;;  %vm1523_vm11 = vcmp.ge.s32.totalorder %v5094_v58, 0  ;;  %vm1587_vm12 = vcmp.lt.s32.totalorder %v5094_v58, 8  ;;  %vm1715_vm13 = vcmp.ge.s32.totalorder %v5158_v12, 0 }
 0x197   :  { %v1332_v60 = vadd.s32 %v5095_v25, %v1268_v20  ;;  %vm1524_vm14 = vcmp.ge.s32.totalorder %v5095_v25, 0  ;;  %vm1588_vm15 = vcmp.lt.s32.totalorder %v5095_v25, 8  ;;  %vm1651_vm0 = vmand %vm1523_vm11, %vm1587_vm12  ;;  %vm1716_vm1 = vcmp.ge.s32.totalorder %v5159_v24, 0 }
 0x198   :  { %v1395_v31 = vmul.u32 8, %v1331_v6  ;;  %vm1652_vm2 = vmand %vm1524_vm14, %vm1588_vm15  ;;  %vm1843_vm3 = vcmp.lt.s32.totalorder %v5158_v12, 8  ;;  %vm1844_vm4 = vcmp.lt.s32.totalorder %v5159_v24, 8  ;;  %v693_v37 = vand.u32 15, %v437_v40 }
 0x199   :  { %v1396_v59 = vmul.u32 8, %v1332_v60  ;;  %vm1779_vm5 = vmand %vm1651_vm0, %vm1715_vm13  ;;  %v694_v19 = vand.u32 15, %v438_v55  ;;  %v1269_v51 = vmul.u32 8, %v6396_v9  ;;  %v311_v5 = vadd.s32 368, %v5931_v26 }
 0x19a   :  { %v1459_v57 = vadd.s32 %v5158_v12, %v1395_v31  ;;  %vm1780_vm6 = vmand %vm1652_vm2, %vm1716_vm1  ;;  %v1270_v53 = vmul.u32 8, %v630_v30  ;;  %v312_v23 = vadd.s32 376, %v5931_v26  ;;  %v757_v14 = vshra.s32 %v693_v37, 2 }
 0x19b   :  { %v1460_v21 = vadd.s32 %v5159_v24, %v1396_v59  ;;  %vm1907_vm7 = vmand %vm1779_vm5, %vm1843_vm3  ;;  %v758_v32 = vshra.s32 %v694_v19, 2  ;;  %v821_v62 = vand.u32 3, %v693_v37  ;;  %v822_v7 = vand.u32 3, %v694_v19 }
 0x19c   :  { %vm1908_vm8 = vmand %vm1780_vm6, %vm1844_vm4  ;;  %vm2101_vm9 = vcmp.eq.s32.totalorder %v5959_v22, %v1459_v57  ;;  %v375_v16 = vshra.s32 %v311_v5, 5  ;;  %v376_v15 = vshra.s32 %v312_v23, 5  ;;  %v885_v56 = vmul.u32 2, %v757_v14 }
 0x19d   :  { %vm2102_vm10 = vcmp.eq.s32.totalorder %v5959_v22, %v1460_v21  ;;  %vm2293_vm11 = vmand %vm1907_vm7, %vm2101_vm9  ;;  %v886_v46 = vmul.u32 2, %v758_v32  ;;  %v439_v17 = vand.u32 31, %v311_v5  ;;  %v1077_v10 = vmul.u32 2, %v821_v62 }
 0x19e   :  { %vm2294_vm12 = vmand %vm1908_vm8, %vm2102_vm10  ;;  %v2357_v43 = vsel %vm2293_vm11, 1.0, %v8260_v13  ;;  %v1078_v20 = vmul.u32 2, %v822_v7  ;;  %v440_v3 = vand.u32 31, %v312_v23  ;;  %v949_v35 = vadd.s32 %v885_v56, %v501_v54 }
 0x19f   :  { %v2358_v45 = vsel %vm2294_vm12, 1.0, %v8260_v13  ;;  %v950_v49 = vadd.s32 %v886_v46, %v502_v44  ;;  %v503_v2 = vshra.s32 %v375_v16, 2  ;;  %v1141_v50 = vadd.s32 %v1077_v10, %v565_v39 }
 0x1a0   :  { %v2400_v11 = vpack.c.bf16 %v2358_v45, %v2357_v43  ;;  %v1142_v40 = vadd.s32 %v1078_v20, %v566_v42  ;;  %v504_v34 = vshra.s32 %v376_v15, 2  ;;  %v5096_v8 = vadd.s32 4294967295, %v949_v35 }
 0x1a1   :  { %v5097_v48 = vadd.s32 4294967295, %v950_v49  ;;  %v567_v55 = vand.u32 3, %v375_v16  ;;  %v568_v18 = vand.u32 3, %v376_v15  ;;  %v5160_v4 = vadd.s32 4294967295, %v1141_v50 }
 0x1a2   :  { %5583 = vmatmul.mubr.bf16.gmra.mrb[40].mxu1 %v2400_v11  ;;  %v5161_v38 = vadd.s32 4294967295, %v1142_v40  ;;  %v6406_v58 = vshra.s32 %v439_v17, 4  ;;  %v6408_v12 = vshra.s32 %v440_v3, 4  ;;  %v1333_v25 = vadd.s32 %v5096_v8, %v1269_v51 }
 0x1a3   :  { %v1334_v24 = vadd.s32 %v5097_v48, %v1270_v53  ;;  %vm1525_vm13 = vcmp.ge.s32.totalorder %v5096_v8, 0  ;;  %vm1526_vm14 = vcmp.ge.s32.totalorder %v5097_v48, 0  ;;  %vm1589_vm15 = vcmp.lt.s32.totalorder %v5096_v8, 8 }
 0x1a4   :  { %vm1590_vm0 = vcmp.lt.s32.totalorder %v5097_v48, 8  ;;  %vm1717_vm1 = vcmp.ge.s32.totalorder %v5160_v4, 0  ;;  %vm1718_vm2 = vcmp.ge.s32.totalorder %v5161_v38, 0  ;;  %v1397_v54 = vmul.u32 8, %v1333_v25  ;;  %vm1653_vm3 = vmand %vm1525_vm13, %vm1589_vm15 }
 0x1a5   :  { %v1398_v44 = vmul.u32 8, %v1334_v24  ;;  %vm1845_vm4 = vcmp.lt.s32.totalorder %v5160_v4, 8  ;;  %vm1846_vm5 = vcmp.lt.s32.totalorder %v5161_v38, 8  ;;  %vm1654_vm6 = vmand %vm1526_vm14, %vm1590_vm0  ;;  %v695_v39 = vand.u32 15, %v439_v17 }
 0x1a6   :  { %v696_v42 = vand.u32 15, %v440_v3  ;;  %v1271_v9 = vmul.u32 8, %v6406_v58  ;;  %v1272_v6 = vmul.u32 8, %v6408_v12  ;;  %v1461_v60 = vadd.s32 %v5160_v4, %v1397_v54  ;;  %vm1781_vm7 = vmand %vm1653_vm3, %vm1717_vm1 }
 0x1a7   :  { %v1462_v31 = vadd.s32 %v5161_v38, %v1398_v44  ;;  %v313_v30 = vadd.s32 384, %v5931_v26  ;;  %v314_v59 = vadd.s32 392, %v5931_v26  ;;  %vm1782_vm8 = vmand %vm1654_vm6, %vm1718_vm2  ;;  %v759_v37 = vshra.s32 %v695_v39, 2 }
 0x1a8   :  { %v760_v19 = vshra.s32 %v696_v42, 2  ;;  %v823_v51 = vand.u32 3, %v695_v39  ;;  %v824_v57 = vand.u32 3, %v696_v42  ;;  %vm1909_vm9 = vmand %vm1781_vm7, %vm1845_vm4  ;;  %vm2103_vm10 = vcmp.eq.s32.totalorder %v5959_v22, %v1461_v60 }
 0x1a9   :  { %vm2104_vm11 = vcmp.eq.s32.totalorder %v5959_v22, %v1462_v31  ;;  %v377_v53 = vshra.s32 %v313_v30, 5  ;;  %v378_v5 = vshra.s32 %v314_v59, 5  ;;  %vm1910_vm12 = vmand %vm1782_vm8, %vm1846_vm5  ;;  %v887_v23 = vmul.u32 2, %v759_v37 }
 0x1aa   :  { %v888_v21 = vmul.u32 2, %v760_v19  ;;  %v441_v14 = vand.u32 31, %v313_v30  ;;  %v442_v32 = vand.u32 31, %v314_v59  ;;  %vm2295_vm13 = vmand %vm1909_vm9, %vm2103_vm10  ;;  %v1079_v62 = vmul.u32 2, %v823_v51 }
 0x1ab   :  { %v1080_v7 = vmul.u32 2, %v824_v57  ;;  %v505_v16 = vshra.s32 %v377_v53, 2  ;;  %v6419_v15 = vshra.s32 %v378_v5, 2  ;;  %vm2296_vm14 = vmand %vm1910_vm12, %vm2104_vm11  ;;  %v2359_v56 = vsel %vm2295_vm13, 1.0, %v8260_v13 }
 0x1ac   :  { %v951_v46 = vadd.s32 %v887_v23, %v503_v2  ;;  %v952_v17 = vadd.s32 %v888_v21, %v504_v34  ;;  %v569_v43 = vand.u32 3, %v377_v53  ;;  %v2360_v10 = vsel %vm2296_vm14, 1.0, %v8260_v13 }
 0x1ad   :  { %v1143_v20 = vadd.s32 %v1079_v62, %v567_v55  ;;  %v1144_v3 = vadd.s32 %v1080_v7, %v568_v18  ;;  %v570_v45 = vand.u32 3, %v378_v5  ;;  %v2401_v35 = vpack.c.bf16 %v2360_v10, %v2359_v56 }
 0x1ae   :  { %v5098_v49 = vadd.s32 4294967295, %v951_v46  ;;  %v5099_v11 = vadd.s32 4294967295, %v952_v17  ;;  %v633_v50 = vshra.s32 %v441_v14, 4  ;;  %v6423_v48 = vshra.s32 %v442_v32, 4 }
 0x1af   :  { %v5162_v40 = vadd.s32 4294967295, %v1143_v20  ;;  %v5163_v8 = vadd.s32 4294967295, %v1144_v3  ;;  %v697_v4 = vand.u32 15, %v441_v14  ;;  %5586 = vmatprep.mubr.bf16.mxu1 %v2401_v35  ;;  %v698_v55 = vand.u32 15, %v442_v32 }
 0x1b0   :  { %v1335_v38 = vadd.s32 %v5098_v49, %v1271_v9  ;;  %v1336_v58 = vadd.s32 %v5099_v11, %v1272_v6  ;;  %vm1527_vm15 = vcmp.ge.s32.totalorder %v5098_v49, 0  ;;  %vm1528_vm0 = vcmp.ge.s32.totalorder %v5099_v11, 0 }
 0x1b1   :  { %vm1591_vm1 = vcmp.lt.s32.totalorder %v5098_v49, 8  ;;  %vm1592_vm2 = vcmp.lt.s32.totalorder %v5099_v11, 8  ;;  %vm1719_vm3 = vcmp.ge.s32.totalorder %v5162_v40, 0  ;;  %vm1720_vm4 = vcmp.ge.s32.totalorder %v5163_v8, 0 }
 0x1b2   :  { %v1399_v2 = vmul.u32 8, %v1335_v38  ;;  %v1400_v34 = vmul.u32 8, %v1336_v58  ;;  %vm1655_vm5 = vmand %vm1527_vm15, %vm1591_vm1  ;;  %vm1847_vm6 = vcmp.lt.s32.totalorder %v5162_v40, 8  ;;  %vm1848_vm7 = vcmp.lt.s32.totalorder %v5163_v8, 8 }
 0x1b3   :  { %vm1656_vm8 = vmand %vm1528_vm0, %vm1592_vm2  ;;  %v761_v18 = vshra.s32 %v697_v4, 2  ;;  %v825_v12 = vand.u32 3, %v697_v4  ;;  %v1273_v25 = vmul.u32 8, %v633_v50  ;;  %v1274_v44 = vmul.u32 8, %v6423_v48 }
 0x1b4   :  { %v1463_v24 = vadd.s32 %v5162_v40, %v1399_v2  ;;  %v1464_v54 = vadd.s32 %v5163_v8, %v1400_v34  ;;  %vm1783_vm9 = vmand %vm1655_vm5, %vm1719_vm3  ;;  %v315_v39 = vadd.s32 400, %v5931_v26  ;;  %v762_v42 = vshra.s32 %v698_v55, 2 }
 0x1b5   :  { %vm1784_vm10 = vmand %vm1656_vm8, %vm1720_vm4  ;;  %v826_v9 = vand.u32 3, %v698_v55  ;;  %v889_v6 = vmul.u32 2, %v761_v18  ;;  %v1081_v60 = vmul.u32 2, %v825_v12  ;;  %v316_v31 = vadd.s32 408, %v5931_v26 }
 0x1b6   :  { %vm1911_vm11 = vmand %vm1783_vm9, %vm1847_vm6  ;;  %vm2105_vm12 = vcmp.eq.s32.totalorder %v5959_v22, %v1463_v24  ;;  %vm2106_vm13 = vcmp.eq.s32.totalorder %v5959_v22, %v1464_v54  ;;  %v379_v30 = vshra.s32 %v315_v39, 5  ;;  %v890_v59 = vmul.u32 2, %v762_v42 }
 0x1b7   :  { %vm1912_vm14 = vmand %vm1784_vm10, %vm1848_vm7  ;;  %v953_v37 = vadd.s32 %v889_v6, %v505_v16  ;;  %v1082_v19 = vmul.u32 2, %v826_v9  ;;  %v1145_v51 = vadd.s32 %v1081_v60, %v569_v43  ;;  %v380_v57 = vshra.s32 %v316_v31, 5 }
 0x1b8   :  { %vm2297_vm15 = vmand %vm1911_vm11, %vm2105_vm12  ;;  %v443_v53 = vand.u32 31, %v315_v39  ;;  %v444_v5 = vand.u32 31, %v316_v31  ;;  %v507_v23 = vshra.s32 %v379_v30, 2  ;;  %v954_v14 = vadd.s32 %v890_v59, %v6419_v15 }
 0x1b9   :  { %vm2298_vm0 = vmand %vm1912_vm14, %vm2106_vm13  ;;  %v2361_v21 = vsel %vm2297_vm15, 1.0, %v8260_v13  ;;  %v5100_v32 = vadd.s32 4294967295, %v953_v37  ;;  %v1146_v62 = vadd.s32 %v1082_v19, %v570_v45  ;;  %v5164_v56 = vadd.s32 4294967295, %v1145_v51 }
 0x1ba   :  { %v2362_v7 = vsel %vm2298_vm0, 1.0, %v8260_v13  ;;  %v508_v46 = vshra.s32 %v380_v57, 2  ;;  %v571_v17 = vand.u32 3, %v379_v30  ;;  %v5101_v10 = vadd.s32 4294967295, %v954_v14 }
 0x1bb   :  { %v2402_v16 = vpack.c.bf16 %v2362_v7, %v2361_v21  ;;  %v5165_v43 = vadd.s32 4294967295, %v1146_v62  ;;  %v1337_v20 = vadd.s32 %v5100_v32, %v1273_v25  ;;  %vm1529_vm1 = vcmp.ge.s32.totalorder %v5100_v32, 0 }
 0x1bc   :  { %vm1593_vm2 = vcmp.lt.s32.totalorder %v5100_v32, 8  ;;  %vm1721_vm3 = vcmp.ge.s32.totalorder %v5164_v56, 0  ;;  %vm1849_vm4 = vcmp.lt.s32.totalorder %v5164_v56, 8  ;;  %v1338_v3 = vadd.s32 %v5101_v10, %v1274_v44 }
 0x1bd   :  { %5587 = vmatmul.mubr.bf16.gmra.mrb[44].mxu1 %v2402_v16  ;;  %v1401_v35 = vmul.u32 8, %v1337_v20  ;;  %vm1530_vm5 = vcmp.ge.s32.totalorder %v5101_v10, 0  ;;  %vm1594_vm6 = vcmp.lt.s32.totalorder %v5101_v10, 8  ;;  %vm1657_vm7 = vmand %vm1529_vm1, %vm1593_vm2  ;;  %vm1722_vm9 = vcmp.ge.s32.totalorder %v5165_v43, 0 }
 0x1be   :  { %vm1658_vm8 = vmand %vm1530_vm5, %vm1594_vm6  ;;  %vm1850_vm10 = vcmp.lt.s32.totalorder %v5165_v43, 8  ;;  %v572_v15 = vand.u32 3, %v380_v57  ;;  %v635_v45 = vshra.s32 %v443_v53, 4  ;;  %v1402_v49 = vmul.u32 8, %v1338_v3 }
 0x1bf   :  { %v1465_v11 = vadd.s32 %v5164_v56, %v1401_v35  ;;  %vm1785_vm11 = vmand %vm1657_vm7, %vm1721_vm3  ;;  %v636_v50 = vshra.s32 %v444_v5, 4  ;;  %v699_v40 = vand.u32 15, %v443_v53  ;;  %v700_v8 = vand.u32 15, %v444_v5 }
 0x1c0   :  { %vm1786_vm12 = vmand %vm1658_vm8, %vm1722_vm9  ;;  %v1275_v48 = vmul.u32 8, %v635_v45  ;;  %v317_v4 = vadd.s32 416, %v5931_v26  ;;  %v318_v38 = vadd.s32 424, %v5931_v26  ;;  %v1466_v58 = vadd.s32 %v5165_v43, %v1402_v49 }
 0x1c1   :  { %vm1913_vm13 = vmand %vm1785_vm11, %vm1849_vm4  ;;  %vm2107_vm14 = vcmp.eq.s32.totalorder %v5959_v22, %v1465_v11  ;;  %v763_v2 = vshra.s32 %v699_v40, 2  ;;  %v827_v34 = vand.u32 3, %v699_v40  ;;  %v764_v55 = vshra.s32 %v700_v8, 2 }
 0x1c2   :  { %vm1914_vm15 = vmand %vm1786_vm12, %vm1850_vm10  ;;  %v828_v18 = vand.u32 3, %v700_v8  ;;  %v1276_v12 = vmul.u32 8, %v636_v50  ;;  %v381_v25 = vshra.s32 %v317_v4, 5  ;;  %vm2108_vm0 = vcmp.eq.s32.totalorder %v5959_v22, %v1466_v58 }
 0x1c3   :  { %vm2299_vm1 = vmand %vm1913_vm13, %vm2107_vm14  ;;  %v891_v24 = vmul.u32 2, %v763_v2  ;;  %v1083_v54 = vmul.u32 2, %v827_v34  ;;  %v382_v44 = vshra.s32 %v318_v38, 5  ;;  %v445_v6 = vand.u32 31, %v317_v4 }
 0x1c4   :  { %vm2300_vm2 = vmand %vm1914_vm15, %vm2108_vm0  ;;  %v2363_v39 = vsel %vm2299_vm1, 1.0, %v8260_v13  ;;  %v892_v42 = vmul.u32 2, %v764_v55  ;;  %v1084_v9 = vmul.u32 2, %v828_v18  ;;  %v446_v59 = vand.u32 31, %v318_v38 }
 0x1c5   :  { %v2364_v60 = vsel %vm2300_vm2, 1.0, %v8260_v13  ;;  %v955_v31 = vadd.s32 %v891_v24, %v507_v23  ;;  %v1147_v30 = vadd.s32 %v1083_v54, %v571_v17  ;;  %v509_v57 = vshra.s32 %v381_v25, 2 }
 0x1c6   :  { %v2403_v37 = vpack.c.bf16 %v2364_v60, %v2363_v39  ;;  %v956_v19 = vadd.s32 %v892_v42, %v508_v46  ;;  %v1148_v51 = vadd.s32 %v1084_v9, %v572_v15  ;;  %v510_v21 = vshra.s32 %v382_v44, 2 }
 0x1c7   :  { %v5102_v53 = vadd.s32 4294967295, %v955_v31  ;;  %v5166_v5 = vadd.s32 4294967295, %v1147_v30  ;;  %v573_v14 = vand.u32 3, %v381_v25  ;;  %v574_v7 = vand.u32 3, %v382_v44 }
 0x1c8   :  { %5590 = vmatprep.mubr.bf16.mxu1 %v2403_v37  ;;  %v5103_v32 = vadd.s32 4294967295, %v956_v19  ;;  %v5167_v62 = vadd.s32 4294967295, %v1148_v51  ;;  %v6445_v56 = vshra.s32 %v445_v6, 4  ;;  %v638_v17 = vshra.s32 %v446_v59, 4 }
 0x1c9   :  { %v1339_v16 = vadd.s32 %v5102_v53, %v1275_v48  ;;  %vm1531_vm3 = vcmp.ge.s32.totalorder %v5102_v53, 0  ;;  %vm1595_vm4 = vcmp.lt.s32.totalorder %v5102_v53, 8  ;;  %vm1723_vm5 = vcmp.ge.s32.totalorder %v5166_v5, 0 }
 0x1ca   :  { %v1340_v23 = vadd.s32 %v5103_v32, %v1276_v12  ;;  %vm1532_vm6 = vcmp.ge.s32.totalorder %v5103_v32, 0  ;;  %vm1596_vm7 = vcmp.lt.s32.totalorder %v5103_v32, 8  ;;  %vm1659_vm8 = vmand %vm1531_vm3, %vm1595_vm4  ;;  %vm1724_vm9 = vcmp.ge.s32.totalorder %v5167_v62, 0 }
 0x1cb   :  { %v1403_v46 = vmul.u32 8, %v1339_v16  ;;  %vm1660_vm10 = vmand %vm1532_vm6, %vm1596_vm7  ;;  %vm1851_vm11 = vcmp.lt.s32.totalorder %v5166_v5, 8  ;;  %vm1852_vm12 = vcmp.lt.s32.totalorder %v5167_v62, 8  ;;  %v701_v43 = vand.u32 15, %v445_v6 }
 0x1cc   :  { %v1404_v10 = vmul.u32 8, %v1340_v23  ;;  %vm1787_vm13 = vmand %vm1659_vm8, %vm1723_vm5  ;;  %v702_v20 = vand.u32 15, %v446_v59  ;;  %v1277_v3 = vmul.u32 8, %v6445_v56  ;;  %v319_v45 = vadd.s32 432, %v5931_v26 }
 0x1cd   :  { %v1467_v35 = vadd.s32 %v5166_v5, %v1403_v46  ;;  %vm1788_vm14 = vmand %vm1660_vm10, %vm1724_vm9  ;;  %v1278_v15 = vmul.u32 8, %v638_v17  ;;  %v320_v49 = vadd.s32 440, %v5931_v26  ;;  %v765_v50 = vshra.s32 %v701_v43, 2 }
 0x1ce   :  { %v1468_v11 = vadd.s32 %v5167_v62, %v1404_v10  ;;  %vm1915_vm15 = vmand %vm1787_vm13, %vm1851_vm11  ;;  %v766_v40 = vshra.s32 %v702_v20, 2  ;;  %v829_v8 = vand.u32 3, %v701_v43  ;;  %v830_v48 = vand.u32 3, %v702_v20 }
 0x1cf   :  { %vm1916_vm0 = vmand %vm1788_vm14, %vm1852_vm12  ;;  %vm2109_vm1 = vcmp.eq.s32.totalorder %v5959_v22, %v1467_v35  ;;  %v383_v4 = vshra.s32 %v319_v45, 5  ;;  %v384_v38 = vshra.s32 %v320_v49, 5  ;;  %v893_v58 = vmul.u32 2, %v765_v50 }
 0x1d0   :  { %vm2110_vm2 = vcmp.eq.s32.totalorder %v5959_v22, %v1468_v11  ;;  %vm2301_vm3 = vmand %vm1915_vm15, %vm2109_vm1  ;;  %v894_v2 = vmul.u32 2, %v766_v40  ;;  %v447_v34 = vand.u32 31, %v319_v45  ;;  %v1085_v18 = vmul.u32 2, %v829_v8 }
 0x1d1   :  { %vm2302_vm4 = vmand %vm1916_vm0, %vm2110_vm2  ;;  %v2365_v55 = vsel %vm2301_vm3, 1.0, %v8260_v13  ;;  %v1086_v12 = vmul.u32 2, %v830_v48  ;;  %v448_v25 = vand.u32 31, %v320_v49  ;;  %v957_v54 = vadd.s32 %v893_v58, %v509_v57 }
 0x1d2   :  { %v2366_v24 = vsel %vm2302_vm4, 1.0, %v8260_v13  ;;  %v958_v44 = vadd.s32 %v894_v2, %v510_v21  ;;  %v511_v39 = vshra.s32 %v383_v4, 2  ;;  %v1149_v9 = vadd.s32 %v1085_v18, %v573_v14 }
 0x1d3   :  { %v2404_v42 = vpack.c.bf16 %v2366_v24, %v2365_v55  ;;  %v1150_v6 = vadd.s32 %v1086_v12, %v574_v7  ;;  %v512_v60 = vshra.s32 %v384_v38, 2  ;;  %v5104_v31 = vadd.s32 4294967295, %v957_v54 }
 0x1d4   :  { %v5105_v30 = vadd.s32 4294967295, %v958_v44  ;;  %v575_v59 = vand.u32 3, %v383_v4  ;;  %v576_v37 = vand.u32 3, %v384_v38  ;;  %v5168_v19 = vadd.s32 4294967295, %v1149_v9 }
 0x1d5   :  { %5591 = vmatmul.mubr.bf16.gmra.mrb[48].mxu1 %v2404_v42  ;;  %v5169_v51 = vadd.s32 4294967295, %v1150_v6  ;;  %v6455_v53 = vshra.s32 %v447_v34, 4  ;;  %v6457_v5 = vshra.s32 %v448_v25, 4  ;;  %v1341_v32 = vadd.s32 %v5104_v31, %v1277_v3 }
 0x1d6   :  { %v1342_v62 = vadd.s32 %v5105_v30, %v1278_v15  ;;  %vm1533_vm5 = vcmp.ge.s32.totalorder %v5104_v31, 0  ;;  %vm1534_vm6 = vcmp.ge.s32.totalorder %v5105_v30, 0  ;;  %vm1597_vm7 = vcmp.lt.s32.totalorder %v5104_v31, 8 }
 0x1d7   :  { %vm1598_vm8 = vcmp.lt.s32.totalorder %v5105_v30, 8  ;;  %vm1725_vm9 = vcmp.ge.s32.totalorder %v5168_v19, 0  ;;  %vm1726_vm10 = vcmp.ge.s32.totalorder %v5169_v51, 0  ;;  %v1405_v57 = vmul.u32 8, %v1341_v32  ;;  %vm1661_vm11 = vmand %vm1533_vm5, %vm1597_vm7 }
 0x1d8   :  { %v1406_v21 = vmul.u32 8, %v1342_v62  ;;  %vm1853_vm12 = vcmp.lt.s32.totalorder %v5168_v19, 8  ;;  %vm1854_vm13 = vcmp.lt.s32.totalorder %v5169_v51, 8  ;;  %vm1662_vm14 = vmand %vm1534_vm6, %vm1598_vm8  ;;  %v703_v14 = vand.u32 15, %v447_v34 }
 0x1d9   :  { %v704_v7 = vand.u32 15, %v448_v25  ;;  %v1279_v56 = vmul.u32 8, %v6455_v53  ;;  %v1280_v16 = vmul.u32 8, %v6457_v5  ;;  %v1469_v23 = vadd.s32 %v5168_v19, %v1405_v57  ;;  %vm1789_vm15 = vmand %vm1661_vm11, %vm1725_vm9 }
 0x1da   :  { %v1470_v46 = vadd.s32 %v5169_v51, %v1406_v21  ;;  %v321_v17 = vadd.s32 448, %v5931_v26  ;;  %v322_v10 = vadd.s32 456, %v5931_v26  ;;  %vm1790_vm0 = vmand %vm1662_vm14, %vm1726_vm10  ;;  %v767_v43 = vshra.s32 %v703_v14, 2 }
 0x1db   :  { %v768_v20 = vshra.s32 %v704_v7, 2  ;;  %v831_v3 = vand.u32 3, %v703_v14  ;;  %v832_v35 = vand.u32 3, %v704_v7  ;;  %vm1917_vm1 = vmand %vm1789_vm15, %vm1853_vm12  ;;  %vm2111_vm2 = vcmp.eq.s32.totalorder %v5959_v22, %v1469_v23 }
 0x1dc   :  { %vm2112_vm3 = vcmp.eq.s32.totalorder %v5959_v22, %v1470_v46  ;;  %v385_v15 = vshra.s32 %v321_v17, 5  ;;  %v386_v45 = vshra.s32 %v322_v10, 5  ;;  %vm1918_vm4 = vmand %vm1790_vm0, %vm1854_vm13  ;;  %v895_v49 = vmul.u32 2, %v767_v43 }
 0x1dd   :  { %v896_v11 = vmul.u32 2, %v768_v20  ;;  %v449_v50 = vand.u32 31, %v321_v17  ;;  %v450_v40 = vand.u32 31, %v322_v10  ;;  %vm2303_vm5 = vmand %vm1917_vm1, %vm2111_vm2  ;;  %v1087_v8 = vmul.u32 2, %v831_v3 }
 0x1de   :  { %v1088_v48 = vmul.u32 2, %v832_v35  ;;  %v513_v4 = vshra.s32 %v385_v15, 2  ;;  %v6468_v38 = vshra.s32 %v386_v45, 2  ;;  %vm2304_vm6 = vmand %vm1918_vm4, %vm2112_vm3  ;;  %v2367_v58 = vsel %vm2303_vm5, 1.0, %v8260_v13  ;;  %v6471_v18 = vpop.f32.mrb[0].mxu1 }
 0x1df   :  { %v959_v2 = vadd.s32 %v895_v49, %v511_v39  ;;  %v960_v34 = vadd.s32 %v896_v11, %v512_v60  ;;  %v577_v55 = vand.u32 3, %v385_v15  ;;  %v2368_v12 = vsel %vm2304_vm6, 1.0, %v8260_v13  ;;  %v6476_v44 = vpop.f32.mrb[1].mxu1 }
 0x1e0   :  { %v1151_v25 = vadd.s32 %v1087_v8, %v575_v59  ;;  %v1152_v24 = vadd.s32 %v1088_v48, %v576_v37  ;;  %v6474_v54 = vand.u32 3, %v386_v45  ;;  %v2405_v42 = vpack.c.bf16 %v2368_v12, %v2367_v58  ;;  %v6480_v30 = vpop.f32.mrb[2].mxu1 }
 0x1e1   :  { %v5106_v9 = vadd.s32 4294967295, %v959_v2  ;;  %v5107_v6 = vadd.s32 4294967295, %v960_v34  ;;  %v6478_v31 = vshra.s32 %v449_v50, 4  ;;  %v6482_v19 = vshra.s32 %v450_v40, 4  ;;  %v6484_v53 = vpop.f32.mrb[3].mxu1 }
 0x1e2   :  { %v5170_v39 = vadd.s32 4294967295, %v1151_v25  ;;  %v5171_v60 = vadd.s32 4294967295, %v1152_v24  ;;  %v705_v51 = vand.u32 15, %v449_v50  ;;  %5594 = vmatprep.mubr.bf16.mxu1 %v2405_v42  ;;  %v706_v62 = vand.u32 15, %v450_v40 }
 0x1e3   :  { %v1343_v59 = vadd.s32 %v5106_v9, %v1279_v56  ;;  %v1344_v37 = vadd.s32 %v5107_v6, %v1280_v16  ;;  %vm1535_vm7 = vcmp.ge.s32.totalorder %v5106_v9, 0  ;;  %vm1536_vm8 = vcmp.ge.s32.totalorder %v5107_v6, 0 }
 0x1e4   :  { %vm1599_vm9 = vcmp.lt.s32.totalorder %v5106_v9, 8  ;;  %vm1600_vm10 = vcmp.lt.s32.totalorder %v5107_v6, 8  ;;  %vm1727_vm11 = vcmp.ge.s32.totalorder %v5170_v39, 0  ;;  %vm1728_vm12 = vcmp.ge.s32.totalorder %v5171_v60, 0 }
 0x1e5   :  { %v1407_v5 = vmul.u32 8, %v1343_v59  ;;  %v1408_v32 = vmul.u32 8, %v1344_v37  ;;  %vm1663_vm13 = vmand %vm1535_vm7, %vm1599_vm9  ;;  %vm1855_vm14 = vcmp.lt.s32.totalorder %v5170_v39, 8  ;;  %vm1856_vm15 = vcmp.lt.s32.totalorder %v5171_v60, 8 }
 0x1e6   :  { %vm1664_vm0 = vmand %vm1536_vm8, %vm1600_vm10  ;;  %v769_v57 = vshra.s32 %v705_v51, 2  ;;  %v833_v21 = vand.u32 3, %v705_v51  ;;  %v1281_v14 = vmul.u32 8, %v6478_v31  ;;  %v1282_v16 = vmul.u32 8, %v6482_v19 }
 0x1e7   :  { %v1471_v7 = vadd.s32 %v5170_v39, %v1407_v5  ;;  %v1472_v56 = vadd.s32 %v5171_v60, %v1408_v32  ;;  %vm1791_vm1 = vmand %vm1663_vm13, %vm1727_vm11  ;;  %v323_v23 = vadd.s32 464, %v5931_v26  ;;  %v6489_v46 = vpop.f32.mrb[4].mxu1  ;;  %v770_v17 = vshra.s32 %v706_v62, 2 }
 0x1e8   :  { %vm1792_vm2 = vmand %vm1664_vm0, %vm1728_vm12  ;;  %v834_v10 = vand.u32 3, %v706_v62  ;;  %v897_v43 = vmul.u32 2, %v769_v57  ;;  %v1089_v20 = vmul.u32 2, %v833_v21  ;;  %v6492_v3 = vpop.f32.mrb[5].mxu1  ;;  %v324_v35 = vadd.s32 472, %v5931_v26 }
 0x1e9   :  { %vm1919_vm3 = vmand %vm1791_vm1, %vm1855_vm14  ;;  %vm2113_vm4 = vcmp.eq.s32.totalorder %v5959_v22, %v1471_v7  ;;  %vm2114_vm5 = vcmp.eq.s32.totalorder %v5959_v22, %v1472_v56  ;;  %v387_v15 = vshra.s32 %v323_v23, 5  ;;  %v6498_v45 = vpop.f32.mrb[6].mxu1  ;;  %v898_v49 = vmul.u32 2, %v770_v17 }
 0x1ea   :  { %vm1920_vm6 = vmand %vm1792_vm2, %vm1856_vm15  ;;  %v961_v11 = vadd.s32 %v897_v43, %v513_v4  ;;  %v1090_v50 = vmul.u32 2, %v834_v10  ;;  %v1153_v40 = vadd.s32 %v1089_v20, %v577_v55  ;;  %v6501_v8 = vpop.f32.mrb[7].mxu1  ;;  %v388_v48 = vshra.s32 %v324_v35, 5 }
 0x1eb   :  { %vm2305_vm7 = vmand %vm1919_vm3, %vm2113_vm4  ;;  %v451_v58 = vand.u32 31, %v323_v23  ;;  %v452_v2 = vand.u32 31, %v324_v35  ;;  %v6503_v34 = vshra.s32 %v387_v15, 2  ;;  %v962_v25 = vadd.s32 %v898_v49, %v6468_v38 }
 0x1ec   :  { %vm2306_vm8 = vmand %vm1920_vm6, %vm2114_vm5  ;;  %v2369_v12 = vsel %vm2305_vm7, 1.0, %v8260_v13  ;;  %v5108_v24 = vadd.s32 4294967295, %v961_v11  ;;  %v1154_v4 = vadd.s32 %v1090_v50, %v6474_v54  ;;  %v5172_v42 = vadd.s32 4294967295, %v1153_v40 }
 0x1ed   :  { %v2370_v55 = vsel %vm2306_vm8, 1.0, %v8260_v13  ;;  %v516_v9 = vshra.s32 %v388_v48, 2  ;;  %v579_v6 = vand.u32 3, %v387_v15  ;;  %v5109_v39 = vadd.s32 4294967295, %v962_v25 }
 0x1ee   :  { %v2406_v31 = vpack.c.bf16 %v2370_v55, %v2369_v12  ;;  %v5173_v60 = vadd.s32 4294967295, %v1154_v4  ;;  %v1345_v19 = vadd.s32 %v5108_v24, %v1281_v14  ;;  %vm1537_vm9 = vcmp.ge.s32.totalorder %v5108_v24, 0 }
 0x1ef   :  { %vm1601_vm10 = vcmp.lt.s32.totalorder %v5108_v24, 8  ;;  %vm1729_vm11 = vcmp.ge.s32.totalorder %v5172_v42, 0  ;;  %vm1857_vm12 = vcmp.lt.s32.totalorder %v5172_v42, 8  ;;  %v6511_v51 = vpop.f32.mrb[8].mxu1  ;;  %v1346_v38 = vadd.s32 %v5109_v39, %v1282_v16 }
 0x1f0   :  { %5595 = vmatmul.mubr.bf16.gmra.mrb[52].mxu1 %v2406_v31  ;;  %v1409_v59 = vmul.u32 8, %v1345_v19  ;;  %vm1538_vm13 = vcmp.ge.s32.totalorder %v5109_v39, 0  ;;  %vm1602_vm14 = vcmp.lt.s32.totalorder %v5109_v39, 8  ;;  %vm1665_vm15 = vmand %vm1537_vm9, %vm1601_vm10  ;;  %v6513_v54 = vpop.f32.mrb[9].mxu1  ;;  %vm1730_vm1 = vcmp.ge.s32.totalorder %v5173_v60, 0 }
 0x1f1   :  { %vm1666_vm0 = vmand %vm1538_vm13, %vm1602_vm14  ;;  %vm1858_vm2 = vcmp.lt.s32.totalorder %v5173_v60, 8  ;;  %v580_v37 = vand.u32 3, %v388_v48  ;;  %v643_v5 = vshra.s32 %v451_v58, 4  ;;  %v6515_v32 = vpop.f32.mrb[10].mxu1  ;;  %v1410_v62 = vmul.u32 8, %v1346_v38 }
 0x1f2   :  { %v1473_v57 = vadd.s32 %v5172_v42, %v1409_v59  ;;  %vm1793_vm3 = vmand %vm1665_vm15, %vm1729_vm11  ;;  %v644_v21 = vshra.s32 %v452_v2, 4  ;;  %v707_v14 = vand.u32 15, %v451_v58  ;;  %v6518_v7 = vpop.f32.mrb[11].mxu1  ;;  %v708_v56 = vand.u32 15, %v452_v2 }
 0x1f3   :  { %vm1794_vm4 = vmand %vm1666_vm0, %vm1730_vm1  ;;  %v1283_v16 = vmul.u32 8, %v643_v5  ;;  %v325_v23 = vadd.s32 480, %v5931_v26  ;;  %v326_v17 = vadd.s32 488, %v5931_v26  ;;  %v1474_v10 = vadd.s32 %v5173_v60, %v1410_v62 }
 0x1f4   :  { %vm1921_vm5 = vmand %vm1793_vm3, %vm1857_vm12  ;;  %vm2115_vm6 = vcmp.eq.s32.totalorder %v5959_v22, %v1473_v57  ;;  %v771_v43 = vshra.s32 %v707_v14, 2  ;;  %v835_v20 = vand.u32 3, %v707_v14  ;;  %v772_v35 = vshra.s32 %v708_v56, 2 }
 0x1f5   :  { %vm1922_vm7 = vmand %vm1794_vm4, %vm1858_vm2  ;;  %v836_v15 = vand.u32 3, %v708_v56  ;;  %v1284_v49 = vmul.u32 8, %v644_v21  ;;  %v389_v11 = vshra.s32 %v325_v23, 5  ;;  %vm2116_vm8 = vcmp.eq.s32.totalorder %v5959_v22, %v1474_v10 }
 0x1f6   :  { %vm2307_vm9 = vmand %vm1921_vm5, %vm2115_vm6  ;;  %v899_v50 = vmul.u32 2, %v771_v43  ;;  %v1091_v40 = vmul.u32 2, %v835_v20  ;;  %v390_v48 = vshra.s32 %v326_v17, 5  ;;  %v453_v25 = vand.u32 31, %v325_v23 }
 0x1f7   :  { %vm2308_vm10 = vmand %vm1922_vm7, %vm2116_vm8  ;;  %v2371_v58 = vsel %vm2307_vm9, 1.0, %v8260_v13  ;;  %v900_v2 = vmul.u32 2, %v772_v35  ;;  %v1092_v12 = vmul.u32 2, %v836_v15  ;;  %v454_v31 = vand.u32 31, %v326_v17 }
 0x1f8   :  { %v6527_v24 = vpop.f32.mrb[12].mxu1  ;;  %v2372_v4 = vsel %vm2308_vm10, 1.0, %v8260_v13  ;;  %v963_v55 = vadd.s32 %v899_v50, %v6503_v34  ;;  %v1155_v42 = vadd.s32 %v1091_v40, %v579_v6  ;;  %v517_v59 = vshra.s32 %v389_v11, 2 }
 0x1f9   :  { %v6531_v39 = vpop.f32.mrb[13].mxu1  ;;  %v2407_v60 = vpack.c.bf16 %v2372_v4, %v2371_v58  ;;  %v964_v19 = vadd.s32 %v900_v2, %v516_v9  ;;  %v1156_v38 = vadd.s32 %v1092_v12, %v580_v37  ;;  %v518_v21 = vshra.s32 %v390_v48, 2 }
 0x1fa   :  { %v6533_v5 = vpop.f32.mrb[14].mxu1  ;;  %v5110_v62 = vadd.s32 4294967295, %v963_v55  ;;  %v5174_v57 = vadd.s32 4294967295, %v1155_v42  ;;  %v581_v14 = vand.u32 3, %v389_v11  ;;  %v582_v34 = vand.u32 3, %v390_v48 }
 0x1fb   :  { %v6535_v56 = vpop.f32.mrb[15].mxu1  ;;  %5598 = vmatprep.mubr.bf16.mxu1 %v2407_v60  ;;  %v5111_v23 = vadd.s32 4294967295, %v964_v19  ;;  %v5175_v10 = vadd.s32 4294967295, %v1156_v38  ;;  %v6537_v6 = vshra.s32 %v453_v25, 4  ;;  %v646_v43 = vshra.s32 %v454_v31, 4 }
 0x1fc   :  { %v1347_v17 = vadd.s32 %v5110_v62, %v1283_v16  ;;  %vm1539_vm11 = vcmp.ge.s32.totalorder %v5110_v62, 0  ;;  %vm1603_vm12 = vcmp.lt.s32.totalorder %v5110_v62, 8  ;;  %vm1731_vm13 = vcmp.ge.s32.totalorder %v5174_v57, 0 }
 0x1fd   :  { %v1348_v9 = vadd.s32 %v5111_v23, %v1284_v49  ;;  %vm1540_vm14 = vcmp.ge.s32.totalorder %v5111_v23, 0  ;;  %vm1604_vm15 = vcmp.lt.s32.totalorder %v5111_v23, 8  ;;  %vm1667_vm0 = vmand %vm1539_vm11, %vm1603_vm12  ;;  %vm1732_vm1 = vcmp.ge.s32.totalorder %v5175_v10, 0 }
 0x1fe   :  { %v1411_v37 = vmul.u32 8, %v1347_v17  ;;  %vm1668_vm2 = vmand %vm1540_vm14, %vm1604_vm15  ;;  %vm1859_vm3 = vcmp.lt.s32.totalorder %v5174_v57, 8  ;;  %vm1860_vm4 = vcmp.lt.s32.totalorder %v5175_v10, 8  ;;  %v709_v35 = vand.u32 15, %v453_v25 }
 0x1ff   :  { %v1412_v20 = vmul.u32 8, %v1348_v9  ;;  %vm1795_vm5 = vmand %vm1667_vm0, %vm1731_vm13  ;;  %v710_v15 = vand.u32 15, %v454_v31  ;;  %v1285_v11 = vmul.u32 8, %v6537_v6  ;;  %v327_v40 = vadd.s32 496, %v5931_v26 }
 0x200   :  { %v6540_v16 = vpop.f32.mrb[16].mxu1  ;;  %v1475_v50 = vadd.s32 %v5174_v57, %v1411_v37  ;;  %vm1796_vm6 = vmand %vm1668_vm2, %vm1732_vm1  ;;  %v1286_v49 = vmul.u32 8, %v646_v43  ;;  %v328_v48 = vadd.s32 504, %v5931_v26  ;;  %v773_v12 = vshra.s32 %v709_v35, 2 }
 0x201   :  { %v6544_v58 = vpop.f32.mrb[17].mxu1  ;;  %v1476_v2 = vadd.s32 %v5175_v10, %v1412_v20  ;;  %vm1923_vm7 = vmand %vm1795_vm5, %vm1859_vm3  ;;  %v774_v4 = vshra.s32 %v710_v15, 2  ;;  %v837_v25 = vand.u32 3, %v709_v35  ;;  %v838_v42 = vand.u32 3, %v710_v15 }
 0x202   :  { %v6547_v55 = vpop.f32.mrb[18].mxu1  ;;  %vm1924_vm8 = vmand %vm1796_vm6, %vm1860_vm4  ;;  %vm2117_vm9 = vcmp.eq.s32.totalorder %v5959_v22, %v1475_v50  ;;  %v391_v31 = vshra.s32 %v327_v40, 5  ;;  %v392_v60 = vshra.s32 %v328_v48, 5  ;;  %v901_v38 = vmul.u32 2, %v773_v12 }
 0x203   :  { %v6551_v19 = vpop.f32.mrb[19].mxu1  ;;  %vm2118_vm10 = vcmp.eq.s32.totalorder %v5959_v22, %v1476_v2  ;;  %vm2309_vm11 = vmand %vm1923_vm7, %vm2117_vm9  ;;  %v902_v62 = vmul.u32 2, %v774_v4  ;;  %v455_v57 = vand.u32 31, %v327_v40  ;;  %v1093_v6 = vmul.u32 2, %v837_v25 }
 0x204   :  { %vm2310_vm12 = vmand %vm1924_vm8, %vm2118_vm10  ;;  %v2373_v23 = vsel %vm2309_vm11, 1.0, %v8260_v13  ;;  %v1094_v17 = vmul.u32 2, %v838_v42  ;;  %v456_v10 = vand.u32 31, %v328_v48  ;;  %v965_v37 = vadd.s32 %v901_v38, %v517_v59 }
 0x205   :  { %v2374_v9 = vsel %vm2310_vm12, 1.0, %v8260_v13  ;;  %v966_v43 = vadd.s32 %v902_v62, %v518_v21  ;;  %v6556_v20 = vshra.s32 %v391_v31, 2  ;;  %v1157_v15 = vadd.s32 %v1093_v6, %v581_v14 }
 0x206   :  { %v2408_v35 = vpack.c.bf16 %v2374_v9, %v2373_v23  ;;  %v1158_v50 = vadd.s32 %v1094_v17, %v582_v34  ;;  %v6558_v2 = vshra.s32 %v392_v60, 2  ;;  %v5112_v12 = vadd.s32 4294967295, %v965_v37 }
 0x207   :  { %v5113_v4 = vadd.s32 4294967295, %v966_v43  ;;  %v6560_v40 = vand.u32 3, %v391_v31  ;;  %v6562_v52 = vand.u32 3, %v392_v60  ;;  %v5176_v48 = vadd.s32 4294967295, %v1157_v15 }
 0x208   :  { %v6564_v25 = vpop.f32.mrb[20].mxu1  ;;  %5599 = vmatmul.mubr.bf16.gmra.mrb[56].mxu1 %v2408_v35  ;;  %v5177_v42 = vadd.s32 4294967295, %v1158_v50  ;;  %v6566_v59 = vshra.s32 %v455_v57, 4  ;;  %v6568_v21 = vshra.s32 %v456_v10, 4  ;;  %v1349_v14 = vadd.s32 %v5112_v12, %v1285_v11 }
 0x209   :  { %v6570_v38 = vpop.f32.mrb[21].mxu1  ;;  %v1350_v34 = vadd.s32 %v5113_v4, %v1286_v49  ;;  %vm1541_vm13 = vcmp.ge.s32.totalorder %v5112_v12, 0  ;;  %vm1542_vm14 = vcmp.ge.s32.totalorder %v5113_v4, 0  ;;  %vm1605_vm15 = vcmp.lt.s32.totalorder %v5112_v12, 8 }
 0x20a   :  { %v6572_v62 = vpop.f32.mrb[22].mxu1  ;;  %vm1606_vm0 = vcmp.lt.s32.totalorder %v5113_v4, 8  ;;  %vm1733_vm1 = vcmp.ge.s32.totalorder %v5176_v48, 0  ;;  %vm1734_vm2 = vcmp.ge.s32.totalorder %v5177_v42, 0  ;;  %v1413_v60 = vmul.u32 8, %v1349_v14  ;;  %vm1669_vm3 = vmand %vm1541_vm13, %vm1605_vm15 }
 0x20b   :  { %v6574_v31 = vpop.f32.mrb[23].mxu1  ;;  %v1414_v23 = vmul.u32 8, %v1350_v34  ;;  %vm1861_vm4 = vcmp.lt.s32.totalorder %v5176_v48, 8  ;;  %vm1862_vm5 = vcmp.lt.s32.totalorder %v5177_v42, 8  ;;  %vm1670_vm6 = vmand %vm1542_vm14, %vm1606_vm0  ;;  %v711_v6 = vand.u32 15, %v455_v57 }
 0x20c   :  { %v712_v17 = vand.u32 15, %v456_v10  ;;  %v1287_v11 = vmul.u32 8, %v6566_v59  ;;  %v1288_v49 = vmul.u32 8, %v6568_v21  ;;  %v1477_v9 = vadd.s32 %v5176_v48, %v1413_v60  ;;  %vm1797_vm7 = vmand %vm1669_vm3, %vm1733_vm1 }
 0x20d   :  { %v1478_v37 = vadd.s32 %v5177_v42, %v1414_v23  ;;  %v2709_v43 = vpack.c.bf16 %v6480_v30, %v6471_v18  ;;  %vm8209_vm8 = vcmask 64512   ;;  %vm1798_vm9 = vmand %vm1670_vm6, %vm1734_vm2  ;;  %v775_v35 = vshra.s32 %v711_v6, 2 }
 0x20e   :  { %v776_v15 = vshra.s32 %v712_v17, 2  ;;  %v839_v50 = vand.u32 3, %v711_v6  ;;  %v840_v12 = vand.u32 3, %v712_v17  ;;  %vm1925_vm10 = vmand %vm1797_vm7, %vm1861_vm4  ;;  %vm2119_vm11 = vcmp.eq.s32.totalorder %v5959_v22, %v1477_v9 }
 0x20f   :  { %vm2120_vm12 = vcmp.eq.s32.totalorder %v5959_v22, %v1478_v37  ;;  %2742 = vst.msk [vmem:[#allocation2 + $0x20] sm:$0xff] %vm8209_vm8, %v2709_v43  ;;  %v2708_v57 = vpack.c.bf16 %v6484_v53, %v6476_v44  ;;  %v2711_v18 = vpack.c.bf16 %v6498_v45, %v6489_v46  ;;  %vm6593_vm13 = vmand %vm1798_vm9, %vm1862_vm5  ;;  %v903_v4 = vmul.u32 2, %v775_v35 }
 0x210   :  { %v6590_v30 = vpop.f32.mrb[24].mxu1  ;;  %v904_v48 = vmul.u32 2, %v776_v15  ;;  %v2710_v59 = vpack.c.bf16 %v6501_v8, %v6492_v3  ;;  %v2713_v21 = vpack.c.bf16 %v6515_v32, %v6511_v51  ;;  %vm2311_vm14 = vmand %vm1925_vm10, %vm2119_vm11  ;;  %v1095_v44 = vmul.u32 2, %v839_v50 }
 0x211   :  { %v6601_v14 = vpop.f32.mrb[25].mxu1  ;;  %v1096_v53 = vmul.u32 2, %v840_v12  ;;  %2741 = vst.msk [vmem:[#allocation2] sm:$0xff] %vm8209_vm8, %v2708_v57  ;;  %2747 = vrot.lane.b32.xlu0 %v2711_v18, %s5790_s21  ;;  %v2712_v46 = vpack.c.bf16 %v6518_v7, %v6513_v54  ;;  %v2715_v45 = vpack.c.bf16 %v6533_v5, %v6527_v24  ;;  %vm2312_vm15 = vmand %vm6593_vm13, %vm2120_vm12  ;;  %v2375_v3 = vsel %vm2311_vm14, 1.0, %v8260_v13 }
 0x212   :  { %v6608_v42 = vpop.f32.mrb[26].mxu1  ;;  %v967_v8 = vadd.s32 %v903_v4, %v6556_v20  ;;  %v968_v51 = vadd.s32 %v904_v48, %v6558_v2  ;;  %2758 = vrot.lane.b32.xlu1 %v2713_v21, %s5791_s22  ;;  %v2714_v54 = vpack.c.bf16 %v6535_v56, %v6531_v39  ;;  %v2376_v7 = vsel %vm2312_vm15, 1.0, %v8260_v13 }
 0x213   :  { %v2552_v32 = vpop.f32.mrb[27].mxu1  ;;  %v1159_v24 = vadd.s32 %v1095_v44, %v6560_v40  ;;  %v1160_v5 = vadd.s32 %v1096_v53, %v6562_v52  ;;  %v2717_v34 = vpack.c.bf16 %v6547_v55, %v6540_v16  ;;  %v2409_v60 = vpack.c.bf16 %v2376_v7, %v2375_v3 }
 0x214   :  { %v5114_v20 = vadd.s32 4294967295, %v967_v8  ;;  %v5115_v23 = vadd.s32 4294967295, %v968_v51  ;;  %v2716_v2 = vpack.c.bf16 %v6551_v19, %v6544_v58  ;;  %v2719_v39 = vpack.c.bf16 %v6572_v62, %v6564_v25 }
 0x215   :  { %v5178_v6 = vadd.s32 4294967295, %v1159_v24  ;;  %v5179_v17 = vadd.s32 4294967295, %v1160_v5  ;;  %2745 = vrot.lane.b32.xlu0 %v2710_v59, %s5790_s21  ;;  %v2718_v56 = vpack.c.bf16 %v6574_v31, %v6570_v38  ;;  %5602 = vmatprep.mubr.bf16.mxu1 %v2409_v60  ;;  %v2721_v55 = vpack.c.bf16 %v6608_v42, %v6590_v30  ;;  %s5803_s21 = smov 112  }
 0x216   :  { %v1351_v52 = vadd.s32 %v5114_v20, %v1287_v11  ;;  %v1352_v40 = vadd.s32 %v5115_v23, %v1288_v49  ;;  %vm1543_vm0 = vcmp.ge.s32.totalorder %v5114_v20, 0  ;;  %vm1544_vm1 = vcmp.ge.s32.totalorder %v5115_v23, 0  ;;  %2756 = vrot.lane.b32.xlu1 %v2712_v46, %s5791_s22 }
 0x217   :  { %vm1607_vm2 = vcmp.lt.s32.totalorder %v5114_v20, 8  ;;  %vm1608_vm3 = vcmp.lt.s32.totalorder %v5115_v23, 8  ;;  %vm1735_vm4 = vcmp.ge.s32.totalorder %v5178_v6, 0  ;;  %vm1736_vm6 = vcmp.ge.s32.totalorder %v5179_v17, 0 }
 0x218   :  { %v1415_v16 = vmul.u32 8, %v1351_v52  ;;  %v1416_v58 = vmul.u32 8, %v1352_v40  ;;  %vm1671_vm5 = vmand %vm1543_vm0, %vm1607_vm2  ;;  %vm1863_vm9 = vcmp.lt.s32.totalorder %v5178_v6, 8  ;;  %v2720_v19 = vpack.c.bf16 %v2552_v32, %v6601_v14 }
 0x219   :  { %vm1672_vm7 = vmand %vm1544_vm1, %vm1608_vm3  ;;  %2767 = vrot.lane.b32.xlu0 %v2714_v54, %s5792_s23  ;;  %vm1864_vm11 = vcmp.lt.s32.totalorder %v5179_v17, 8  ;;  %vm2751_vm3 = vcmask 130112  }
 0x21a   :  { %v1479_v25 = vadd.s32 %v5178_v6, %v1415_v16  ;;  %v1480_v38 = vadd.s32 %v5179_v17, %v1416_v58  ;;  %vm1799_vm10 = vmand %vm1671_vm5, %vm1735_vm4  ;;  %2769 = vrot.lane.b32.xlu1 %v2715_v45, %s5792_s23  ;;  %vm2762_vm4 = vcmask 195712   ;;  %vm2773_vm5 = vcmask 261312  }
 0x21b   :  { %vm1800_vm12 = vmand %vm1672_vm7, %vm1736_vm6  ;;  %vm2784_vm6 = vcmask 326912   ;;  %vm2795_vm7 = vcmask 392512  }
 0x21c   :  { %vm1927_vm13 = vmand %vm1799_vm10, %vm1863_vm9  ;;  %vm2121_vm14 = vcmp.eq.s32.totalorder %v5959_v22, %v1479_v25  ;;  %vm2122_vm15 = vcmp.eq.s32.totalorder %v5959_v22, %v1480_v38  ;;  %vm2806_vm9 = vcmask 458112   ;;  %vm2817_vm10 = vcmask 523712   ;;  %v5728_v25 = vld [vmem:[%s8194_s2 + $0x8] sm:$0xff]  }
 0x21d   :  { %vm1928_vm0 = vmand %vm1800_vm12, %vm1864_vm11  ;;  %2778 = vrot.lane.b32.xlu0 %v2716_v2, %s5793_s24  ;;  %vm2828_vm11 = vcmask 589312   ;;  %vm2839_vm12 = vcmask 654912  }
 0x21e   :  { %vm2313_vm1 = vmand %vm1927_vm13, %vm2121_vm14  ;;  %2780 = vrot.lane.b32.xlu1 %v2717_v34, %s5793_s24  ;;  %vm2850_vm13 = vcmask 720512   ;;  %vm2861_vm14 = vcmask 786112  }
 0x21f   :  { %vm2314_vm2 = vmand %vm1928_vm0, %vm2122_vm15  ;;  %v2377_v62 = vsel %vm2313_vm1, 1.0, %v8260_v13  ;;  %vm2872_vm15 = vcmask 851712   ;;  %vm2883_vm0 = vcmask 917312   ;;  %vm2894_vm1 = vcmask 982912  }
 0x220   :  { %v2378_v31 = vsel %vm2314_vm2, 1.0, %v8260_v13  ;;  %vm2905_vm2 = vcmask 1048512  }
 0x221   :  { %v2410_v11 = vpack.c.bf16 %v2378_v31, %v2377_v62  ;;  %2789 = vrot.lane.b32.xlu0 %v2718_v56, %s5794_s25 }
 0x222   :  { %2791 = vrot.lane.b32.xlu1 %v2719_v39, %s5794_s25 }
 0x223   :  { %5603 = vmatmul.mubr.bf16.gmra.mrb[60].mxu1 %v2410_v11 }
 0x225   :  { %2800 = vrot.lane.b32.xlu0 %v2720_v19, %s5795_s26  ;;  %v5727_v19 = vld [vmem:[%s8194_s2] sm:$0xff]  }
 0x226   :  { %2802 = vrot.lane.b32.xlu1 %v2721_v55, %s5795_s26  ;;  %5606 = vmatprep.subr.bf16.mxu0 %v5727_v19 }
 0x227   :  { %5607 = vmatpush3.bf16.msra.mxu0 %v5727_v19  ;;  %v6676_v19 = vand.u32 7, %v5931_v26 }
 0x228   :  { %5608 = vmatprep.subr.bf16.mxu0 %v5728_v25 }
 0x22a   :  { %v5572_v49 = vpop.f32.mrb[28].mxu1 }
 0x22b   :  { %v2565_v9 = vpop.f32.mrb[29].mxu1  ;;  %5609 = vmatpush3.bf16.msra.mxu0 %v5728_v25  ;;  %v6679_v25 = vand.u32 7, %v5934_v27 }
 0x22c   :  { %v5573_v37 = vpop.f32.mrb[30].mxu1 }
 0x22d   :  { %v2723_v43 = vpack.c.bf16 %v5573_v37, %v5572_v49  ;;  %v2568_v35 = vpop.f32.mrb[31].mxu1 }
 0x22e   :  { %v2722_v15 = vpack.c.bf16 %v2568_v35, %v2565_v9  ;;  %v5729_v35 = vld [vmem:[%s8194_s2 + $0x10] sm:$0xff]  }
 0x22f   :  { %2813 = vrot.lane.b32.xlu1 %v2723_v43, %s5796_s27  ;;  %5610 = vmatprep.subr.bf16.mxu0 %v5729_v35 }
 0x230   :  { %2811 = vrot.lane.b32.xlu0 %v2722_v15, %s5796_s27  ;;  %v5730_v15 = vld [vmem:[%s8194_s2 + $0x18] sm:$0xff]   ;;  %5611 = vmatpush3.bf16.msra.mxu0 %v5729_v35 }
 0x231   :  { %5612 = vmatprep.subr.bf16.mxu0 %v5730_v15 }
 0x234   :  { %5613 = vmatpush3.bf16.msra.mxu0 %v5730_v15 }
 0x242   :  { %v5576_v50 = vpop.f32.mrb[32].mxu1 }
 0x243   :  { %v2581_v12 = vpop.f32.mrb[33].mxu1 }
 0x244   :  { %v5577_v57 = vpop.f32.mrb[34].mxu1 }
 0x245   :  { %v2725_v18 = vpack.c.bf16 %v5577_v57, %v5576_v50  ;;  %v2584_v30 = vpop.f32.mrb[35].mxu1 }
 0x246   :  { %v2724_v10 = vpack.c.bf16 %v2584_v30, %v2581_v12 }
 0x247   :  { %2824 = vrot.lane.b32.xlu1 %v2725_v18, %s5797_s28 }
 0x248   :  { %2822 = vrot.lane.b32.xlu0 %v2724_v10, %s5797_s28 }
 0x25d   :  { %v5580_v4 = vpop.f32.mrb[36].mxu1 }
 0x25e   :  { %v2597_v48 = vpop.f32.mrb[37].mxu1 }
 0x25f   :  { %v5581_v59 = vpop.f32.mrb[38].mxu1 }
 0x260   :  { %v2727_v21 = vpack.c.bf16 %v5581_v59, %v5580_v4  ;;  %v2600_v14 = vpop.f32.mrb[39].mxu1  ;;  %v5732_v59 = vld [vmem:[%s8194_s2 + $0x28] sm:$0xff]  }
 0x261   :  { %v2726_v44 = vpack.c.bf16 %v2600_v14, %v2597_v48  ;;  %v5731_v48 = vld [vmem:[%s8194_s2 + $0x20] sm:$0xff]  }
 0x262   :  { %2835 = vrot.lane.b32.xlu1 %v2727_v21, %s5798_s29  ;;  %5614 = vmatprep.subr.bf16.mxu0 %v5731_v48 }
 0x263   :  { %2833 = vrot.lane.b32.xlu0 %v2726_v44, %s5798_s29  ;;  %5615 = vmatpush3.bf16.msra.mxu0 %v5731_v48 }
 0x264   :  { %5616 = vmatprep.subr.bf16.mxu0 %v5732_v59 }
 0x267   :  { %5617 = vmatpush3.bf16.msra.mxu0 %v5732_v59 }
 0x275   :  { %v5584_v53 = vpop.f32.mrb[40].mxu1 }
 0x276   :  { %v2613_v46 = vpop.f32.mrb[41].mxu1 }
 0x277   :  { %v5585_v45 = vpop.f32.mrb[42].mxu1 }
 0x278   :  { %v2729_v42 = vpack.c.bf16 %v5585_v45, %v5584_v53  ;;  %v2616_v3 = vpop.f32.mrb[43].mxu1 }
 0x279   :  { %v2728_v8 = vpack.c.bf16 %v2616_v3, %v2613_v46 }
 0x27a   :  { %2846 = vrot.lane.b32.xlu1 %v2729_v42, %s5799_s30 }
 0x27b   :  { %2844 = vrot.lane.b32.xlu0 %v2728_v8, %s5799_s30 }
 0x283   :  { %v2748_v51 = vpop.permute.xlu0 %2747 }
 0x284   :  { %2753 = vst.msk [vmem:[#allocation2 + $0x20] sm:$0xff] %vm2751_vm3, %v2748_v51  ;;  %v2759_v54 = vpop.permute.xlu1 %2758  ;;  %v5733_v51 = vld [vmem:[%s8194_s2 + $0x30] sm:$0xff]  }
 0x285   :  { %2764 = vst.msk [vmem:[#allocation2 + $0x20] sm:$0xff] %vm2762_vm4, %v2759_v54  ;;  %5618 = vmatprep.subr.bf16.mxu0 %v5733_v51  ;;  %v5734_v54 = vld [vmem:[%s8194_s2 + $0x38] sm:$0xff]  }
 0x286   :  { %5619 = vmatpush3.bf16.msra.mxu0 %v5733_v51 }
 0x287   :  { %v2746_v32 = vpop.permute.xlu0 %2745  ;;  %5620 = vmatprep.subr.bf16.mxu0 %v5734_v54 }
 0x288   :  { %2752 = vst.msk [vmem:[#allocation2] sm:$0xff] %vm2751_vm3, %v2746_v32  ;;  %v2757_v7 = vpop.permute.xlu1 %2756 }
 0x289   :  { %2763 = vst.msk [vmem:[#allocation2] sm:$0xff] %vm2762_vm4, %v2757_v7 }
 0x28a   :  { %5621 = vmatpush3.bf16.msra.mxu0 %v5734_v54 }
 0x28b   :  { %v2768_v24 = vpop.permute.xlu0 %2767 }
 0x28c   :  { %v2770_v5 = vpop.permute.xlu1 %2769  ;;  %2774 = vst.msk [vmem:[#allocation2] sm:$0xff] %vm2773_vm5, %v2768_v24 }
 0x28d   :  { %2775 = vst.msk [vmem:[#allocation2 + $0x20] sm:$0xff] %vm2773_vm5, %v2770_v5 }
 0x28f   :  { %v2779_v34 = vpop.permute.xlu0 %2778 }
 0x290   :  { %v5588_v60 = vpop.f32.mrb[44].mxu1  ;;  %v2781_v20 = vpop.permute.xlu1 %2780  ;;  %2785 = vst.msk [vmem:[#allocation2] sm:$0xff] %vm2784_vm6, %v2779_v34 }
 0x291   :  { %v2629_v23 = vpop.f32.mrb[45].mxu1  ;;  %2786 = vst.msk [vmem:[#allocation2 + $0x20] sm:$0xff] %vm2784_vm6, %v2781_v20 }
 0x292   :  { %v5589_v2 = vpop.f32.mrb[46].mxu1 }
 0x293   :  { %v2731_v6 = vpack.c.bf16 %v5589_v2, %v5588_v60  ;;  %v2632_v17 = vpop.f32.mrb[47].mxu1  ;;  %v2790_v39 = vpop.permute.xlu0 %2789 }
 0x294   :  { %v2730_v56 = vpack.c.bf16 %v2632_v17, %v2629_v23  ;;  %v2792_v52 = vpop.permute.xlu1 %2791  ;;  %2796 = vst.msk [vmem:[#allocation2] sm:$0xff] %vm2795_vm7, %v2790_v39 }
 0x295   :  { %2857 = vrot.lane.b32.xlu1 %v2731_v6, %s5800_s8  ;;  %2797 = vst.msk [vmem:[#allocation2 + $0x20] sm:$0xff] %vm2795_vm7, %v2792_v52 }
 0x296   :  { %2855 = vrot.lane.b32.xlu0 %v2730_v56, %s5800_s8  ;;  %s5804_s8 = smov 120  }
 0x297   :  { %v2801_v40 = vpop.permute.xlu0 %2800 }
 0x298   :  { %v2803_v16 = vpop.permute.xlu1 %2802  ;;  %2807 = vst.msk [vmem:[#allocation2] sm:$0xff] %vm2806_vm9, %v2801_v40 }
 0x299   :  { %2808 = vst.msk [vmem:[#allocation2 + $0x20] sm:$0xff] %vm2806_vm9, %v2803_v16 }
 0x2a1   :  { %v2814_v58 = vpop.permute.xlu1 %2813 }
 0x2a2   :  { %2819 = vst.msk [vmem:[#allocation2 + $0x20] sm:$0xff] %vm2817_vm10, %v2814_v58  ;;  %v2812_v55 = vpop.permute.xlu0 %2811 }
 0x2a3   :  { %2818 = vst.msk [vmem:[#allocation2] sm:$0xff] %vm2817_vm10, %v2812_v55 }
 0x2a8   :  { %v5592_v38 = vpop.f32.mrb[48].mxu1 }
 0x2a9   :  { %v2645_v62 = vpop.f32.mrb[49].mxu1 }
 0x2aa   :  { %v5593_v31 = vpop.f32.mrb[50].mxu1 }
 0x2ab   :  { %v2733_v11 = vpack.c.bf16 %v5593_v31, %v5592_v38  ;;  %v2648_v49 = vpop.f32.mrb[51].mxu1  ;;  %v3171_v38 = vand.u32 3, %v6676_v19  ;;  %v3091_v31 = vshra.s32 %v5931_v26, 3 }
 0x2ac   :  { %v2732_v9 = vpack.c.bf16 %v2648_v49, %v2645_v62  ;;  %v3172_v62 = vand.u32 3, %v6679_v25 }
 0x2ad   :  { %2868 = vrot.lane.b32.xlu1 %v2733_v11, %s5801_s13  ;;  %v3092_v11 = vshra.s32 %v5934_v27, 3  ;;  %v3187_v49 = vshra.s32 %v3171_v38, 1 }
 0x2ae   :  { %2866 = vrot.lane.b32.xlu0 %v2732_v9, %s5801_s13  ;;  %v3188_v9 = vshra.s32 %v3172_v62, 1 }
 0x2af   :  { %v3219_v35 = vmul.u32 2, %v3187_v49  ;;  %v6695_v27 = vand.u32 3, %v3092_v11 }
 0x2b0   :  { %v3220_v15 = vmul.u32 2, %v3188_v9 }
 0x2b9   :  { %v2825_v37 = vpop.permute.xlu1 %2824 }
 0x2ba   :  { %2830 = vst.msk [vmem:[#allocation2 + $0x20] sm:$0xff] %vm2828_vm11, %v2825_v37  ;;  %v2823_v43 = vpop.permute.xlu0 %2822  ;;  %v6685_v37 = vshra.s32 %v3091_v31, 2 }
 0x2bb   :  { %2829 = vst.msk [vmem:[#allocation2] sm:$0xff] %vm2828_vm11, %v2823_v43  ;;  %v6687_v43 = vshra.s32 %v3092_v11, 2 }
 0x2bd   :  { %v3236_v26 = vadd.s32 %v3220_v15, %v6687_v43 }
 0x2c3   :  { %v5596_v50 = vpop.f32.mrb[52].mxu1 }
 0x2c4   :  { %v2661_v12 = vpop.f32.mrb[53].mxu1 }
 0x2c5   :  { %v5597_v57 = vpop.f32.mrb[54].mxu1 }
 0x2c6   :  { %v2735_v18 = vpack.c.bf16 %v5597_v57, %v5596_v50  ;;  %v2664_v30 = vpop.f32.mrb[55].mxu1  ;;  %v3155_v50 = vshra.s32 %v6676_v19, 2  ;;  %v3203_v57 = vand.u32 1, %v3171_v38 }
 0x2c7   :  { %v2734_v10 = vpack.c.bf16 %v2664_v30, %v2661_v12  ;;  %v3156_v12 = vshra.s32 %v6679_v25, 2  ;;  %v3235_v30 = vadd.s32 %v3219_v35, %v6685_v37 }
 0x2c8   :  { %2879 = vrot.lane.b32.xlu1 %v2735_v18, %s5802_s18  ;;  %v3204_v18 = vand.u32 1, %v3172_v62  ;;  %v6719_v62 = vand.u32 7, %v5962_v33 }
 0x2c9   :  { %2877 = vrot.lane.b32.xlu0 %v2734_v10, %s5802_s18  ;;  %v6693_v10 = vand.u32 3, %v3091_v31  ;;  %v5190_v59 = vadd.s32 4294967295, %v3235_v30 }
 0x2ca   :  { %v3268_v48 = vmul.u32 2, %v3204_v18  ;;  %8272 = vst [vmem:[#allocation9_spill] sm:$0xff] %v6719_v62 }
 0x2cb   :  { %vm3379_vm3 = vcmp.ge.s32.totalorder %v5190_v59, 0  ;;  %vm3395_vm5 = vcmp.lt.s32.totalorder %v5190_v59, 4 }
 0x2cc   :  { %vm3411_vm9 = vmand %vm3379_vm3, %vm3395_vm5 }
 0x2d4   :  { %v2836_v4 = vpop.permute.xlu1 %2835 }
 0x2d5   :  { %2841 = vst.msk [vmem:[#allocation2 + $0x20] sm:$0xff] %vm2839_vm12, %v2836_v4  ;;  %v2834_v21 = vpop.permute.xlu0 %2833  ;;  %v3267_v4 = vmul.u32 2, %v3203_v57 }
 0x2d6   :  { %2840 = vst.msk [vmem:[#allocation2] sm:$0xff] %vm2839_vm12, %v2834_v21  ;;  %v5191_v21 = vadd.s32 4294967295, %v3236_v26 }
 0x2d8   :  { %vm3380_vm4 = vcmp.ge.s32.totalorder %v5191_v21, 0  ;;  %vm3396_vm6 = vcmp.lt.s32.totalorder %v5191_v21, 4 }
 0x2d9   :  { %vm3412_vm11 = vmand %vm3380_vm4, %vm3396_vm6  ;;  %vm8236_vm4 = vcmask 261120  }
 0x2db   :  { %v5600_v14 = vpop.f32.mrb[56].mxu1 }
 0x2dc   :  { %v2677_v44 = vpop.f32.mrb[57].mxu1 }
 0x2dd   :  { %v5601_v53 = vpop.f32.mrb[58].mxu1 }
 0x2de   :  { %v2737_v46 = vpack.c.bf16 %v5601_v53, %v5600_v14  ;;  %v2680_v45 = vpop.f32.mrb[59].mxu1  ;;  %v3315_v14 = vmul.u32 4, %v3155_v50  ;;  %v3283_v53 = vadd.s32 %v3267_v4, %v6693_v10 }
 0x2df   :  { %v2736_v42 = vpack.c.bf16 %v2680_v45, %v2677_v44  ;;  %v3316_v44 = vmul.u32 4, %v3156_v12  ;;  %v3175_v12 = vand.u32 3, %v6719_v62 }
 0x2e0   :  { %2890 = vrot.lane.b32.xlu1 %v2737_v46, %s5803_s21  ;;  %v3284_v46 = vadd.s32 %v3268_v48, %v6695_v27  ;;  %v3331_v45 = vadd.s32 %v5190_v59, %v3315_v14 }
 0x2e1   :  { %2888 = vrot.lane.b32.xlu0 %v2736_v42, %s5803_s21  ;;  %v3332_v42 = vadd.s32 %v5191_v21, %v3316_v44  ;;  %v3095_v21 = vshra.s32 %v5962_v33, 3  ;;  %v3191_v14 = vshra.s32 %v3175_v12, 1  ;;  %v3159_v33 = vshra.s32 %v6719_v62, 2 }
 0x2e2   :  { %v3347_v51 = vmul.u32 4, %v3331_v45 }
 0x2e3   :  { %v3348_v54 = vmul.u32 4, %v3332_v42 }
 0x2ec   :  { %v2847_v3 = vpop.permute.xlu1 %2846 }
 0x2ed   :  { %2852 = vst.msk [vmem:[#allocation2 + $0x20] sm:$0xff] %vm2850_vm13, %v2847_v3  ;;  %v2845_v8 = vpop.permute.xlu0 %2844  ;;  %v5206_v3 = vadd.s32 4294967295, %v3283_v53  ;;  %v3096_v53 = vshra.s32 %v5970_v41, 3 }
 0x2ee   :  { %2851 = vst.msk [vmem:[#allocation2] sm:$0xff] %vm2850_vm13, %v2845_v8  ;;  %v5207_v8 = vadd.s32 4294967295, %v3284_v46 }
 0x2ef   :  { %vm3427_vm7 = vcmp.ge.s32.totalorder %v5206_v3, 0  ;;  %vm3459_vm12 = vcmp.lt.s32.totalorder %v5206_v3, 4 }
 0x2f0   :  { %vm3428_vm10 = vcmp.ge.s32.totalorder %v5207_v8, 0  ;;  %vm3443_vm13 = vmand %vm3411_vm9, %vm3427_vm7 }
 0x2f6   :  { %v5604_v32 = vpop.f32.mrb[60].mxu1 }
 0x2f7   :  { %v2693_v7 = vpop.f32.mrb[61].mxu1 }
 0x2f8   :  { %v5605_v24 = vpop.f32.mrb[62].mxu1 }
 0x2f9   :  { %v2739_v5 = vpack.c.bf16 %v5605_v24, %v5604_v32  ;;  %v2696_v34 = vpop.f32.mrb[63].mxu1  ;;  %v3363_v32 = vadd.s32 %v5206_v3, %v3347_v51  ;;  %v3223_v51 = vmul.u32 2, %v3191_v14 }
 0x2fa   :  { %v2738_v60 = vpack.c.bf16 %v2696_v34, %v2693_v7  ;;  %v3364_v7 = vadd.s32 %v5207_v8, %v3348_v54 }
 0x2fb   :  { %2901 = vrot.lane.b32.xlu1 %v2739_v5, %s5804_s8 }
 0x2fc   :  { %2899 = vrot.lane.b32.xlu0 %v2738_v60, %s5804_s8  ;;  %v6705_v60 = vand.u32 7, %v5937_v28 }
 0x2fe   :  { %8270 = vst [vmem:[#allocation7_spill] sm:$0xff] %v6705_v60  ;;  %v3157_v31 = vshra.s32 %v6705_v60, 2 }
 0x300   :  { %v3317_v18 = vmul.u32 4, %v3157_v31 }
 0x307   :  { %v2858_v20 = vpop.permute.xlu1 %2857 }
 0x308   :  { %2863 = vst.msk [vmem:[#allocation2 + $0x20] sm:$0xff] %vm2861_vm14, %v2858_v20  ;;  %v2856_v23 = vpop.permute.xlu0 %2855  ;;  %v6708_v20 = vand.u32 7, %v5940_v29 }
 0x309   :  { %2862 = vst.msk [vmem:[#allocation2] sm:$0xff] %vm2861_vm14, %v2856_v23  ;;  %vm3460_vm14 = vcmp.lt.s32.totalorder %v5207_v8, 4  ;;  %v3173_v23 = vand.u32 3, %v6705_v60  ;;  %v6738_v8 = vshra.s32 %v3095_v21, 2 }
 0x30a   :  { %8271 = vst [vmem:[#allocation8_spill] sm:$0xff] %v6708_v20 }
 0x30b   :  { %8276 = vst [vmem:[#allocation13_spill] sm:$0xff] %v6738_v8 }
 0x31f   :  { %v2869_v2 = vpop.permute.xlu1 %2868 }
 0x320   :  { %2874 = vst.msk [vmem:[#allocation2 + $0x20] sm:$0xff] %vm2872_vm15, %v2869_v2  ;;  %v2867_v6 = vpop.permute.xlu0 %2866  ;;  %v3174_v2 = vand.u32 3, %v6708_v20 }
 0x321   :  { %2873 = vst.msk [vmem:[#allocation2] sm:$0xff] %vm2872_vm15, %v2867_v6  ;;  %vm3444_vm15 = vmand %vm3412_vm11, %vm3428_vm10  ;;  %v3093_v6 = vshra.s32 %v5937_v28, 3  ;;  %v6724_v28 = vand.u32 7, %v5970_v41  ;;  %v3207_v41 = vand.u32 1, %v3175_v12  ;;  %v3098_v12 = vshra.s32 %v5992_v63, 3 }
 0x322   :  { %vm3476_vm8 = vmand %vm3444_vm15, %vm3460_vm14  ;;  %v3206_v38 = vand.u32 1, %v3174_v2 }
 0x323   :  { %8273 = vst [vmem:[#allocation10_spill] sm:$0xff] %v6724_v28  ;;  %v6728_v9 = vand.u32 3, %v3093_v6  ;;  %v3176_v30 = vand.u32 3, %v6724_v28  ;;  %v3271_v31 = vmul.u32 2, %v3207_v41 }
 0x324   :  { %v3270_v50 = vmul.u32 2, %v3206_v38 }
 0x325   :  { %8274 = vst [vmem:[#allocation11_spill] sm:$0xff] %v6728_v9  ;;  %v3192_v46 = vshra.s32 %v3176_v30, 1 }
 0x33a   :  { %v2880_v17 = vpop.permute.xlu1 %2879 }
 0x33b   :  { %2885 = vst.msk [vmem:[#allocation2 + $0x20] sm:$0xff] %vm2883_vm0, %v2880_v17  ;;  %v2878_v39 = vpop.permute.xlu0 %2877  ;;  %v3189_v17 = vshra.s32 %v3173_v23, 1 }
 0x33c   :  { %2884 = vst.msk [vmem:[#allocation2] sm:$0xff] %vm2883_vm0, %v2878_v39  ;;  %vm3523_vm0 = vcmp.eq.s32.totalorder %v5959_v22, %v3363_v32  ;;  %v3094_v39 = vshra.s32 %v5940_v29, 3  ;;  %v3158_v29 = vshra.s32 %v6708_v20, 2  ;;  %v6740_v32 = vshra.s32 %v3096_v53, 2 }
 0x33e   :  { %v6730_v15 = vand.u32 3, %v3094_v39  ;;  %v3318_v4 = vmul.u32 4, %v3158_v29  ;;  %8277 = vst [vmem:[#allocation14_spill] sm:$0xff] %v6740_v32 }
 0x340   :  { %8275 = vst [vmem:[#allocation12_spill] sm:$0xff] %v6730_v15  ;;  %v3286_v59 = vadd.s32 %v3270_v50, %v6730_v15  ;;  %v3097_v50 = vshra.s32 %v5988_v61, 3 }
 0x342   :  { %v5209_v3 = vadd.s32 4294967295, %v3286_v59  ;;  %v6766_v59 = vshra.s32 %v3097_v50, 2 }
 0x344   :  { %8282 = vst [vmem:[#allocation19_spill] sm:$0xff] %v6766_v59 }
 0x352   :  { %v2891_v56 = vpop.permute.xlu1 %2890 }
 0x353   :  { %2896 = vst.msk [vmem:[#allocation2 + $0x20] sm:$0xff] %vm2894_vm1, %v2891_v56  ;;  %v2889_v52 = vpop.permute.xlu0 %2888  ;;  %v3190_v56 = vshra.s32 %v3174_v2, 1  ;;  %v3160_v2 = vshra.s32 %v6724_v28, 2 }
 0x354   :  { %2895 = vst.msk [vmem:[#allocation2] sm:$0xff] %vm2894_vm1, %v2889_v52  ;;  %vm3475_vm1 = vmand %vm3443_vm13, %vm3459_vm12  ;;  %v6714_v52 = vshra.s32 %v3093_v6, 2  ;;  %vm3430_vm12 = vcmp.ge.s32.totalorder %v5209_v3, 0 }
 0x355   :  { %vm3571_vm3 = vmand %vm3475_vm1, %vm3523_vm0  ;;  %vm3462_vm0 = vcmp.lt.s32.totalorder %v5209_v3, 4 }
 0x356   :  { %v3587_v24 = vsel %vm3571_vm3, 1.0, %v8260_v13 }
 0x36d   :  { %v2902_v40 = vpop.permute.xlu1 %2901 }
 0x36e   :  { %2907 = vst.msk [vmem:[#allocation2 + $0x20] sm:$0xff] %vm2905_vm2, %v2902_v40  ;;  %v2900_v16 = vpop.permute.xlu0 %2899  ;;  %v3221_v40 = vmul.u32 2, %v3189_v17  ;;  %v6747_v17 = vand.u32 7, %v5988_v61  ;;  %v6768_v61 = vshra.s32 %v3098_v12, 2 }
 0x36f   :  { %2906 = vst.msk [vmem:[#allocation2] sm:$0xff] %vm2905_vm2, %v2900_v16  ;;  %vm3524_vm2 = vcmp.eq.s32.totalorder %v5959_v22, %v3364_v7  ;;  %v6716_v16 = vshra.s32 %v3094_v39, 2  ;;  %v3224_v7 = vmul.u32 2, %v3192_v46 }
 0x370   :  { %vm3572_vm5 = vmand %vm3476_vm8, %vm3524_vm2  ;;  %v3237_v11 = vadd.s32 %v3221_v40, %v6714_v52  ;;  %8278 = vst [vmem:[#allocation15_spill] sm:$0xff] %v6747_v17  ;;  %v3319_v40 = vmul.u32 4, %v3159_v33 }
 0x371   :  { %v3588_v5 = vsel %vm3572_vm5, 1.0, %v8260_v13  ;;  %v3240_v6 = vadd.s32 %v3224_v7, %v6740_v32  ;;  %8283 = vst [vmem:[#allocation20_spill] sm:$0xff] %v6768_v61 }
 0x372   :  { %v3603_v34 = vpack.c.bf16 %v3588_v5, %v3587_v24  ;;  %v5192_v57 = vadd.s32 4294967295, %v3237_v11  ;;  %v3208_v5 = vand.u32 1, %v3176_v30 }
 0x373   :  { %v5195_v29 = vadd.s32 4294967295, %v3240_v6 }
 0x374   :  { %v3333_v44 = vadd.s32 %v5192_v57, %v3317_v18  ;;  %vm3381_vm8 = vcmp.ge.s32.totalorder %v5192_v57, 0  ;;  %vm3397_vm6 = vcmp.lt.s32.totalorder %v5192_v57, 4  ;;  %v3272_v11 = vmul.u32 2, %v3208_v5 }
 0x375   :  { %v2909_v55 = vld [vmem:[#allocation2 + $0x20] sm:$0xff]  ;;  %vm3413_vm10 = vmand %vm3381_vm8, %vm3397_vm6 }
 0x376   :  { %v2908_v58 = vld [vmem:[#allocation2] sm:$0xff]  ;;  %v3349_v54 = vmul.u32 4, %v3333_v44 }
 0x377   :  { %5622 = vmatprep.mubr.bf16.mxu0 %v2908_v58  ;;  %v3222_v58 = vmul.u32 2, %v3190_v56  ;;  %v6749_v56 = vand.u32 3, %v3095_v21  ;;  %v6773_v21 = vand.u32 3, %v3097_v50 }
 0x378   :  { %5623 = vmatmul.mubr.bf16.vlgmr.msra.gmra.mrb[16].mxu0 %v2909_v55  ;;  %v3205_v55 = vand.u32 1, %v3173_v23 }
 0x379   :  { %5630 = vmatprep.mubr.msk.bf16.mxu0 %vm8236_vm4, %v3603_v34  ;;  %v3238_v49 = vadd.s32 %v3222_v58, %v6716_v16  ;;  %v3239_v34 = vadd.s32 %v3223_v51, %v6738_v8  ;;  %8279 = vst [vmem:[#allocation16_spill] sm:$0xff] %v6749_v56  ;;  %v6752_v58 = vand.u32 7, %v5992_v63  ;;  %v3287_v18 = vadd.s32 %v3271_v31, %v6749_v56 }
 0x37a   :  { %v3269_v35 = vmul.u32 2, %v3205_v55  ;;  %v6755_v55 = vand.u32 3, %v3096_v53  ;;  %8284 = vst [vmem:[#allocation21_spill] sm:$0xff] %v6773_v21 }
 0x37b   :  { %v5193_v26 = vadd.s32 4294967295, %v3238_v49  ;;  %8280 = vst [vmem:[#allocation17_spill] sm:$0xff] %v6752_v58  ;;  %v5194_v38 = vadd.s32 4294967295, %v3239_v34  ;;  %v3320_v49 = vmul.u32 4, %v3160_v2  ;;  %v3178_v57 = vand.u32 3, %v6752_v58 }
 0x37c   :  { %v3285_v48 = vadd.s32 %v3269_v35, %v6728_v9  ;;  %8281 = vst [vmem:[#allocation18_spill] sm:$0xff] %v6755_v55  ;;  %v3177_v35 = vand.u32 3, %v6747_v17  ;;  %v3288_v30 = vadd.s32 %v3272_v11, %v6755_v55  ;;  %v5210_v53 = vadd.s32 4294967295, %v3287_v18 }
 0x37d   :  { %v3334_v45 = vadd.s32 %v5193_v26, %v3318_v4  ;;  %vm3382_vm7 = vcmp.ge.s32.totalorder %v5193_v26, 0  ;;  %vm3398_vm9 = vcmp.lt.s32.totalorder %v5193_v26, 4  ;;  %v3335_v26 = vadd.s32 %v5194_v38, %v3319_v40 }
 0x37e   :  { %v5208_v42 = vadd.s32 4294967295, %v3285_v48  ;;  %vm3414_vm13 = vmand %vm3382_vm7, %vm3398_vm9  ;;  %v3336_v4 = vadd.s32 %v5195_v29, %v3320_v49  ;;  %v3193_v48 = vshra.s32 %v3177_v35, 1  ;;  %vm3025_vm7 = vcmask 130048  }
 0x37f   :  { %v3350_v24 = vmul.u32 4, %v3334_v45  ;;  %vm3446_vm1 = vmand %vm3414_vm13, %vm3430_vm12  ;;  %v3194_v14 = vshra.s32 %v3178_v57, 1  ;;  %v3209_v44 = vand.u32 1, %v3177_v35  ;;  %v5211_v46 = vadd.s32 4294967295, %v3288_v30 }
 0x380   :  { %vm3429_vm11 = vcmp.ge.s32.totalorder %v5208_v42, 0  ;;  %v3365_v23 = vadd.s32 %v5208_v42, %v3349_v54  ;;  %vm3461_vm15 = vcmp.lt.s32.totalorder %v5208_v42, 4  ;;  %vm3478_vm5 = vmand %vm3446_vm1, %vm3462_vm0  ;;  %v3351_v45 = vmul.u32 4, %v3335_v26 }
 0x381   :  { %v3366_v39 = vadd.s32 %v5209_v3, %v3350_v24  ;;  %vm3445_vm14 = vmand %vm3413_vm10, %vm3429_vm11  ;;  %v3161_v42 = vshra.s32 %v6747_v17, 2  ;;  %v3352_v51 = vmul.u32 4, %v3336_v4  ;;  %v6779_v54 = vand.u32 3, %v3098_v12 }
 0x382   :  { %vm3477_vm2 = vmand %vm3445_vm14, %vm3461_vm15  ;;  %vm3525_vm3 = vcmp.eq.s32.totalorder %v5959_v22, %v3365_v23  ;;  %v3225_v7 = vmul.u32 2, %v3193_v48  ;;  %vm3383_vm10 = vcmp.ge.s32.totalorder %v5194_v38, 0  ;;  %vm3399_vm11 = vcmp.lt.s32.totalorder %v5194_v38, 4 }
 0x383   :  { %vm3526_vm8 = vcmp.eq.s32.totalorder %v5959_v22, %v3366_v39  ;;  %vm3573_vm6 = vmand %vm3477_vm2, %vm3525_vm3  ;;  %8285 = vst [vmem:[#allocation22_spill] sm:$0xff] %v6779_v54  ;;  %v3162_v24 = vshra.s32 %v6752_v58, 2  ;;  %v3210_v33 = vand.u32 1, %v3178_v57  ;;  %vm3384_vm12 = vcmp.ge.s32.totalorder %v5195_v29, 0 }
 0x384   :  { %vm3574_vm9 = vmand %vm3478_vm5, %vm3526_vm8  ;;  %v6771_v63 = vsel %vm3573_vm6, 1.0, %v8260_v13  ;;  %vm3400_vm13 = vcmp.lt.s32.totalorder %v5195_v29, 4  ;;  %v3226_v41 = vmul.u32 2, %v3194_v14  ;;  %v3273_v5 = vmul.u32 2, %v3209_v44 }
 0x385   :  { %v6777_v3 = vsel %vm3574_vm9, 1.0, %v8260_v13  ;;  %vm3431_vm14 = vcmp.ge.s32.totalorder %v5210_v53, 0  ;;  %vm3432_vm15 = vcmp.ge.s32.totalorder %v5211_v46, 0  ;;  %vm3463_vm0 = vcmp.lt.s32.totalorder %v5210_v53, 4  ;;  %vm6788_vm1 = vmand %vm3383_vm10, %vm3399_vm11 }
 0x386   :  { %v3321_v23 = vmul.u32 4, %v3161_v42  ;;  %v3367_v6 = vadd.s32 %v5210_v53, %v3351_v45  ;;  %v3368_v39 = vadd.s32 %v5211_v46, %v3352_v51  ;;  %vm3464_vm2 = vcmp.lt.s32.totalorder %v5211_v46, 4  ;;  %vm6799_vm3 = vmand %vm3384_vm12, %vm3400_vm13 }
 0x387   :  { %v3241_v31 = vadd.s32 %v3225_v7, %v6766_v59  ;;  %v3274_v50 = vmul.u32 2, %v3210_v33  ;;  %v3322_v38 = vmul.u32 4, %v3162_v24  ;;  %v3099_v12 = vshra.s32 %v5995_v0, 3  ;;  %vm3447_vm5 = vmand %vm6788_vm1, %vm3431_vm14 }
 0x388   :  { %v3242_v18 = vadd.s32 %v3226_v41, %v6768_v61  ;;  %v3289_v30 = vadd.s32 %v3273_v5, %v6773_v21  ;;  %v6809_v26 = vand.u32 7, %v5995_v0  ;;  %v6812_v4 = vand.u32 7, %v5998_v1  ;;  %vm6828_vm8 = vmand %vm6799_vm3, %vm3432_vm15 }
 0x389   :  { %vm3527_vm6 = vcmp.eq.s32.totalorder %v5959_v22, %v3367_v6  ;;  %v6833_v42 = vadd.s32 4294967295, %v3241_v31  ;;  %v3100_v51 = vshra.s32 %v5998_v1, 3  ;;  %vm3479_vm9 = vmand %vm3447_vm5, %vm3463_vm0  ;;  %vm3528_vm11 = vcmp.eq.s32.totalorder %v5959_v22, %v3368_v39 }
 0x38a   :  { %8290 = vst [vmem:[#allocation23_spill] sm:$0xff] %v6809_v26  ;;  %8291 = vst [vmem:[#allocation24_spill] sm:$0xff] %v6812_v4  ;;  %v3179_v35 = vand.u32 3, %v6809_v26  ;;  %v3180_v31 = vand.u32 3, %v6812_v4  ;;  %v6872_v6 = vand.u32 7, %v6041_v47  ;;  %v3163_v28 = vshra.s32 %v6809_v26, 2 }
 0x38b   :  { %vm3480_vm10 = vmand %vm6828_vm8, %vm3464_vm2  ;;  %v3337_v46 = vadd.s32 %v6833_v42, %v3321_v23  ;;  %v6863_v45 = vshra.s32 %v3100_v51, 2  ;;  %v6882_v61 = vand.u32 3, %v3100_v51  ;;  %v3164_v62 = vshra.s32 %v6812_v4, 2 }
 0x38c   :  { %vm3575_vm12 = vmand %vm3479_vm9, %vm3527_vm6  ;;  %8298 = vst [vmem:[#allocation29_spill] sm:$0xff] %v6872_v6  ;;  %v3323_v26 = vmul.u32 4, %v3163_v28  ;;  %vm3401_vm14 = vcmp.lt.s32.totalorder %v6833_v42, 4 }
 0x38d   :  { %8295 = vst [vmem:[#allocation26_spill] sm:$0xff] %v6863_v45  ;;  %vm3576_vm13 = vmand %vm3480_vm10, %vm3528_vm11 }
 0x38e   :  { %8299 = vst [vmem:[#allocation30_spill] sm:$0xff] %v6882_v61 }
 0x44b   :  { %v6782_v34 = vpop.f32.mrb[16].mxu0 }
 0x44c   :  { %v6784_v2 = vpop.f32.mrb[17].mxu0  ;;  %v3042_v29 = vmul.f32 %v6782_v34, %v6782_v34  ;;  %v3029_v7 = vsel %vm3025_vm7, %v6782_v34, 0.0 }
 0x44d   :  { %v3040_v11 = vmul.f32 %v6784_v2, %v6784_v2  ;;  %v6795_v49 = vpop.f32.mrb[18].mxu0  ;;  %v3026_v48 = vsel %vm3025_vm7, %v6784_v2, 0.0 }
 0x44e   :  { %v6804_v57 = vpop.f32.mrb[19].mxu0  ;;  %v3043_v33 = vmul.f32 %v6795_v49, %v6795_v49  ;;  %v3047_v1 = vsel %vm3025_vm7, %v3042_v29, 0.0  ;;  %v6861_v29 = vshra.s32 %v3099_v12, 2 }
 0x44f   :  { %v3027_v14 = vsel %vm3025_vm7, %v6804_v57, 0.0  ;;  %v3041_v44 = vmul.f32 %v6804_v57, %v6804_v57  ;;  %v3044_v24 = vsel %vm3025_vm7, %v3040_v11, 0.0  ;;  %v6852_v11 = vadd.s32 4294967295, %v3242_v18 }
 0x450   :  { %v3028_v0 = vadd.f32 %v3027_v14, %v3026_v48  ;;  %v3031_v48 = vsel %vm3025_vm7, %v6795_v49, 0.0  ;;  %8294 = vst [vmem:[#allocation25_spill] sm:$0xff] %v6861_v29 }
 0x451   :  { %v3045_v41 = vsel %vm3025_vm7, %v3041_v44, 0.0  ;;  %v3290_v44 = vadd.s32 %v3274_v50, %v6779_v54  ;;  %v3338_v50 = vadd.s32 %v6852_v11, %v3322_v38  ;;  %v3211_v38 = vand.u32 1, %v3179_v35 }
 0x452   :  { %v3030_v5 = vadd.f32 %v3029_v7, %v3028_v0  ;;  %v3046_v40 = vadd.f32 %v3045_v41, %v3044_v24  ;;  %v6855_v0 = vadd.s32 4294967295, %v3289_v30  ;;  %v3049_v7 = vsel %vm3025_vm7, %v3043_v33, 0.0 }
 0x453   :  { %v3195_v24 = vshra.s32 %v3179_v35, 1  ;;  %v3196_v41 = vshra.s32 %v3180_v31, 1  ;;  %v6866_v30 = vand.u32 3, %v3099_v12  ;;  %v6869_v33 = vand.u32 7, %v6034_v36 }
 0x454   :  { %v3032_v14 = vadd.f32 %v3031_v48, %v3030_v5  ;;  %v3048_v53 = vadd.f32 %v3047_v1, %v3046_v40  ;;  %v6875_v40 = vsel %vm3575_vm12, 1.0, %v8260_v13  ;;  %v6877_v1 = vadd.s32 4294967295, %v3290_v44 }
 0x455   :  { %8296 = vst [vmem:[#allocation27_spill] sm:$0xff] %v6866_v30  ;;  %8297 = vst [vmem:[#allocation28_spill] sm:$0xff] %v6869_v33  ;;  %v6880_v48 = vsel %vm3576_vm13, 1.0, %v8260_v13  ;;  %v3212_v12 = vand.u32 1, %v3180_v31  ;;  %v3227_v17 = vmul.u32 2, %v3195_v24  ;;  %v3228_v54 = vmul.u32 2, %v3196_v41 }
 0x456   :  { %v3033_v39 = vrot.slane %v3032_v14, 4  ;;  %v3050_v18 = vadd.f32 %v3049_v7, %v3048_v53  ;;  %v3353_v53 = vmul.u32 4, %v3337_v46  ;;  %v3354_v21 = vmul.u32 4, %v3338_v50 }
 0x457   :  { %v3275_v46 = vmul.u32 2, %v3211_v38  ;;  %v3276_v35 = vmul.u32 2, %v3212_v12  ;;  %v3101_v31 = vshra.s32 %v6034_v36, 3  ;;  %v3243_v51 = vadd.s32 %v3227_v17, %v6861_v29 }
 0x458   :  { %v3034_v23 = vadd.f32 %v3033_v39, %v3032_v14  ;;  %v3051_v5 = vrot.slane %v3050_v18, 4  ;;  %v3181_v14 = vand.u32 3, %v6869_v33  ;;  %v3182_v39 = vand.u32 3, %v6872_v6 }
 0x459   :  { %v3244_v50 = vadd.s32 %v3228_v54, %v6863_v45  ;;  %v3324_v36 = vmul.u32 4, %v3164_v62  ;;  %v6906_v45 = vadd.s32 4294967295, %v3243_v51  ;;  %v8302_v62 = vld [vmem:[#allocation3_spill] sm:$0xff]  ;;  %vm3385_vm7 = vcmp.ge.s32.totalorder %v6833_v42, 0 }
 0x45a   :  { %v3035_v7 = vrot.slane %v3034_v23, 2  ;;  %v3052_v58 = vadd.f32 %v3051_v5, %v3050_v18  ;;  %v3102_v18 = vshra.s32 %v6041_v47, 3  ;;  %v6893_v5 = vadd.s32 %v6855_v0, %v3353_v53  ;;  %vm6989_vm13 = vmand %vm3385_vm7, %vm3401_vm14 }
 0x45b   :  { %v3198_v4 = vshra.s32 %v3182_v39, 1  ;;  %v3291_v47 = vadd.s32 %v3275_v46, %v6866_v30  ;;  %v6912_v29 = vand.u32 7, %v8302_v62  ;;  %vm3386_vm15 = vcmp.ge.s32.totalorder %v6852_v11, 0 }
 0x45c   :  { %v3036_v59 = vadd.f32 %v3035_v7, %v3034_v23  ;;  %v3053_v44 = vrot.slane %v3052_v58, 2  ;;  %v6896_v23 = vadd.s32 %v6877_v1, %v3354_v21  ;;  %v3197_v7 = vshra.s32 %v3181_v14, 1 }
 0x45d   :  { %v6902_v17 = vshra.s32 %v3102_v18, 2  ;;  %v6908_v21 = vadd.s32 4294967295, %v3244_v50  ;;  %v3230_v28 = vmul.u32 2, %v3198_v4  ;;  %8303 = vst [vmem:[#allocation3_spill] sm:$0xff] %v6912_v29  ;;  %v3213_v4 = vand.u32 1, %v3181_v14 }
 0x45e   :  { %v3037_v24 = vrot.slane %v3036_v59, 1  ;;  %v3054_v41 = vadd.f32 %v3053_v44, %v3052_v58  ;;  %v3292_v58 = vadd.s32 %v3276_v35, %v6882_v61  ;;  %v6900_v44 = vshra.s32 %v3101_v31, 2 }
 0x45f   :  { %8301 = vst [vmem:[#allocation32_spill] sm:$0xff] %v6902_v17  ;;  %vm3402_vm0 = vcmp.lt.s32.totalorder %v6852_v11, 4  ;;  %v6932_v51 = vand.u32 3, %v3102_v18  ;;  %v3166_v50 = vshra.s32 %v6872_v6, 2  ;;  %v3246_v14 = vadd.s32 %v3230_v28, %v6902_v17 }
 0x460   :  { %v3038_v38 = vadd.f32 %v3037_v24, %v3036_v59  ;;  %v3055_v12 = vrot.slane %v3054_v41, 1  ;;  %8300 = vst [vmem:[#allocation31_spill] sm:$0xff] %v6900_v44  ;;  %v3165_v59 = vshra.s32 %v6869_v33, 2  ;;  %v3229_v24 = vmul.u32 2, %v3197_v7  ;;  %vm7003_vm12 = vmand %vm3386_vm15, %vm3402_vm0 }
 0x461   :  { %v3214_v7 = vand.u32 1, %v3182_v39  ;;  %8305 = vst [vmem:[#allocation34_spill] sm:$0xff] %v6932_v51  ;;  %vm3433_vm1 = vcmp.ge.s32.totalorder %v6855_v0, 0  ;;  %vm3434_vm2 = vcmp.ge.s32.totalorder %v6877_v1, 0  ;;  %v6945_v18 = vadd.s32 4294967295, %v3292_v58 }
 0x462   :  { %v6904_v54 = vmul.f32 0.03125, %v3038_v38  ;;  %v3056_v53 = vadd.f32 %v3055_v12, %v3054_v41  ;;  %v3340_v41 = vadd.s32 %v6908_v21, %v3324_v36  ;;  %v6930_v38 = vand.u32 3, %v3101_v31  ;;  %vm7020_vm15 = vmand %vm6989_vm13, %vm3433_vm1 }
 0x463   :  { %v3245_v33 = vadd.s32 %v3229_v24, %v6900_v44  ;;  %v6943_v31 = vadd.s32 4294967295, %v3291_v47  ;;  %v3277_v36 = vmul.u32 2, %v3213_v4  ;;  %v3278_v6 = vmul.u32 2, %v3214_v7  ;;  %vm7036_vm1 = vmand %vm7003_vm12, %vm3434_vm2 }
 0x464   :  { %v3057_v46 = vmul.f32 0.03125, %v3056_v53  ;;  %v3058_v35 = vmul.f32 %v6904_v54, %v6904_v54  ;;  %v3339_v53 = vadd.s32 %v6906_v45, %v3323_v26  ;;  %8304 = vst [vmem:[#allocation33_spill] sm:$0xff] %v6930_v38  ;;  %v3183_v26 = vand.u32 3, %v6912_v29 }
 0x465   :  { %v3356_v28 = vmul.u32 4, %v3340_v41  ;;  %vm3387_vm3 = vcmp.ge.s32.totalorder %v6906_v45, 0  ;;  %vm3465_vm5 = vcmp.lt.s32.totalorder %v6855_v0, 4  ;;  %v6952_v17 = vadd.s32 4294967295, %v3246_v14 }
 0x466   :  { %v3059_v12 = vsub.f32 %v3057_v46, %v3058_v35  ;;  %v3325_v46 = vmul.u32 4, %v3165_v59  ;;  %v8306_v35 = vld [vmem:[#allocation4_spill] sm:$0xff]  ;;  %v3355_v44 = vmul.u32 4, %v3339_v53  ;;  %v3103_v59 = vshra.s32 %v8302_v62, 3  ;;  %v8309_v53 = vld [vmem:[#allocation5_spill] sm:$0xff] }
 0x467   :  { %v6939_v61 = vand.u32 7, %v8306_v35  ;;  %v3326_v30 = vmul.u32 4, %v3166_v50  ;;  %v3104_v47 = vshra.s32 %v8306_v35, 3  ;;  %vm3388_vm8 = vcmp.ge.s32.totalorder %v6908_v21, 0 }
 0x468   :  { %v3060_v39 = vmax.f32 %v3059_v12, 0.0  ;;  %v6950_v12 = vadd.s32 4294967295, %v3245_v33  ;;  %vm3403_vm6 = vcmp.lt.s32.totalorder %v6906_v45, 4  ;;  %v3199_v41 = vshra.s32 %v3183_v26, 1 }
 0x469   :  { %8307 = vst [vmem:[#allocation4_spill] sm:$0xff] %v6939_v61  ;;  %v3184_v58 = vand.u32 3, %v6939_v61  ;;  %vm3404_vm9 = vcmp.lt.s32.totalorder %v6908_v21, 4  ;;  %vm3435_vm10 = vcmp.ge.s32.totalorder %v6943_v31, 0  ;;  %v3293_v33 = vadd.s32 %v3277_v36, %v6930_v38  ;;  %vm7049_vm14 = vmand %vm3387_vm3, %vm3403_vm6 }
 0x46a   :  { %v3065_v24 = vadd.f32 1e-05, %v3060_v39  ;;  %v3294_v62 = vadd.s32 %v3278_v6, %v6932_v51  ;;  %vm3466_vm11 = vcmp.lt.s32.totalorder %v6877_v1, 4  ;;  %v6964_v50 = vadd.s32 %v6943_v31, %v3355_v44  ;;  %vm7064_vm3 = vmand %vm7020_vm15, %vm3465_vm5 }
 0x46b   :  { %v6967_v4 = vadd.s32 %v6945_v18, %v3356_v28  ;;  %v6969_v7 = vshra.s32 %v3103_v59, 2  ;;  %v6972_v14 = vand.u32 7, %v8309_v53  ;;  %v6976_v39 = vadd.s32 %v6950_v12, %v3325_v46  ;;  %vm3420_vm5 = vmand %vm3388_vm8, %vm3404_vm9 }
 0x46c   :  { %5783 = vrsqrt.f32 %v3065_v24  ;;  %v6979_v6 = vadd.s32 %v6952_v17, %v3326_v30  ;;  %v6981_v35 = vshra.s32 %v3104_v47, 2  ;;  %v6983_v44 = vand.u32 3, %v3103_v59  ;;  %v8312_v30 = vld [vmem:[#allocation6_spill] sm:$0xff]  ;;  %vm7094_vm6 = vmand %vm7049_vm14, %vm3435_vm10 }
 0x46d   :  { %8308 = vst [vmem:[#allocation35_spill] sm:$0xff] %v6969_v7  ;;  %v6994_v24 = vand.u32 3, %v3104_v47  ;;  %v3200_v46 = vshra.s32 %v3184_v58, 1  ;;  %v3231_v28 = vmul.u32 2, %v3199_v41  ;;  %v6997_v51 = vand.u32 7, %v8312_v30  ;;  %vm7107_vm8 = vmand %vm7036_vm1, %vm3466_vm11 }
 0x46e   :  { %v7007_v42 = vadd.s32 4294967295, %v3293_v33  ;;  %v7009_v38 = vadd.s32 4294967295, %v3294_v62  ;;  %v3167_v47 = vshra.s32 %v6912_v29, 2  ;;  %v3168_v55 = vshra.s32 %v6939_v61, 2  ;;  %v5188_v29 = vld [vmem:[%s8193_s6 + $0x1] ss:$0 sm:$0xff] }
 0x46f   :  { %v3215_v41 = vand.u32 1, %v3183_v26  ;;  %v3216_v56 = vand.u32 1, %v3184_v58  ;;  %v3185_v11 = vand.u32 3, %v6972_v14  ;;  %vm3529_vm0 = vcmp.eq.s32.totalorder %v5959_v22, %v6893_v5 }
 0x470   :  { %vm3530_vm7 = vcmp.eq.s32.totalorder %v5959_v22, %v6896_v23  ;;  %vm3405_vm4 = vcmp.lt.s32.totalorder %v6950_v12, 4  ;;  %v3232_v36 = vmul.u32 2, %v3200_v46  ;;  %v3247_v62 = vadd.s32 %v3231_v28, %v6969_v7 }
 0x471   :  { %v3186_v61 = vand.u32 3, %v6997_v51  ;;  %vm3532_vm2 = vcmp.eq.s32.totalorder %v5959_v22, %v6967_v4  ;;  %vm3406_vm12 = vcmp.lt.s32.totalorder %v6952_v17, 4  ;;  %vm3437_vm13 = vcmp.ge.s32.totalorder %v7007_v42, 0 }
 0x472   :  { %v3327_v46 = vmul.u32 4, %v3167_v47  ;;  %v3328_v28 = vmul.u32 4, %v3168_v55  ;;  %v3106_v47 = vshra.s32 %v8312_v30, 3  ;;  %v3201_v55 = vshra.s32 %v3185_v11, 1 }
 0x473   :  { %v3279_v7 = vmul.u32 2, %v3215_v41  ;;  %v3280_v32 = vmul.u32 2, %v3216_v56  ;;  %v8323_v8 = vsub.f32 %v6804_v57, %v6904_v54  ;;  %v8324_v0 = vsub.f32 %v6784_v2, %v6904_v54 }
 0x474   :  { %v8325_v33 = vsub.f32 %v6782_v34, %v6904_v54  ;;  %v8326_v9 = vsub.f32 %v6795_v49, %v6904_v54  ;;  %vm3469_vm15 = vcmp.lt.s32.totalorder %v7007_v42, 4  ;;  %v5202_v34 = vadd.s32 4294967295, %v3247_v62 }
 0x475   :  { %v8329_v2 = vshra.s32 %v8309_v53, 3  ;;  %v3202_v57 = vshra.s32 %v3186_v61, 1  ;;  %vm3470_vm9 = vcmp.lt.s32.totalorder %v7009_v38, 4  ;;  %vm8332_vm10 = vcmp.ge.s32.totalorder %v6945_v18, 0 }
 0x476   :  { %v5784_v26 = vpop.eup %5783  ;;  %vm7114_vm14 = vmand %vm3420_vm5, %vm8332_vm10  ;;  %vm8335_vm11 = vcmp.lt.s32.totalorder %v6943_v31, 4  ;;  %vm8338_vm5 = vcmp.ge.s32.totalorder %v6950_v12, 0  ;;  %v3169_v23 = vshra.s32 %v6972_v14, 2  ;;  %v8376_v12 = vmov 0 }
 0x477   :  { %v3068_v20 = vmul.f32 %v5784_v26, %v8323_v8  ;;  %v3067_v15 = vmul.f32 %v5784_v26, %v8324_v0  ;;  %v3069_v60 = vmul.f32 %v5784_v26, %v8325_v33  ;;  %v3070_v41 = vmul.f32 %v5784_v26, %v8326_v9  ;;  %v5189_v8 = vld [vmem:[%s8193_s6 + $0x2] ss:$0 sm:$0xff]  ;;  %vm7128_vm1 = vmand %vm7094_vm6, %vm8335_vm11 }
 0x478   :  { %v3248_v9 = vadd.s32 %v3232_v36, %v6981_v35  ;;  %v7101_v49 = vshra.s32 %v8329_v2, 2  ;;  %vm7136_vm10 = vmand %vm8338_vm5, %vm3405_vm4  ;;  %v3217_v2 = vand.u32 1, %v3185_v11  ;;  %vm8341_vm6 = vcmp.lt.s32.totalorder %v6945_v18, 4 }
 0x479   :  { %v3076_v54 = vmul.f32 %v5188_v29, %v3068_v20  ;;  %v3075_v21 = vmul.f32 %v5188_v29, %v3067_v15  ;;  %v3077_v26 = vmul.f32 %v5188_v29, %v3069_v60  ;;  %v3078_v0 = vmul.f32 %v5188_v29, %v3070_v41  ;;  %vm3484_vm11 = vmand %vm7114_vm14, %vm8341_vm6 }
 0x47a   :  { %v3295_v20 = vadd.s32 %v3279_v7, %v6983_v44  ;;  %v3296_v60 = vadd.s32 %v3280_v32, %v6994_v24  ;;  %v7122_v15 = vshra.s32 %v3106_v47, 2  ;;  %v3233_v29 = vmul.u32 2, %v3201_v55  ;;  %vm7149_vm4 = vmand %vm7064_vm3, %vm3529_vm0 }
 0x47b   :  { %v3083_v1 = vadd.f32 %v5189_v8, %v3075_v21  ;;  %v3084_v58 = vadd.f32 %v5189_v8, %v3076_v54  ;;  %v3085_v36 = vadd.f32 %v5189_v8, %v3077_v26  ;;  %v3086_v33 = vadd.f32 %v5189_v8, %v3078_v0  ;;  %vm7158_vm5 = vmand %vm7107_vm8, %vm3530_vm7 }
 0x47c   :  { %v5203_v7 = vadd.s32 4294967295, %v3248_v9  ;;  %v3343_v55 = vadd.s32 %v5202_v34, %v3327_v46  ;;  %v3234_v8 = vmul.u32 2, %v3202_v57  ;;  %v8346_v18 = vmul.u32 4, %v6976_v39  ;;  %vm7196_vm14 = vmand %vm3484_vm11, %vm3532_vm2 }
 0x47d   :  { %v3087_v54 = vmax.f32 %v3083_v1, 0.0  ;;  %v3088_v31 = vmax.f32 %v3084_v58, 0.0  ;;  %v3089_v21 = vmax.f32 %v3085_v36, 0.0  ;;  %v3090_v56 = vmax.f32 %v3086_v33, 0.0 }
 0x47e   :  { %v3373_v46 = vadd.s32 %v7007_v42, %v8346_v18  ;;  %vm8347_vm0 = vcmp.ge.s32.totalorder %v6952_v17, 0  ;;  %v5218_v45 = vadd.s32 4294967295, %v3295_v20  ;;  %v3218_v9 = vand.u32 1, %v3186_v61 }
 0x47f   :  { %vm7169_vm3 = vmand %vm8347_vm0, %vm3406_vm12  ;;  %v3611_v57 = vpack.c.bf16 %v3088_v31, %v3087_v54  ;;  %v3612_v26 = vpack.c.bf16 %v3090_v56, %v3089_v21  ;;  %vm8350_vm7 = vcmp.eq.s32.totalorder %v5959_v22, %v6964_v50  ;;  %v3170_v61 = vshra.s32 %v6997_v51, 2 }
 0x480   :  { %vm7179_vm8 = vmand %vm7128_vm1, %vm8350_vm7  ;;  %v3249_v0 = vadd.s32 %v3233_v29, %v7101_v49  ;;  %v3344_v59 = vadd.s32 %v5203_v7, %v3328_v28  ;;  %vm3391_vm1 = vcmp.ge.s32.totalorder %v5202_v34, 0  ;;  %vm3407_vm6 = vcmp.lt.s32.totalorder %v5202_v34, 4 }
 0x481   :  { %vm7187_vm12 = vmand %vm7136_vm10, %vm3437_vm13  ;;  %v3250_v62 = vadd.s32 %v3234_v8, %v7122_v15  ;;  %5626 = vmatprep.subr.bf16.mxu0 %v3611_v57  ;;  %vm8357_vm13 = vcmp.ge.s32.totalorder %v7009_v38, 0  ;;  %v5219_v29 = vadd.s32 4294967295, %v3296_v60  ;;  %v3359_v4 = vmul.u32 4, %v3343_v55 }
 0x482   :  { %vm7205_vm10 = vmand %vm7169_vm3, %vm8357_vm13  ;;  %v8360_v1 = vshra.s32 %v8309_v53, 3  ;;  %v3281_v28 = vmul.u32 2, %v3217_v2  ;;  %5627 = vmatpush3.bf16.msra.mxu0 %v3611_v57  ;;  %vm3392_vm11 = vcmp.ge.s32.totalorder %v5203_v7, 0  ;;  %vm3408_vm0 = vcmp.lt.s32.totalorder %v5203_v7, 4 }
 0x483   :  { %vm7217_vm2 = vmand %vm7187_vm12, %vm3469_vm15  ;;  %v7223_v60 = vand.u32 3, %v3106_v47  ;;  %v3282_v33 = vmul.u32 2, %v3218_v9  ;;  %5628 = vmatprep.subr.bf16.mxu0 %v3612_v26  ;;  %v8363_v53 = vmul.u32 4, %v6979_v6  ;;  %vm3439_vm15 = vcmp.ge.s32.totalorder %v5218_v45, 0 }
 0x484   :  { %v7211_v58 = vand.u32 3, %v8360_v1  ;;  %vm7230_vm3 = vmand %vm3391_vm1, %vm3407_vm6  ;;  %v5204_v32 = vadd.s32 4294967295, %v3249_v0  ;;  %v3329_v55 = vmul.u32 4, %v3169_v23  ;;  %vm3533_vm12 = vcmp.eq.s32.totalorder %v5959_v22, %v3373_v46 }
 0x485   :  { %v3374_v41 = vadd.s32 %v7009_v38, %v8363_v53  ;;  %vm7238_vm7 = vmand %vm7205_vm10, %vm3470_vm9  ;;  %v3360_v6 = vmul.u32 4, %v3344_v59  ;;  %v5205_v47 = vadd.s32 4294967295, %v3250_v62  ;;  %v3330_v34 = vmul.u32 4, %v3170_v61 }
 0x486   :  { %v3604_v2 = vpack.c.bf16 %v6777_v3, %v6771_v63  ;;  %v3375_v8 = vadd.s32 %v5218_v45, %v3359_v4  ;;  %vm3424_vm1 = vmand %vm3392_vm11, %vm3408_vm0  ;;  %vm3440_vm6 = vcmp.ge.s32.totalorder %v5219_v29, 0  ;;  %v3297_v38 = vadd.s32 %v3281_v28, %v7211_v58  ;;  %5629 = vmatpush3.bf16.msra.mxu0 %v3612_v26 }
 0x487   :  { %v3605_v54 = vpack.c.bf16 %v6880_v48, %v6875_v40  ;;  %vm3455_vm9 = vmand %vm7230_vm3, %vm3439_vm15  ;;  %vm3471_vm13 = vcmp.lt.s32.totalorder %v5218_v45, 4  ;;  %v3298_v31 = vadd.s32 %v3282_v33, %v7223_v60  ;;  %vm3534_vm10 = vcmp.eq.s32.totalorder %v5959_v22, %v3374_v41  ;;  %v5739_v40 = vld [vmem:[%s8195_s3 + $0x50] sm:$0xff]  }
 0x488   :  { %vm7259_vm11 = vmand %vm7217_vm2, %vm3533_vm12  ;;  %v8368_v63 = vmov 0  ;;  %v3345_v3 = vadd.s32 %v5204_v32, %v3329_v55  ;;  %v3376_v7 = vadd.s32 %v5219_v29, %v3360_v6  ;;  %vm3472_vm3 = vcmp.lt.s32.totalorder %v5219_v29, 4  ;;  %v5735_v6 = vld [vmem:[%s8195_s3 + $0x40] sm:$0xff]  }
 0x489   :  { %v8369_v63 = vsel %vm7259_vm11, 4294967295, %v8368_v63  ;;  %vm7263_vm0 = vmand %vm3424_vm1, %vm3440_vm6  ;;  %v3346_v48 = vadd.s32 %v5205_v47, %v3330_v34  ;;  %vm8372_vm15 = vcmask 261120   ;;  %v3593_v21 = vsel %vm7149_vm4, 1.0, %v8260_v13  ;;  %v5736_v34 = vld [vmem:[%s8195_s3] sm:$0xff]   ;;  %5406 = vmatprep.subr.bf16.mxu0 %v5735_v6 }
 0x48a   :  { %5631 = vmatmul.mubr.msk.bf16.vlgmr.msra.gmra.mrb[20].mxu0 %vm8372_vm15, %v3604_v2  ;;  %v3594_v56 = vsel %vm7158_vm5, 1.0, %v8260_v13  ;;  %vm7274_vm2 = vmand %vm3455_vm9, %vm3471_vm13  ;;  %vm3535_vm12 = vcmp.eq.s32.totalorder %v5959_v22, %v3375_v8  ;;  %v5220_v46 = vadd.s32 4294967295, %v3297_v38  ;;  %v3595_v5 = vsel %vm7179_vm8, 1.0, %v8260_v13 }
 0x48b   :  { %vm8375_vm1 = vmmov %vm8372_vm15  ;;  %v5221_v11 = vadd.s32 4294967295, %v3298_v31  ;;  %vm3393_vm5 = vcmp.ge.s32.totalorder %v5204_v32, 0  ;;  %vm3409_vm6 = vcmp.lt.s32.totalorder %v5204_v32, 4  ;;  %v3596_v45 = vsel %vm7196_vm14, 1.0, %v8260_v13  ;;  %5407 = vmatpush3.bf16.msra.mxu0 %v5736_v34 }
 0x48c   :  { %5634 = vmatprep.mubr.msk.bf16.mxu0 %vm8375_vm1, %v3605_v54  ;;  %vm7287_vm4 = vmand %vm7238_vm7, %vm3534_vm10  ;;  %v3361_v23 = vmul.u32 4, %v3345_v3  ;;  %vm3394_vm8 = vcmp.ge.s32.totalorder %v5205_v47, 0  ;;  %vm3410_vm13 = vcmp.lt.s32.totalorder %v5205_v47, 4  ;;  %vm3536_vm15 = vcmp.eq.s32.totalorder %v5959_v22, %v3376_v7  ;;  %v5738_v3 = vld [vmem:[%s8195_s3 + $0x8] sm:$0xff]  }
 0x48d   :  { %v8377_v12 = vsel %vm7287_vm4, 4294967295, %v8376_v12  ;;  %vm3488_vm9 = vmand %vm7263_vm0, %vm3472_vm3  ;;  %v8378_v9 = vmov 0  ;;  %v3362_v57 = vmul.u32 4, %v3346_v48  ;;  %v3606_v26 = vpack.c.bf16 %v3594_v56, %v3593_v21  ;;  %v5740_v21 = vld [vmem:[%s8195_s3 + $0x10] sm:$0xff]  }
 0x48e   :  { %vm7300_vm7 = vmand %vm7274_vm2, %vm3535_vm12  ;;  %vm3441_vm1 = vcmp.ge.s32.totalorder %v5220_v46, 0  ;;  %v3607_v39 = vpack.c.bf16 %v3596_v45, %v3595_v5  ;;  %vm3442_vm4 = vcmp.ge.s32.totalorder %v5221_v11, 0  ;;  %v3377_v17 = vadd.s32 %v5220_v46, %v3361_v23  ;;  %v5741_v5 = vld [vmem:[%s8195_s3 + $0x58] sm:$0xff]  }
 0x48f   :  { %v8379_v9 = vsel %vm7300_vm7, 4294967295, %v8378_v9  ;;  %vm3425_vm10 = vmand %vm3393_vm5, %vm3409_vm6  ;;  %v3378_v61 = vadd.s32 %v5221_v11, %v3362_v57  ;;  %vm3473_vm3 = vcmp.lt.s32.totalorder %v5220_v46, 4  ;;  %vm8380_vm2 = vcmask 261120   ;;  %v5743_v57 = vld [vmem:[%s8195_s3 + $0x60] sm:$0xff]  }
 0x490   :  { %vm3426_vm14 = vmand %vm3394_vm8, %vm3410_vm13  ;;  %vm3474_vm7 = vcmp.lt.s32.totalorder %v5221_v11, 4  ;;  %vm8382_vm6 = vnez %v8369_v63  ;;  %vm8383_vm8 = vnez %v8377_v12  ;;  %v5737_v63 = vld [vmem:[%s8195_s3 + $0x48] sm:$0xff]   ;;  %v5742_v12 = vld [vmem:[%s8195_s3 + $0x18] sm:$0xff]  }
 0x491   :  { %vm3584_vm11 = vmand %vm3488_vm9, %vm3536_vm15  ;;  %v3597_v0 = vsel %vm8382_vm6, 1.0, %v8260_v13  ;;  %v3598_v50 = vsel %vm8383_vm8, 1.0, %v8260_v13  ;;  %vm8384_vm9 = vnez %v8379_v9  ;;  %5408 = vmatprep.subr.bf16.mxu0 %v5737_v63  ;;  %vm3768_vm6 = vcmask 650752  }
 0x492   :  { %vm3457_vm0 = vmand %vm3425_vm10, %vm3441_vm1  ;;  %5635 = vmatmul.mubr.msk.bf16.gmra.mrb[24].mxu0 %vm8380_vm2, %v3606_v26  ;;  %v3599_v59 = vsel %vm8384_vm9, 1.0, %v8260_v13  ;;  %v3600_v62 = vsel %vm3584_vm11, 1.0, %v8260_v13  ;;  %vm3538_vm10 = vcmp.eq.s32.totalorder %v5959_v22, %v3378_v61  ;;  %v3608_v20 = vpack.c.bf16 %v3598_v50, %v3597_v0  ;;  %v5744_v26 = vld [vmem:[%s8195_s3 + $0x20] sm:$0xff]  }
 0x493   :  { %vm3458_vm12 = vmand %vm3426_vm14, %vm3442_vm4  ;;  %vm3537_vm4 = vcmp.eq.s32.totalorder %v5959_v22, %v3377_v17  ;;  %v3609_v29 = vpack.c.bf16 %v3600_v62, %v3599_v59  ;;  %5409 = vmatpush3.bf16.msra.mxu0 %v5738_v3  ;;  %vm3774_vm8 = vcmask 781952   ;;  %vm3780_vm9 = vcmask 913152  }
 0x494   :  { %vm8381_vm5 = vmmov %vm8380_vm2  ;;  %5410 = vmatprep.subr.bf16.mxu0 %v5739_v40  ;;  %v5248_v40 = vadd.s32 4294967295, %v6685_v37 }
 0x495   :  { %5638 = vmatprep.mubr.msk.bf16.mxu0 %vm8381_vm5, %v3607_v39  ;;  %vm3489_vm13 = vmand %vm3457_vm0, %vm3473_vm3  ;;  %vm3750_vm0 = vcmask 257152   ;;  %vm3756_vm3 = vcmask 388352  }
 0x496   :  { %vm3490_vm15 = vmand %vm3458_vm12, %vm3474_vm7  ;;  %vm3743_vm7 = vcmask 125952   ;;  %vm3762_vm12 = vcmask 519552  }
 0x497   :  { %vm3585_vm1 = vmand %vm3489_vm13, %vm3537_vm4  ;;  %5411 = vmatpush3.bf16.msra.mxu0 %v5740_v21  ;;  %vm3786_vm13 = vcmask 1044352   ;;  %v4064_v21 = vmul.u32 2, %v6676_v19  ;;  %vm4128_vm4 = vcmp.ge.s32.totalorder %v5248_v40, 0 }
 0x498   :  { %vm3586_vm14 = vmand %vm3490_vm15, %vm3538_vm10  ;;  %v3601_v4 = vsel %vm3585_vm1, 1.0, %v8260_v13  ;;  %5412 = vmatprep.subr.bf16.mxu0 %v5741_v5  ;;  %vm4144_vm10 = vcmp.lt.s32.totalorder %v5248_v40, 2 }
 0x499   :  { %vm8385_vm5 = vmmov %vm8380_vm2  ;;  %v3602_v1 = vsel %vm3586_vm14, 1.0, %v8260_v13  ;;  %v4080_v5 = vadd.s32 %v5248_v40, %v4064_v21 }
 0x49a   :  { %5639 = vmatmul.mubr.msk.bf16.gmra.mrb[28].mxu0 %vm8380_vm2, %v3608_v20  ;;  %v3610_v28 = vpack.c.bf16 %v3602_v1, %v3601_v4  ;;  %vm8386_vm11 = vmmov %vm8380_vm2  ;;  %v5745_v20 = vld [vmem:[%s8195_s3 + $0x68] sm:$0xff]   ;;  %v5747_v4 = vld [vmem:[%s8195_s3 + $0x70] sm:$0xff]  }
 0x49b   :  { %5642 = vmatprep.mubr.msk.bf16.mxu0 %vm8385_vm5, %v3609_v29  ;;  %5413 = vmatpush3.bf16.msra.mxu0 %v5742_v12  ;;  %v5746_v29 = vld [vmem:[%s8195_s3 + $0x28] sm:$0xff]   ;;  %v5748_v1 = vld [vmem:[%s8195_s3 + $0x30] sm:$0xff]   ;;  %vm4160_vm2 = vmand %vm4128_vm4, %vm4144_vm10 }
 0x49c   :  { %5414 = vmatprep.subr.bf16.mxu0 %v5743_v57  ;;  %v5250_v57 = vadd.s32 4294967295, %v6714_v52  ;;  %v8392_v52 = vld [vmem:[#allocation13_spill] sm:$0xff] }
 0x49f   :  { %5415 = vmatpush3.bf16.msra.mxu0 %v5744_v26  ;;  %v5251_v26 = vadd.s32 4294967295, %v6716_v16  ;;  %v5252_v16 = vadd.s32 4294967295, %v8392_v52 }
 0x4a0   :  { %5416 = vmatprep.subr.bf16.mxu0 %v5745_v20 }
 0x4a2   :  { %5643 = vmatmul.mubr.msk.bf16.gmra.mrb[32].mxu0 %vm8386_vm11, %v3610_v28  ;;  %v5749_v28 = vld [vmem:[%s8195_s3 + $0x78] sm:$0xff]  }
 0x4a3   :  { %5417 = vmatpush3.bf16.msra.mxu0 %v5746_v29 }
 0x4a4   :  { %5418 = vmatprep.subr.bf16.mxu0 %v5747_v4 }
 0x4a7   :  { %5419 = vmatpush3.bf16.msra.mxu0 %v5748_v1 }
 0x4a8   :  { %5420 = vmatprep.subr.bf16.mxu0 %v5749_v28  ;;  %v8393_v28 = vld [vmem:[#allocation14_spill] sm:$0xff] }
 0x55d   :  { %v5632_v36 = vpop.f32.mrb[20].mxu0 }
 0x55e   :  { %v3672_v33 = vpop.f32.mrb[21].mxu0 }
 0x55f   :  { %v5633_v53 = vpop.f32.mrb[22].mxu0 }
 0x560   :  { %v3736_v41 = vpack.c.bf16 %v5633_v53, %v5632_v36  ;;  %v3675_v42 = vpop.f32.mrb[23].mxu0  ;;  %v5750_v36 = vld [vmem:[%s8195_s3 + $0x38] sm:$0xff]  }
 0x561   :  { %v3735_v32 = vpack.c.bf16 %v3675_v42, %v3672_v33  ;;  %5421 = vmatpush3.bf16.msra.mxu0 %v5750_v36  ;;  %v5253_v36 = vadd.s32 4294967295, %v8393_v28 }
 0x562   :  { %3753 = vrot.lane.b32.xlu1 %v3736_v41, %s5793_s24  ;;  %v3758_v55 = vrot.slane %v3736_v41, 4 }
 0x563   :  { %3744 = vst.msk [vmem:[#allocation2] sm:$0xf] %vm3743_vm7, %v3735_v32  ;;  %v3746_v8 = vrot.slane %v3735_v32, 4 }
 0x565   :  { %v5636_v30 = vpop.f32.mrb[24].mxu0 }
 0x566   :  { %3759 = vrot.lane.b32.xlu1 %v3758_v55, %s5795_s26  ;;  %v3688_v47 = vpop.f32.mrb[25].mxu0 }
 0x567   :  { %v5637_v2 = vpop.f32.mrb[26].mxu0 }
 0x568   :  { %v3738_v38 = vpack.c.bf16 %v5637_v2, %v5636_v30  ;;  %v3691_v54 = vpop.f32.mrb[27].mxu0 }
 0x569   :  { %v3737_v31 = vpack.c.bf16 %v3691_v54, %v3688_v47 }
 0x56a   :  { %3747 = vrot.lane.b32.xlu1 %v3746_v8, %s5791_s22  ;;  %v3782_v61 = vrot.slane %v3738_v38, 4 }
 0x56b   :  { %v3770_v45 = vrot.slane %v3737_v31, 4 }
 0x56d   :  { %v5640_v7 = vpop.f32.mrb[28].mxu0 }
 0x56e   :  { %3777 = vrot.lane.b32.xlu1 %v3738_v38, %s5801_s13  ;;  %v3704_v48 = vpop.f32.mrb[29].mxu0 }
 0x56f   :  { %v5641_v56 = vpop.f32.mrb[30].mxu0 }
 0x570   :  { %v3740_v18 = vpack.c.bf16 %v5641_v56, %v5640_v7  ;;  %v3707_v46 = vpop.f32.mrb[31].mxu0  ;;  %v4065_v56 = vmul.u32 2, %v6679_v25 }
 0x571   :  { %v3739_v11 = vpack.c.bf16 %v3707_v46, %v3704_v48  ;;  %v5249_v48 = vadd.s32 4294967295, %v6687_v43  ;;  %v5265_v46 = vadd.s32 4294967295, %v6695_v27 }
 0x572   :  { %3765 = vrot.lane.b32.xlu1 %v3737_v31, %s5797_s28  ;;  %3796 = vrot.lane.b32.xlu0 %v3740_v18, %s5793_s24  ;;  %v3800_v23 = vrot.slane %v3740_v18, 4  ;;  %v5264_v18 = vadd.s32 4294967295, %v6693_v10  ;;  %v5805_v10 = vmov 0  }
 0x573   :  { %3788 = vst.msk [vmem:[#allocation2 + $0x8] sm:$0xf] %vm3743_vm7, %v3739_v11  ;;  %v3790_v0 = vrot.slane %v3739_v11, 4  ;;  %v4081_v12 = vadd.s32 %v5249_v48, %v4065_v56  ;;  %vm4129_vm15 = vcmp.ge.s32.totalorder %v5249_v48, 0  ;;  %vm4145_vm1 = vcmp.lt.s32.totalorder %v5249_v48, 2  ;;  %v8405_v48 = vld [vmem:[#allocation10_spill] sm:$0xff] }
 0x574   :  { %vm4176_vm14 = vcmp.ge.s32.totalorder %v5264_v18, 0  ;;  %v4096_v11 = vmul.u32 2, %v4080_v5  ;;  %vm4177_vm5 = vcmp.ge.s32.totalorder %v5265_v46, 0  ;;  %vm4161_vm11 = vmand %vm4129_vm15, %vm4145_vm1  ;;  %vm4208_vm7 = vcmp.lt.s32.totalorder %v5264_v18, 2  ;;  %v8408_v5 = vld [vmem:[#allocation19_spill] sm:$0xff] }
 0x575   :  { %v5644_v9 = vpop.f32.mrb[32].mxu0  ;;  %v4069_v21 = vmul.u32 2, %v8405_v48 }
 0x576   :  { %3771 = vrot.lane.b32.xlu1 %v3770_v45, %s5799_s30  ;;  %3801 = vrot.lane.b32.xlu0 %v3800_v23, %s5795_s26  ;;  %v3720_v39 = vpop.f32.mrb[33].mxu0  ;;  %v4097_v45 = vmul.u32 2, %v4081_v12  ;;  %v4112_v37 = vadd.s32 %v5264_v18, %v4096_v11  ;;  %v5254_v12 = vadd.s32 4294967295, %v8408_v5  ;;  %v8435_v5 = vld [vmem:[#allocation24_spill] sm:$0xff] }
 0x577   :  { %v5645_v17 = vpop.f32.mrb[34].mxu0 }
 0x578   :  { %v3742_v50 = vpack.c.bf16 %v5645_v17, %v5644_v9  ;;  %v3723_v59 = vpop.f32.mrb[35].mxu0  ;;  %v4113_v43 = vadd.s32 %v5265_v46, %v4097_v45  ;;  %vm4272_vm10 = vcmp.eq.s32.totalorder %v5959_v22, %v4112_v37 }
 0x579   :  { %v3741_v62 = vpack.c.bf16 %v3723_v59, %v3720_v39  ;;  %v8388_v39 = vld [vmem:[#allocation11_spill] sm:$0xff] }
 0x57a   :  { %3783 = vrot.lane.b32.xlu1 %v3782_v61, %s5803_s21  ;;  %3791 = vrot.lane.b32.xlu0 %v3790_v0, %s5791_s22  ;;  %v3820_v53 = vrot.slane %v3742_v50, 4  ;;  %vm4273_vm15 = vcmp.eq.s32.totalorder %v5959_v22, %v4113_v43  ;;  %v5266_v17 = vadd.s32 4294967295, %v8388_v39  ;;  %v8389_v61 = vld [vmem:[#allocation7_spill] sm:$0xff]  ;;  %v8411_v43 = vld [vmem:[#allocation20_spill] sm:$0xff] }
 0x57b   :  { %v3810_v33 = vrot.slane %v3741_v62, 4  ;;  %v4066_v0 = vmul.u32 2, %v8389_v61 }
 0x57d   :  { %v4082_v29 = vadd.s32 %v5250_v57, %v4066_v0 }
 0x57e   :  { %3816 = vrot.lane.b32.xlu0 %v3742_v50, %s5801_s13  ;;  %v8390_v50 = vld [vmem:[#allocation12_spill] sm:$0xff] }
 0x57f   :  { %v5267_v59 = vadd.s32 4294967295, %v8390_v50 }
 0x582   :  { %3806 = vrot.lane.b32.xlu0 %v3741_v62, %s5797_s28  ;;  %v8391_v62 = vld [vmem:[#allocation8_spill] sm:$0xff] }
 0x583   :  { %v4067_v20 = vmul.u32 2, %v8391_v62 }
 0x585   :  { %v4083_v4 = vadd.s32 %v5251_v26, %v4067_v20  ;;  %v8446_v20 = vld [vmem:[#allocation31_spill] sm:$0xff] }
 0x586   :  { %3811 = vrot.lane.b32.xlu0 %v3810_v33, %s5799_s30 }
 0x58a   :  { %3821 = vrot.lane.b32.xlu0 %v3820_v53, %s5803_s21 }
 0x5d4   :  { %v3754_v41 = vpop.permute.xlu1 %3753 }
 0x5d8   :  { %v3760_v42 = vpop.permute.xlu1 %3759 }
 0x5dc   :  { %v3748_v32 = vpop.permute.xlu1 %3747 }
 0x5dd   :  { %3751 = vst.msk [vmem:[#allocation2] sm:$0xf] %vm3750_vm0, %v3748_v32  ;;  %v4098_v32 = vmul.u32 2, %v4082_v29  ;;  %v8420_v29 = vld [vmem:[#allocation15_spill] sm:$0xff] }
 0x5de   :  { %3757 = vst.msk [vmem:[#allocation2] sm:$0xf] %vm3756_vm3, %v3754_v41 }
 0x5df   :  { %3763 = vst.msk [vmem:[#allocation2] sm:$0xf] %vm3762_vm12, %v3760_v42  ;;  %v7459_v11 = vadd.s32 %v5266_v17, %v4098_v32 }
 0x5e0   :  { %v3778_v55 = vpop.permute.xlu1 %3777 }
 0x5e4   :  { %v3766_v30 = vpop.permute.xlu1 %3765  ;;  %v3797_v6 = vpop.permute.xlu0 %3796 }
 0x5e5   :  { %3769 = vst.msk [vmem:[#allocation2] sm:$0xf] %vm3768_vm6, %v3766_v30 }
 0x5e8   :  { %v3772_v47 = vpop.permute.xlu1 %3771  ;;  %v3802_v34 = vpop.permute.xlu0 %3801 }
 0x5e9   :  { %3775 = vst.msk [vmem:[#allocation2] sm:$0xf] %vm3774_vm8, %v3772_v47  ;;  %v4099_v47 = vmul.u32 2, %v4083_v4  ;;  %v4070_v4 = vmul.u32 2, %v8420_v29 }
 0x5ea   :  { %3781 = vst.msk [vmem:[#allocation2] sm:$0xf] %vm3780_vm9, %v3778_v55  ;;  %v8396_v55 = vld [vmem:[#allocation16_spill] sm:$0xff] }
 0x5eb   :  { %v7429_v30 = vadd.s32 4294967295, %v8396_v55  ;;  %v7461_v45 = vadd.s32 %v5267_v59, %v4099_v47  ;;  %v5263_v55 = vadd.s32 4294967295, %v7122_v15 }
 0x5ec   :  { %v3784_v2 = vpop.permute.xlu1 %3783  ;;  %v3792_v8 = vpop.permute.xlu0 %3791 }
 0x5ed   :  { %3787 = vst.msk [vmem:[#allocation2] sm:$0xf] %vm3786_vm13, %v3784_v2 }
 0x5ee   :  { %3794 = vst.msk [vmem:[#allocation2 + $0x8] sm:$0xf] %vm3750_vm0, %v3792_v8  ;;  %vm4192_vm0 = vmand %vm4160_vm2, %vm4176_vm14 }
 0x5ef   :  { %3799 = vst.msk [vmem:[#allocation2 + $0x8] sm:$0xf] %vm3756_vm3, %v3797_v6  ;;  %vm4209_vm3 = vcmp.lt.s32.totalorder %v5265_v46, 2 }
 0x5f0   :  { %3804 = vst.msk [vmem:[#allocation2 + $0x8] sm:$0xf] %vm3762_vm12, %v3802_v34  ;;  %v3817_v38 = vpop.permute.xlu0 %3816  ;;  %vm4193_vm12 = vmand %vm4161_vm11, %vm4177_vm5  ;;  %v8397_v34 = vld [vmem:[#allocation18_spill] sm:$0xff] }
 0x5f1   :  { %v7432_v2 = vadd.s32 4294967295, %v8397_v34  ;;  %v4086_v34 = vadd.s32 %v5254_v12, %v4070_v4  ;;  %v5258_v4 = vadd.s32 4294967295, %v8446_v20  ;;  %v8496_v20 = vld [vmem:[#allocation3_spill] sm:$0xff] }
 0x5f4   :  { %v3807_v54 = vpop.permute.xlu0 %3806  ;;  %v3825_v7 = vld [vmem:[#allocation2] sm:$0xf] }
 0x5f5   :  { %3809 = vst.msk [vmem:[#allocation2 + $0x8] sm:$0xf] %vm3768_vm6, %v3807_v54  ;;  %vm4240_vm6 = vcmp.lt.s32.totalorder %v6676_v19, 2 }
 0x5f8   :  { %v3812_v31 = vpop.permute.xlu0 %3811 }
 0x5f9   :  { %3814 = vst.msk [vmem:[#allocation2 + $0x8] sm:$0xf] %vm3774_vm8, %v3812_v31  ;;  %vm4224_vm8 = vmand %vm4192_vm0, %vm4208_vm7  ;;  %vm8387_vm7 = vcmask 64512   ;;  %vm4130_vm0 = vcmp.ge.s32.totalorder %v5250_v57, 0 }
 0x5fa   :  { %3819 = vst.msk [vmem:[#allocation2 + $0x8] sm:$0xf] %vm3780_vm9, %v3817_v38  ;;  %vm4241_vm9 = vcmp.lt.s32.totalorder %v6679_v25, 2  ;;  %vm4256_vm4 = vmand %vm4224_vm8, %vm4240_vm6  ;;  %vm4147_vm6 = vcmp.lt.s32.totalorder %v5251_v26, 2 }
 0x5fb   :  { %v4288_v27 = vsel %vm4256_vm4, 1, %v5805_v10  ;;  %vm4179_vm4 = vcmp.ge.s32.totalorder %v5267_v59, 0 }
 0x5fc   :  { %v3822_v63 = vpop.permute.xlu0 %3821  ;;  %vm4304_vm14 = vcmp.eq.s32.totalorder %v4288_v27, 1  ;;  %v5255_v27 = vadd.s32 4294967295, %v8411_v43 }
 0x5fd   :  { %3824 = vst.msk [vmem:[#allocation2 + $0x8] sm:$0xf] %vm3786_vm13, %v3822_v63  ;;  %vm4225_vm13 = vmand %vm4193_vm12, %vm4209_vm3  ;;  %vm4146_vm3 = vcmp.lt.s32.totalorder %v5250_v57, 2  ;;  %vm4131_vm12 = vcmp.ge.s32.totalorder %v5251_v26, 0  ;;  %v8414_v26 = vld [vmem:[#allocation21_spill] sm:$0xff] }
 0x5fe   :  { %vm4257_vm1 = vmand %vm4225_vm13, %vm4241_vm9  ;;  %vm4178_vm9 = vcmp.ge.s32.totalorder %v5266_v17, 0  ;;  %v7480_v39 = vadd.s32 4294967295, %v8414_v26 }
 0x5ff   :  { %v4289_v23 = vsel %vm4257_vm1, 1, %v5805_v10  ;;  %vm4320_vm5 = vmand %vm4304_vm14, %vm4272_vm10  ;;  %vm4210_vm1 = vcmp.lt.s32.totalorder %v5266_v17, 2  ;;  %vm4211_vm14 = vcmp.lt.s32.totalorder %v5267_v59, 2  ;;  %v8415_v17 = vld [vmem:[#allocation22_spill] sm:$0xff] }
 0x600   :  { %vm4305_vm2 = vcmp.eq.s32.totalorder %v4289_v23, 1  ;;  %v4336_v19 = vsel %vm4320_vm5, 1.0, %v8260_v13  ;;  %vm4162_vm8 = vmand %vm4130_vm0, %vm4146_vm3  ;;  %vm4148_vm5 = vcmp.lt.s32.totalorder %v5252_v16, 2  ;;  %vm4133_vm0 = vcmp.ge.s32.totalorder %v5253_v36, 0 }
 0x601   :  { %vm4321_vm11 = vmand %vm4305_vm2, %vm4273_vm15  ;;  %vm4132_vm2 = vcmp.ge.s32.totalorder %v5252_v16, 0  ;;  %vm4149_vm3 = vcmp.lt.s32.totalorder %v5253_v36, 2 }
 0x602   :  { %v4337_v25 = vsel %vm4321_vm11, 1.0, %v8260_v13  ;;  %vm4163_vm13 = vmand %vm4131_vm12, %vm4147_vm6  ;;  %vm8398_vm11 = vcmask 261120   ;;  %vm4242_vm6 = vcmp.lt.s32.totalorder %v8389_v61, 2  ;;  %v7483_v61 = vadd.s32 4294967295, %v8415_v17 }
 0x603   :  { %v4352_v9 = vpack.c.bf16 %v4337_v25, %v4336_v19  ;;  %vm7422_vm10 = vmand %vm4162_vm8, %vm4178_vm9 }
 0x604   :  { %v3826_v3 = vld [vmem:[#allocation2 + $0x8] sm:$0xf]  ;;  %vm4195_vm15 = vmand %vm4163_vm13, %vm4179_vm4  ;;  %vm4180_vm13 = vcmp.ge.s32.totalorder %v7429_v30, 0 }
 0x605   :  { %3987 = vmatprep.mubr.bf16.mxu0 %v3826_v3  ;;  %vm7444_vm12 = vmand %vm4195_vm15, %vm4211_vm14  ;;  %v8403_v3 = vld [vmem:[#allocation9_spill] sm:$0xff] }
 0x606   :  { %3988 = vmatmul.mubr.bf16.vlgmr.msra.gmra.mrb[36].mxu0 %v3825_v7  ;;  %v4068_v7 = vmul.u32 2, %v8403_v3  ;;  %vm8404_vm8 = vmmov %vm8398_vm11 }
 0x607   :  { %5648 = vmatprep.mubr.msk.bf16.mxu0 %vm8387_vm7, %v4352_v9  ;;  %vm7440_vm7 = vmand %vm7422_vm10, %vm4210_vm1  ;;  %vm4181_vm10 = vcmp.ge.s32.totalorder %v7432_v2, 0  ;;  %vm4243_vm1 = vcmp.lt.s32.totalorder %v8391_v62, 2  ;;  %v4085_v9 = vadd.s32 %v5253_v36, %v4069_v21  ;;  %v8433_v21 = vld [vmem:[#allocation30_spill] sm:$0xff] }
 0x608   :  { %vm7452_vm9 = vmand %vm4132_vm2, %vm4148_vm5  ;;  %v4084_v25 = vadd.s32 %v5252_v16, %v4068_v7  ;;  %vm4212_vm2 = vcmp.lt.s32.totalorder %v7429_v30, 2  ;;  %v8432_v7 = vld [vmem:[#allocation27_spill] sm:$0xff]  ;;  %v5273_v56 = vadd.s32 4294967295, %v8433_v21 }
 0x609   :  { %vm4165_vm4 = vmand %vm4133_vm0, %vm4149_vm3  ;;  %vm4134_vm0 = vcmp.ge.s32.totalorder %v5254_v12, 0  ;;  %vm4150_vm3 = vcmp.lt.s32.totalorder %v5254_v12, 2  ;;  %v4101_v36 = vmul.u32 2, %v4085_v9  ;;  %v4073_v12 = vmul.u32 2, %v8435_v5 }
 0x60a   :  { %vm7466_vm15 = vmand %vm7440_vm7, %vm4242_vm6  ;;  %vm4274_vm6 = vcmp.eq.s32.totalorder %v5959_v22, %v7459_v11  ;;  %v4100_v28 = vmul.u32 2, %v4084_v25 }
 0x60b   :  { %vm4196_vm14 = vmand %vm7452_vm9, %vm4180_vm13  ;;  %vm4135_vm9 = vcmp.ge.s32.totalorder %v5255_v27, 0  ;;  %vm4151_vm13 = vcmp.lt.s32.totalorder %v5255_v27, 2  ;;  %v4290_v16 = vsel %vm7466_vm15, 1, %v5805_v10  ;;  %v4117_v26 = vadd.s32 %v7432_v2, %v4101_v36 }
 0x60c   :  { %vm7474_vm5 = vmand %vm4165_vm4, %vm4181_vm10  ;;  %vm4244_vm4 = vcmp.lt.s32.totalorder %v8403_v3, 2  ;;  %vm4245_vm10 = vcmp.lt.s32.totalorder %v8405_v48, 2 }
 0x60d   :  { %vm7489_vm7 = vmand %vm7444_vm12, %vm4243_vm1 }
 0x60e   :  { %vm4166_vm1 = vmand %vm4134_vm0, %vm4150_vm3  ;;  %vm4214_vm3 = vcmp.lt.s32.totalorder %v7480_v39, 2  ;;  %v4291_v57 = vsel %vm7489_vm7, 1, %v5805_v10 }
 0x60f   :  { %vm4167_vm15 = vmand %vm4135_vm9, %vm4151_vm13  ;;  %vm4215_vm9 = vcmp.lt.s32.totalorder %v7483_v61, 2 }
 0x6d9   :  { %v5422_v1 = vpop.f32.mrb[36].mxu0 }
 0x6da   :  { %v5423_v33 = vpop.f32.mrb[37].mxu0 }
 0x6db   :  { %v7426_v41 = vadd.f32 %v5423_v33, %v5422_v1  ;;  %v5425_v42 = vpop.f32.mrb[38].mxu0 }
 0x6dc   :  { %v5426_v6 = vpop.f32.mrb[39].mxu0  ;;  %v8423_v42 = vld [vmem:[#allocation25_spill] sm:$0xff] }
 0x6dd   :  { %v3997_v8 = vsel %vm8398_vm11, %v7426_v41, 0.0  ;;  %v4005_v38 = vmul.f32 %v7426_v41, %v7426_v41  ;;  %vm4213_vm11 = vcmp.lt.s32.totalorder %v7432_v2, 2  ;;  %v5256_v32 = vadd.s32 4294967295, %v8423_v42  ;;  %v8426_v6 = vld [vmem:[#allocation17_spill] sm:$0xff] }
 0x6de   :  { %v3998_v31 = vrot.slane %v3997_v8, 4  ;;  %vm7507_vm12 = vmand %vm7474_vm5, %vm4213_vm11  ;;  %vm4306_vm5 = vcmp.eq.s32.totalorder %v4290_v16, 1  ;;  %v4071_v47 = vmul.u32 2, %v8426_v6 }
 0x6df   :  { %v4006_v40 = vsel %vm8404_vm8, %v4005_v38, 0.0  ;;  %vm7495_vm8 = vmand %vm4196_vm14, %vm4212_vm2  ;;  %vm4182_vm14 = vcmp.ge.s32.totalorder %v7480_v39, 0  ;;  %vm4183_vm2 = vcmp.ge.s32.totalorder %v7483_v61, 0 }
 0x6e0   :  { %v3999_v18 = vadd.f32 %v3998_v31, %v3997_v8  ;;  %v4007_v46 = vrot.slane %v4006_v40, 4  ;;  %vm7519_vm11 = vmand %vm7495_vm8, %vm4244_vm4  ;;  %v8427_v8 = vld [vmem:[#allocation26_spill] sm:$0xff]  ;;  %vm4136_vm4 = vcmp.ge.s32.totalorder %v5256_v32, 0  ;;  %v4087_v25 = vadd.s32 %v5255_v27, %v4071_v47  ;;  %v5753_v47 = vld [vmem:[%s8196_s4 + $0x48] sm:$0xff]  }
 0x6e1   :  { %v5257_v38 = vadd.s32 4294967295, %v8427_v8  ;;  %vm7527_vm0 = vmand %vm4166_vm1, %vm4182_vm14  ;;  %vm4152_vm1 = vcmp.lt.s32.totalorder %v5256_v32, 2  ;;  %v4292_v16 = vsel %vm7519_vm11, 1, %v5805_v10 }
 0x6e2   :  { %v4000_v23 = vrot.slane %v3999_v18, 2  ;;  %v4008_v19 = vadd.f32 %v4007_v46, %v4006_v40  ;;  %vm7533_vm8 = vmand %vm4167_vm15, %vm4183_vm2  ;;  %v5272_v40 = vadd.s32 4294967295, %v8432_v7  ;;  %v4103_v2 = vmul.u32 2, %v4087_v25  ;;  %v8466_v7 = vld [vmem:[#allocation35_spill] sm:$0xff] }
 0x6e3   :  { %vm7547_vm13 = vmand %vm7507_vm12, %vm4245_vm10  ;;  %vm4137_vm15 = vcmp.ge.s32.totalorder %v5257_v38, 0  ;;  %vm4153_vm2 = vcmp.lt.s32.totalorder %v5257_v38, 2  ;;  %v7663_v21 = vadd.s32 4294967295, %v8466_v7 }
 0x6e4   :  { %v4001_v0 = vadd.f32 %v4000_v23, %v3999_v18  ;;  %v4009_v50 = vrot.slane %v4008_v19, 2  ;;  %v8434_v18 = vld [vmem:[#allocation23_spill] sm:$0xff]  ;;  %vm7554_vm14 = vmand %vm7527_vm0, %vm4214_vm3  ;;  %vm4247_vm3 = vcmp.lt.s32.totalorder %v8426_v6, 2  ;;  %v4293_v6 = vsel %vm7547_vm13, 1, %v5805_v10  ;;  %v5766_v23 = vld [vmem:[%s8196_s4 + $0x38] sm:$0xff]  }
 0x6e5   :  { %v4072_v46 = vmul.u32 2, %v8434_v18  ;;  %vm7567_vm10 = vmand %vm4306_vm5, %vm4274_vm6  ;;  %vm4184_vm6 = vcmp.ge.s32.totalorder %v5272_v40, 0  ;;  %v7637_v8 = vadd.s32 %v7483_v61, %v4103_v2  ;;  %v5247_v2 = vld [vmem:[%s8193_s6 + $0x4] ss:$0 sm:$0xff] }
 0x6e6   :  { %v4002_v62 = vrot.slane %v4001_v0, 1  ;;  %v4010_v52 = vadd.f32 %v4009_v50, %v4008_v19  ;;  %v4116_v19 = vadd.s32 %v7429_v30, %v4100_v28  ;;  %v8440_v30 = vmov 0  ;;  %vm7575_vm0 = vmand %vm7533_vm8, %vm4215_vm9  ;;  %v8452_v28 = vld [vmem:[#allocation32_spill] sm:$0xff] }
 0x6e7   :  { %v8441_v30 = vsel %vm7567_vm10, 4294967295, %v8440_v30  ;;  %v4088_v17 = vadd.s32 %v5256_v32, %v4072_v46  ;;  %vm4168_vm7 = vmand %vm4136_vm4, %vm4152_vm1  ;;  %v4102_v50 = vmul.u32 2, %v4086_v34  ;;  %vm4185_vm9 = vcmp.ge.s32.totalorder %v5273_v56, 0 }
 0x6e8   :  { %v4003_v33 = vadd.f32 %v4002_v62, %v4001_v0  ;;  %v4011_v53 = vrot.slane %v4010_v52, 1  ;;  %v4089_v0 = vadd.s32 %v5257_v38, %v4073_v12  ;;  %vm7584_vm5 = vmand %vm4137_vm15, %vm4153_vm2  ;;  %vm4307_vm8 = vcmp.eq.s32.totalorder %v4291_v57, 1  ;;  %v8497_v62 = vld [vmem:[#allocation4_spill] sm:$0xff] }
 0x6e9   :  { %vm4276_vm12 = vcmp.eq.s32.totalorder %v5959_v22, %v4116_v19  ;;  %vm8447_vm10 = vcmp.lt.s32.totalorder %v8420_v29, 2  ;;  %vm7602_vm1 = vmand %vm4168_vm7, %vm4184_vm6  ;;  %vm4216_vm15 = vcmp.lt.s32.totalorder %v5272_v40, 2  ;;  %v7607_v36 = vadd.s32 4294967295, %v8452_v28 }
 0x6ea   :  { %v7525_v54 = vmul.f32 0.125, %v4003_v33  ;;  %v4012_v31 = vadd.f32 %v4011_v53, %v4010_v52  ;;  %vm7595_vm4 = vmand %vm7554_vm14, %vm8447_vm10  ;;  %v4104_v29 = vmul.u32 2, %v4088_v17  ;;  %v4105_v33 = vmul.u32 2, %v4089_v0  ;;  %v8453_v53 = vld [vmem:[#allocation33_spill] sm:$0xff] }
 0x6eb   :  { %vm4201_vm14 = vmand %vm7584_vm5, %vm4185_vm9  ;;  %vm4217_vm2 = vcmp.lt.s32.totalorder %v5273_v56, 2  ;;  %v7612_v42 = vadd.s32 4294967295, %v8453_v53  ;;  %v7615_v32 = vadd.s32 %v7480_v39, %v4102_v50  ;;  %vm4138_vm10 = vcmp.ge.s32.totalorder %v5258_v4, 0  ;;  %v8458_v39 = vld [vmem:[#allocation34_spill] sm:$0xff] }
 0x6ec   :  { %v4013_v37 = vmul.f32 0.125, %v4012_v31  ;;  %v4014_v43 = vmul.f32 %v7525_v54, %v7525_v54  ;;  %vm7619_vm11 = vmand %vm7575_vm0, %vm4247_vm3  ;;  %vm4154_vm7 = vcmp.lt.s32.totalorder %v5258_v4, 2  ;;  %vm4308_vm6 = vcmp.eq.s32.totalorder %v4292_v16, 1 }
 0x6ed   :  { %vm7628_vm5 = vmand %vm7602_vm1, %vm4216_vm15  ;;  %vm4248_vm9 = vcmp.lt.s32.totalorder %v8434_v18, 2  ;;  %v7634_v34 = vadd.s32 4294967295, %v8458_v39  ;;  %vm8461_vm1 = vcmp.eq.s32.totalorder %v5959_v22, %v7461_v45  ;;  %v7653_v63 = vadd.s32 %v5272_v40, %v4104_v29  ;;  %v5754_v39 = vld [vmem:[%s8196_s4 + $0x8] sm:$0xff]  }
 0x6ee   :  { %v4015_v48 = vsub.f32 %v4013_v37, %v4014_v43  ;;  %vm7639_vm0 = vmand %vm4201_vm14, %vm4217_vm2  ;;  %v7655_v61 = vadd.s32 %v5273_v56, %v4105_v33  ;;  %vm4186_vm2 = vcmp.ge.s32.totalorder %v7612_v42, 0  ;;  %v8467_v45 = vmov 0  ;;  %v8471_v56 = vld [vmem:[#allocation28_spill] sm:$0xff]  ;;  %v8477_v37 = vld [vmem:[#allocation29_spill] sm:$0xff] }
 0x6ef   :  { %vm7649_vm15 = vmand %vm4307_vm8, %vm8461_vm1  ;;  %v4074_v46 = vmul.u32 2, %v8471_v56  ;;  %vm8472_vm1 = vnez %v8441_v30  ;;  %vm8474_vm3 = vcmp.ge.s32.totalorder %v7607_v36, 0  ;;  %v4075_v43 = vmul.u32 2, %v8477_v37 }
 0x6f0   :  { %v4016_v11 = vmax.f32 %v4015_v48, 0.0  ;;  %vm7657_vm14 = vmand %vm4138_vm10, %vm4154_vm7  ;;  %vm4249_vm10 = vcmp.lt.s32.totalorder %v8435_v5, 2  ;;  %v7686_v12 = vsel %vm8472_vm1, 1.0, %v8260_v13  ;;  %v5261_v5 = vadd.s32 4294967295, %v6981_v35 }
 0x6f1   :  { %vm7669_vm8 = vmand %vm4308_vm6, %vm4276_vm12  ;;  %vm8473_vm6 = vcmp.lt.s32.totalorder %v7607_v36, 2  ;;  %v7713_v19 = vadd.s32 4294967295, %v6983_v44  ;;  %vm8481_vm12 = vcmp.eq.s32.totalorder %v4293_v6, 1  ;;  %v4294_v44 = vsel %vm7595_vm4, 1, %v5805_v10 }
 0x6f2   :  { %v4018_v52 = vadd.f32 1e-05, %v4016_v11  ;;  %v8468_v45 = vsel %vm7669_vm8, 4294967295, %v8467_v45  ;;  %vm7678_vm7 = vmand %vm7628_vm5, %vm4248_vm9  ;;  %vm4156_vm8 = vcmp.lt.s32.totalorder %v7663_v21, 2  ;;  %v4090_v9 = vadd.s32 %v5258_v4, %v4074_v46 }
 0x6f3   :  { %vm7694_vm13 = vmand %vm8474_vm3, %vm8473_vm6  ;;  %vm8480_vm6 = vcmp.eq.s32.totalorder %v5959_v22, %v4117_v26  ;;  %vm4140_vm3 = vcmp.ge.s32.totalorder %v7663_v21, 0  ;;  %v7747_v57 = vadd.s32 4294967295, %v6994_v24  ;;  %v4017_v30 = vsub.f32 %v7426_v41, %v7525_v54  ;;  %v5246_v24 = vld [vmem:[%s8193_s6 + $0x3] ss:$0 sm:$0xff] }
 0x6f4   :  { %5785 = vrsqrt.f32 %v4018_v52  ;;  %vm7707_vm1 = vmand %vm7657_vm14, %vm4186_vm2  ;;  %v4295_v27 = vsel %vm7619_vm11, 1, %v5805_v10  ;;  %vm8489_vm4 = vcmp.lt.s32.totalorder %v7612_v42, 2  ;;  %v4296_v41 = vsel %vm7678_vm7, 1, %v5805_v10 }
 0x6f5   :  { %vm7718_vm5 = vmand %vm8481_vm12, %vm8480_vm6  ;;  %vm4219_vm12 = vcmp.lt.s32.totalorder %v7634_v34, 2  ;;  %vm4141_vm6 = vcmp.ge.s32.totalorder %v5261_v5, 0  ;;  %v4091_v0 = vadd.s32 %v7607_v36, %v4075_v43  ;;  %v4076_v4 = vmul.u32 2, %v8496_v20 }
 0x6f6   :  { %vm7724_vm9 = vmand %vm7639_vm0, %vm4249_vm10  ;;  %vm8486_vm0 = vcmp.ge.s32.totalorder %v7634_v34, 0  ;;  %v4077_v52 = vmul.u32 2, %v8497_v62  ;;  %vm4312_vm2 = vcmp.eq.s32.totalorder %v4296_v41, 1  ;;  %v5262_v36 = vadd.s32 4294967295, %v7101_v49 }
 0x6f7   :  { %vm7741_vm10 = vmand %vm7694_vm13, %vm8486_vm0  ;;  %vm4157_vm0 = vcmp.lt.s32.totalorder %v5261_v5, 2  ;;  %v4297_v54 = vsel %vm7724_vm9, 1, %v5805_v10  ;;  %vm4250_vm9 = vcmp.lt.s32.totalorder %v8471_v56, 2  ;;  %v4339_v29 = vsel %vm7649_vm15, 1.0, %v8260_v13  ;;  %v5762_v56 = vld [vmem:[%s8196_s4 + $0x28] sm:$0xff]  }
 0x6f8   :  { %vm7758_vm13 = vmand %vm7707_vm1, %vm8489_vm4  ;;  %vm4188_vm1 = vcmp.ge.s32.totalorder %v7713_v19, 0  ;;  %vm4310_vm4 = vcmp.eq.s32.totalorder %v4294_v44, 1  ;;  %vm4313_vm14 = vcmp.eq.s32.totalorder %v4297_v54, 1  ;;  %v4106_v33 = vmul.u32 2, %v4090_v9 }
 0x6f9   :  { %vm7776_vm11 = vmand %vm4140_vm3, %vm4156_vm8  ;;  %vm8505_vm15 = vcmp.eq.s32.totalorder %v5959_v22, %v7615_v32  ;;  %v4107_v15 = vmul.u32 2, %v4091_v0  ;;  %v8518_v38 = vmov 0  ;;  %v4092_v31 = vadd.s32 %v7663_v21, %v4076_v4  ;;  %v5756_v32 = vld [vmem:[%s8196_s4 + $0x10] sm:$0xff]  }
 0x6fa   :  { %vm7785_vm7 = vmand %vm7741_vm10, %vm4219_vm12  ;;  %vm4189_vm10 = vcmp.ge.s32.totalorder %v7747_v57, 0  ;;  %v4093_v3 = vadd.s32 %v5261_v5, %v4077_v52  ;;  %v4341_v40 = vsel %vm7718_vm5, 1.0, %v8260_v13  ;;  %v4078_v18 = vmul.u32 2, %v6972_v14 }
 0x6fb   :  { %vm7797_vm3 = vmand %vm4141_vm6, %vm4157_vm0  ;;  %v4353_v5 = vpack.c.bf16 %v4339_v29, %v7686_v12  ;;  %v4079_v43 = vmul.u32 2, %v6997_v51  ;;  %v4123_v25 = vadd.s32 %v7634_v34, %v4107_v15  ;;  %v8536_v34 = vmov 0  ;;  %v5755_v15 = vld [vmem:[%s8196_s4 + $0x50] sm:$0xff]  }
 0x6fc   :  { %vm7807_vm8 = vmand %vm7776_vm11, %vm4188_vm1  ;;  %vm8504_vm11 = vnez %v8468_v45  ;;  %v7891_v45 = vadd.s32 4294967295, %v7223_v60  ;;  %v4109_v44 = vmul.u32 2, %v4093_v3  ;;  %v4094_v48 = vadd.s32 %v5262_v36, %v4078_v18  ;;  %v5764_v18 = vld [vmem:[%s8196_s4 + $0x30] sm:$0xff]  }
 0x6fd   :  { %vm7820_vm0 = vmand %vm7758_vm13, %vm4250_vm9  ;;  %v4340_v49 = vsel %vm8504_vm11, 1.0, %v8260_v13  ;;  %vm8508_vm13 = vcmp.eq.s32.totalorder %v5959_v22, %v7637_v8  ;;  %vm8509_vm9 = vcmp.eq.s32.totalorder %v4295_v27, 1  ;;  %v8515_v8 = vmov 0 }
 0x6fe   :  { %v5786_v17 = vpop.eup %5785  ;;  %vm7832_vm1 = vmand %vm4310_vm4, %vm8505_vm15  ;;  %vm4221_vm4 = vcmp.lt.s32.totalorder %v7747_v57, 2  ;;  %vm8514_vm15 = vcmp.eq.s32.totalorder %v5959_v22, %v7653_v63  ;;  %v4298_v46 = vsel %vm7820_vm0, 1, %v5805_v10  ;;  %v4354_v12 = vpack.c.bf16 %v4341_v40, %v4340_v49  ;;  %v5752_v49 = vld [vmem:[%s8196_s4] sm:$0xff]   ;;  %v5761_v40 = vld [vmem:[%s8196_s4 + $0x68] sm:$0xff]  }
 0x6ff   :  { %v4020_v50 = vmul.f32 %v5786_v17, %v4017_v30  ;;  %vm7840_vm6 = vmand %vm8509_vm9, %vm8508_vm13  ;;  %vm8517_vm13 = vcmp.eq.s32.totalorder %v5959_v22, %v7655_v61  ;;  %v7880_v61 = vadd.s32 4294967295, %v7211_v58  ;;  %v4122_v58 = vadd.s32 %v7612_v42, %v4106_v33  ;;  %v5760_v63 = vld [vmem:[%s8196_s4 + $0x20] sm:$0xff]  }
 0x700   :  { %vm7848_vm11 = vmand %vm7797_vm3, %vm4189_vm10  ;;  %vm8520_vm3 = vcmp.lt.s32.totalorder %v7713_v19, 2  ;;  %v4095_v26 = vadd.s32 %v5263_v55, %v4079_v43  ;;  %v4125_v41 = vadd.s32 %v7747_v57, %v4109_v44  ;;  %v4342_v54 = vsel %vm7832_vm1, 1.0, %v8260_v13 }
 0x701   :  { %v4025_v1 = vmul.f32 %v5246_v24, %v4020_v50  ;;  %vm7857_vm12 = vmand %vm4312_vm2, %vm8514_vm15  ;;  %vm4252_vm2 = vcmp.lt.s32.totalorder %v8496_v20, 2  ;;  %vm4190_vm0 = vcmp.ge.s32.totalorder %v7880_v61, 0  ;;  %v4343_v0 = vsel %vm7840_vm6, 1.0, %v8260_v13 }
 0x702   :  { %v8516_v8 = vsel %vm7857_vm12, 4294967295, %v8515_v8  ;;  %vm7865_vm9 = vmand %vm4313_vm14, %vm8517_vm13  ;;  %vm8523_vm14 = vcmp.lt.s32.totalorder %v8477_v37, 2  ;;  %vm4158_vm13 = vcmp.lt.s32.totalorder %v5262_v36, 2  ;;  %v4108_v37 = vmul.u32 2, %v4092_v31  ;;  %v5759_v31 = vld [vmem:[%s8196_s4 + $0x60] sm:$0xff]  }
 0x703   :  { %v4030_v6 = vadd.f32 %v5247_v2, %v4025_v1  ;;  %v8519_v38 = vsel %vm7865_vm9, 4294967295, %v8518_v38  ;;  %vm7874_vm10 = vmand %vm7807_vm8, %vm8520_vm3  ;;  %vm8533_vm8 = vcmask 1043456   ;;  %vm4191_vm9 = vcmp.ge.s32.totalorder %v7891_v45, 0 }
 0x704   :  { %vm7886_vm15 = vmand %vm7785_vm7, %vm8523_vm14  ;;  %vm4143_vm7 = vcmp.ge.s32.totalorder %v5263_v55, 0  ;;  %vm4159_vm14 = vcmp.lt.s32.totalorder %v5263_v55, 2  ;;  %v4124_v27 = vadd.s32 %v7713_v19, %v4108_v37  ;;  %vm4283_vm12 = vcmp.eq.s32.totalorder %v5959_v22, %v4123_v25 }
 0x705   :  { %v4031_v7 = vmax.f32 %v4030_v6, 0.0  ;;  %vm7901_vm3 = vmand %vm7848_vm11, %vm4221_vm4  ;;  %vm8530_vm11 = vcmp.ge.s32.totalorder %v5262_v36, 0  ;;  %v4299_v9 = vsel %vm7886_vm15, 1, %v5805_v10  ;;  %vm8548_vm1 = vnez %v8519_v38  ;;  %v5758_v38 = vld [vmem:[%s8196_s4 + $0x18] sm:$0xff]  }
 0x706   :  { %vm7913_vm5 = vmand %vm7874_vm10, %vm4252_vm2  ;;  %v4345_v50 = vsel %vm8548_vm1, 1.0, %v8260_v13  ;;  %v4110_v59 = vmul.u32 2, %v4094_v48  ;;  %v4111_v20 = vmul.u32 2, %v4095_v26  ;;  %v4355_v4 = vpack.c.bf16 %v4343_v0, %v4342_v54 }
 0x707   :  { %v4360_v60 = vpack.c.bf16 %v4031_v7, %v4031_v7  ;;  %vm7921_vm4 = vmand %vm8530_vm11, %vm4158_vm13  ;;  %vm4282_vm13 = vcmp.eq.s32.totalorder %v5959_v22, %v4122_v58  ;;  %vm4314_vm11 = vcmp.eq.s32.totalorder %v4298_v46, 1  ;;  %v4300_v19 = vsel %vm7913_vm5, 1, %v5805_v10  ;;  %v5763_v46 = vld [vmem:[%s8196_s4 + $0x70] sm:$0xff]  }
 0x708   :  { %vm8534_vm10 = vmmov %vm8533_vm8  ;;  %vm4254_vm5 = vcmp.lt.s32.totalorder %v6972_v14, 2 }
 0x709   :  { %5707 = vmatprep.subr.msk.bf16.mxu0 %vm8533_vm8, %v4360_v60  ;;  %v4387_v35 = vsel %vm8534_vm10, %v4360_v60, 0  ;;  %vm4175_vm2 = vmand %vm4143_vm7, %vm4159_vm14  ;;  %vm8535_vm8 = vcmp.lt.s32.totalorder %v8497_v62, 2  ;;  %vm4222_vm14 = vcmp.lt.s32.totalorder %v7880_v61, 2  ;;  %v4127_v62 = vadd.s32 %v7891_v45, %v4111_v20 }
 0x70a   :  { %5647 = vmatpush3.bf16.msra.mxu0 %v4387_v35  ;;  %vm7940_vm10 = vmand %vm7901_vm3, %vm8535_vm8  ;;  %vm4223_vm3 = vcmp.lt.s32.totalorder %v7891_v45, 2  ;;  %vm8542_vm8 = vcmask 64512  }
 0x70b   :  { %v8537_v34 = vsel %vm7940_vm10, 4294967295, %v8536_v34  ;;  %vm7946_vm7 = vmand %vm7921_vm4, %vm4190_vm0  ;;  %vm4315_vm10 = vcmp.eq.s32.totalorder %v4299_v9, 1 }
 0x70c   :  { %vm7952_vm15 = vmand %vm4175_vm2, %vm4191_vm9  ;;  %vm8546_vm0 = vnez %v8537_v34  ;;  %v5767_v34 = vld [vmem:[%s8196_s4 + $0xc0] sm:$0xff]  }
 0x70d   :  { %5649 = vmatmul.mubr.msk.bf16.vlgmr.msra.gmra.mrb[40].mxu0 %vm8542_vm8, %v4353_v5  ;;  %vm7959_vm4 = vmand %vm4314_vm11, %vm4282_vm13  ;;  %v4301_v11 = vsel %vm8546_vm0, 1, %v5805_v10  ;;  %vm8547_vm13 = vnez %v8516_v8  ;;  %vm4255_vm11 = vcmp.lt.s32.totalorder %v6997_v51, 2  ;;  %v4126_v51 = vadd.s32 %v7880_v61, %v4110_v59  ;;  %v5757_v8 = vld [vmem:[%s8196_s4 + $0x58] sm:$0xff]  }
 0x70e   :  { %vm8545_vm9 = vmmov %vm8542_vm8  ;;  %v4344_v57 = vsel %vm8547_vm13, 1.0, %v8260_v13  ;;  %vm4316_vm8 = vcmp.eq.s32.totalorder %v4300_v19, 1  ;;  %vm4317_vm0 = vcmp.eq.s32.totalorder %v4301_v11, 1  ;;  %v4346_v1 = vsel %vm7959_vm4, 1.0, %v8260_v13  ;;  %v5765_v5 = vld [vmem:[%s8196_s4 + $0x78] sm:$0xff]  }
 0x70f   :  { %5652 = vmatprep.mubr.msk.bf16.mxu0 %vm8545_vm9, %v4354_v12  ;;  %vm4238_vm2 = vmand %vm7946_vm7, %vm4222_vm14  ;;  %vm4284_vm14 = vcmp.eq.s32.totalorder %v5959_v22, %v4124_v27  ;;  %vm4285_vm9 = vcmp.eq.s32.totalorder %v5959_v22, %v4125_v41  ;;  %v4356_v2 = vpack.c.bf16 %v4345_v50, %v4344_v57 }
 0x710   :  { %vm4239_vm6 = vmand %vm7952_vm15, %vm4223_vm3 }
 0x711   :  { %vm7996_vm7 = vmand %vm4315_vm10, %vm4283_vm12  ;;  %vm8551_vm12 = vcmask 64512  }
 0x712   :  { %vm4270_vm13 = vmand %vm4238_vm2, %vm4254_vm5  ;;  %v4347_v28 = vsel %vm7996_vm7, 1.0, %v8260_v13  ;;  %vm4286_vm2 = vcmp.eq.s32.totalorder %v5959_v22, %v4126_v51  ;;  %v4944_v51 = vld [vmem:[%s8197_s5] sm:$0xff] }
 0x713   :  { %vm4271_vm15 = vmand %vm4239_vm6, %vm4255_vm11  ;;  %v4302_v52 = vsel %vm4270_vm13, 1, %v5805_v10  ;;  %vm4287_vm6 = vcmp.eq.s32.totalorder %v5959_v22, %v4127_v62  ;;  %v5751_v22 = vld [vmem:[%s8196_s4 + $0x40] sm:$0xff]   ;;  %v4945_v62 = vld [vmem:[%s8197_s5 + $0x8] sm:$0xff]  ;;  %vm4501_vm13 = vcmask 519424  }
 0x714   :  { %vm4332_vm3 = vmand %vm4316_vm8, %vm4284_vm14  ;;  %v4303_v16 = vsel %vm4271_vm15, 1, %v5805_v10  ;;  %vm4318_vm5 = vcmp.eq.s32.totalorder %v4302_v52, 1  ;;  %v4357_v10 = vpack.c.bf16 %v4347_v28, %v4346_v1  ;;  %5437 = vmatprep.subr.bf16.mxu0 %v5751_v22  ;;  %v4946_v52 = vld [vmem:[%s8197_s5 + $0x10] sm:$0xff]  ;;  %v4947_v1 = vld [vmem:[%s8197_s5 + $0x18] sm:$0xff]  ;;  %vm4507_vm15 = vcmask 781824  }
 0x715   :  { %vm4333_vm1 = vmand %vm4317_vm0, %vm4285_vm9  ;;  %5653 = vmatmul.mubr.msk.bf16.gmra.mrb[44].mxu0 %vm8551_vm12, %v4355_v4  ;;  %v4348_v36 = vsel %vm4332_vm3, 1.0, %v8260_v13  ;;  %vm4319_vm11 = vcmp.eq.s32.totalorder %v4303_v16, 1  ;;  %vm4494_vm0 = vcmask 257024   ;;  %v5696_v16 = vpack.c.bf16 %v4945_v62, %v4944_v51 }
 0x716   :  { %vm8552_vm10 = vmmov %vm8551_vm12  ;;  %v4349_v29 = vsel %vm4333_vm1, 1.0, %v8260_v13  ;;  %5438 = vmatpush3.bf16.msra.mxu0 %v5752_v49  ;;  %v5699_v28 = vpack.c.bf16 %v4947_v1, %v4946_v52  ;;  %vm4513_vm3 = vcmask 1044224   ;;  %v5768_v49 = vld [vmem:[%s8196_s4 + $0x80] sm:$0xff]   ;;  %vm5807_vm1 = vmmov 0  }
 0x717   :  { %5656 = vmatprep.mubr.msk.bf16.mxu0 %vm8552_vm10, %v4356_v2  ;;  %v4358_v33 = vpack.c.bf16 %v4349_v29, %v4348_v36  ;;  %vm4334_vm14 = vmand %vm4318_vm5, %vm4286_vm2  ;;  %5439 = vmatprep.subr.bf16.mxu0 %v5753_v47  ;;  %v5806_v2 = vmov 0.0|0.0   ;;  %vm4908_vm12 = vcmask 523264  }
 0x718   :  { %vm4335_vm8 = vmand %vm4319_vm11, %vm4287_vm6  ;;  %v4350_v53 = vsel %vm4334_vm14, 1.0, %v8260_v13  ;;  %5695 = vmatprep.subr.bf16.mxu1 %v5806_v2  ;;  %5680 = vmatprep.mubr.msk.f32.mxu1 %vm5807_vm1, %v8260_v13 }
 0x719   :  { %vm8553_vm9 = vmmov %vm8552_vm10  ;;  %v4351_v55 = vsel %vm4335_vm8, 1.0, %v8260_v13  ;;  %5697 = vmatpush3.bf16.msra.mxu1 %v5696_v16 }
 0x71a   :  { %vm8554_vm4 = vmmov %vm8553_vm9  ;;  %v4359_v6 = vpack.c.bf16 %v4351_v55, %v4350_v53  ;;  %5440 = vmatpush3.bf16.msra.mxu0 %v5754_v39  ;;  %5698 = vmatprep.subr.bf16.mxu1 %v5806_v2  ;;  %v5769_v39 = vld [vmem:[%s8196_s4 + $0xc8] sm:$0xff]  }
 0x71b   :  { %vm8555_vm7 = vmmov %vm8554_vm4  ;;  %5441 = vmatprep.subr.bf16.mxu0 %v5755_v15 }
 0x71d   :  { %5657 = vmatmul.mubr.msk.bf16.gmra.mrb[48].mxu0 %vm8553_vm9, %v4357_v10  ;;  %5700 = vmatpush3.bf16.msra.mxu1 %v5699_v28 }
 0x71e   :  { %5660 = vmatprep.mubr.msk.bf16.mxu0 %vm8554_vm4, %v4358_v33  ;;  %5442 = vmatpush3.bf16.msra.mxu0 %v5756_v32 }
 0x71f   :  { %5443 = vmatprep.subr.bf16.mxu0 %v5757_v8  ;;  %5701 = vmatprep.subr.bf16.mxu1 %v5806_v2 }
 0x722   :  { %5444 = vmatpush3.bf16.msra.mxu0 %v5758_v38  ;;  %v5770_v38 = vld [vmem:[%s8196_s4 + $0x88] sm:$0xff]  }
 0x723   :  { %5445 = vmatprep.subr.bf16.mxu0 %v5759_v31  ;;  %v5771_v31 = vld [vmem:[%s8196_s4 + $0xd0] sm:$0xff]  }
 0x725   :  { %5661 = vmatmul.mubr.msk.bf16.gmra.mrb[52].mxu0 %vm8555_vm7, %v4359_v6 }
 0x726   :  { %5446 = vmatpush3.bf16.msra.mxu0 %v5760_v63  ;;  %v5772_v63 = vld [vmem:[%s8196_s4 + $0x90] sm:$0xff]  }
 0x727   :  { %5447 = vmatprep.subr.bf16.mxu0 %v5761_v40  ;;  %v5776_v40 = vld [vmem:[%s8196_s4 + $0xa0] sm:$0xff]  }
 0x72a   :  { %5448 = vmatpush3.bf16.msra.mxu0 %v5762_v56 }
 0x72b   :  { %5449 = vmatprep.subr.bf16.mxu0 %v5763_v46  ;;  %v5779_v46 = vld [vmem:[%s8196_s4 + $0xf0] sm:$0xff]  }
 0x72e   :  { %5450 = vmatpush3.bf16.msra.mxu0 %v5764_v18  ;;  %v5781_v18 = vld [vmem:[%s8196_s4 + $0xf8] sm:$0xff]  }
 0x72f   :  { %5451 = vmatprep.subr.bf16.mxu0 %v5765_v5  ;;  %v5782_v5 = vld [vmem:[%s8196_s4 + $0xb8] sm:$0xff]  }
 0x732   :  { %5452 = vmatpush3.bf16.msra.mxu0 %v5766_v23  ;;  %v4949_v23 = vld [vmem:[%s8197_s5 + $0x28] sm:$0xff] }
 0x733   :  { %5459 = vmatprep.subr.bf16.mxu0 %v5767_v34 }
 0x7e0   :  { %v5650_v3 = vpop.f32.mrb[40].mxu0 }
 0x7e1   :  { %v4423_v61 = vpop.f32.mrb[41].mxu0 }
 0x7e2   :  { %v5651_v7 = vpop.f32.mrb[42].mxu0 }
 0x7e3   :  { %v4487_v21 = vpack.c.bf16 %v5651_v7, %v5650_v3  ;;  %v4426_v45 = vpop.f32.mrb[43].mxu0 }
 0x7e4   :  { %v4486_v58 = vpack.c.bf16 %v4426_v45, %v4423_v61  ;;  %v5773_v61 = vld [vmem:[%s8196_s4 + $0xd8] sm:$0xff]   ;;  %v5775_v45 = vld [vmem:[%s8196_s4 + $0xe0] sm:$0xff]  }
 0x7e5   :  { %4504 = vrot.lane.b32.xlu1 %v4487_v21, %s5797_s28  ;;  %v4509_v35 = vrot.slane %v4487_v21, 4  ;;  %v5774_v21 = vld [vmem:[%s8196_s4 + $0x98] sm:$0xff]  }
 0x7e6   :  { %v4497_v60 = vrot.slane %v4486_v58, 4  ;;  %4495 = vst.msk [vmem:[#allocation2] sm:$0xf] %vm4494_vm0, %v4486_v58  ;;  %v5777_v58 = vld [vmem:[%s8196_s4 + $0xe8] sm:$0xff]  }
 0x7e8   :  { %v5654_v42 = vpop.f32.mrb[44].mxu0 }
 0x7e9   :  { %4498 = vrot.lane.b32.xlu1 %v4497_v60, %s5793_s24  ;;  %v4439_v37 = vpop.f32.mrb[45].mxu0  ;;  %v5778_v60 = vld [vmem:[%s8196_s4 + $0xa8] sm:$0xff]  }
 0x7ea   :  { %v5655_v43 = vpop.f32.mrb[46].mxu0 }
 0x7eb   :  { %v4489_v25 = vpack.c.bf16 %v5655_v43, %v5654_v42  ;;  %v4442_v44 = vpop.f32.mrb[47].mxu0  ;;  %v5780_v42 = vld [vmem:[%s8196_s4 + $0xb0] sm:$0xff]   ;;  %v4948_v43 = vld [vmem:[%s8197_s5 + $0x20] sm:$0xff] }
 0x7ec   :  { %v4488_v12 = vpack.c.bf16 %v4442_v44, %v4439_v37  ;;  %v4951_v44 = vld [vmem:[%s8197_s5 + $0x38] sm:$0xff] }
 0x7ed   :  { %4510 = vrot.lane.b32.xlu1 %v4509_v35, %s5801_s13  ;;  %4523 = vrot.lane.b32.xlu0 %v4489_v25, %s5797_s28  ;;  %v4527_v26 = vrot.slane %v4489_v25, 4  ;;  %v5702_v35 = vpack.c.bf16 %v4949_v23, %v4948_v43  ;;  %v4950_v25 = vld [vmem:[%s8197_s5 + $0x30] sm:$0xff] }
 0x7ee   :  { %v4517_v9 = vrot.slane %v4488_v12, 4  ;;  %4515 = vst.msk [vmem:[#allocation2 + $0x8] sm:$0xf] %vm4494_vm0, %v4488_v12  ;;  %v5705_v12 = vpack.c.bf16 %v4951_v44, %v4950_v25 }
 0x7ef   :  { %5703 = vmatpush3.bf16.msra.mxu1 %v5702_v35 }
 0x7f0   :  { %v5658_v48 = vpop.f32.mrb[48].mxu0  ;;  %5704 = vmatprep.subr.bf16.mxu1 %v5806_v2 }
 0x7f1   :  { %4518 = vrot.lane.b32.xlu0 %v4517_v9, %s5793_s24  ;;  %v4455_v30 = vpop.f32.mrb[49].mxu0 }
 0x7f2   :  { %v5659_v27 = vpop.f32.mrb[50].mxu0 }
 0x7f3   :  { %v4491_v17 = vpack.c.bf16 %v5659_v27, %v5658_v48  ;;  %v4458_v24 = vpop.f32.mrb[51].mxu0  ;;  %5706 = vmatpush3.bf16.msra.mxu1 %v5705_v12 }
 0x7f4   :  { %v4490_v41 = vpack.c.bf16 %v4458_v24, %v4455_v30 }
 0x7f5   :  { %4528 = vrot.lane.b32.xlu0 %v4527_v26, %s5801_s13  ;;  %4540 = vrot.lane.b32.xlu1 %v4491_v17, %s5797_s28  ;;  %v4544_v0 = vrot.slane %v4491_v17, 4 }
 0x7f6   :  { %4532 = vst.msk [vmem:[#allocation2 + $0x10] sm:$0xf] %vm4494_vm0, %v4490_v41  ;;  %v4534_v19 = vrot.slane %v4490_v41, 4 }
 0x7f8   :  { %v5662_v54 = vpop.f32.mrb[52].mxu0 }
 0x7f9   :  { %4535 = vrot.lane.b32.xlu1 %v4534_v19, %s5793_s24  ;;  %v4471_v11 = vpop.f32.mrb[53].mxu0 }
 0x7fa   :  { %v5663_v57 = vpop.f32.mrb[54].mxu0 }
 0x7fb   :  { %v4493_v50 = vpack.c.bf16 %v5663_v57, %v5662_v54  ;;  %v4474_v59 = vpop.f32.mrb[55].mxu0 }
 0x7fc   :  { %v4492_v14 = vpack.c.bf16 %v4474_v59, %v4471_v11 }
 0x7fd   :  { %4545 = vrot.lane.b32.xlu1 %v4544_v0, %s5801_s13  ;;  %4557 = vrot.lane.b32.xlu0 %v4493_v50, %s5797_s28  ;;  %v4561_v4 = vrot.slane %v4493_v50, 4 }
 0x7fe   :  { %4549 = vst.msk [vmem:[#allocation2 + $0x18] sm:$0xf] %vm4494_vm0, %v4492_v14  ;;  %v4551_v20 = vrot.slane %v4492_v14, 4 }
 0x801   :  { %4552 = vrot.lane.b32.xlu0 %v4551_v20, %s5793_s24 }
 0x805   :  { %4562 = vrot.lane.b32.xlu0 %v4561_v4, %s5801_s13 }
 0x857   :  { %v4505_v36 = vpop.permute.xlu1 %4504 }
 0x85b   :  { %v4499_v29 = vpop.permute.xlu1 %4498 }
 0x85c   :  { %4502 = vst.msk [vmem:[#allocation2] sm:$0xf] %vm4501_vm13, %v4499_v29 }
 0x85d   :  { %4508 = vst.msk [vmem:[#allocation2] sm:$0xf] %vm4507_vm15, %v4505_v36 }
 0x85f   :  { %v4511_v10 = vpop.permute.xlu1 %4510  ;;  %v4524_v33 = vpop.permute.xlu0 %4523 }
 0x860   :  { %4514 = vst.msk [vmem:[#allocation2] sm:$0xf] %vm4513_vm3, %v4511_v10 }
 0x863   :  { %v4519_v53 = vpop.permute.xlu0 %4518 }
 0x864   :  { %4521 = vst.msk [vmem:[#allocation2 + $0x8] sm:$0xf] %vm4501_vm13, %v4519_v53 }
 0x865   :  { %4526 = vst.msk [vmem:[#allocation2 + $0x8] sm:$0xf] %vm4507_vm15, %v4524_v33 }
 0x867   :  { %v4529_v55 = vpop.permute.xlu0 %4528  ;;  %v4541_v6 = vpop.permute.xlu1 %4540  ;;  %v4566_v8 = vld [vmem:[#allocation2] sm:$0xf] }
 0x868   :  { %4531 = vst.msk [vmem:[#allocation2 + $0x8] sm:$0xf] %vm4513_vm3, %v4529_v55 }
 0x86b   :  { %v4536_v22 = vpop.permute.xlu1 %4535 }
 0x86c   :  { %4538 = vst.msk [vmem:[#allocation2 + $0x10] sm:$0xf] %vm4501_vm13, %v4536_v22  ;;  %v5320_v22 = vld [vmem:[%s8193_s6 + $0x5] ss:$0 sm:$0xff] }
 0x86d   :  { %4543 = vst.msk [vmem:[#allocation2 + $0x10] sm:$0xf] %vm4507_vm15, %v4541_v6 }
 0x86f   :  { %v4567_v47 = vld [vmem:[#allocation2 + $0x8] sm:$0xf]  ;;  %v4546_v15 = vpop.permute.xlu1 %4545  ;;  %v4558_v32 = vpop.permute.xlu0 %4557 }
 0x870   :  { %4858 = vmatprep.mubr.bf16.mxu0 %v4567_v47  ;;  %4548 = vst.msk [vmem:[#allocation2 + $0x10] sm:$0xf] %vm4513_vm3, %v4546_v15  ;;  %v5321_v47 = vld [vmem:[%s8193_s6 + $0x6] ss:$0 sm:$0xff] }
 0x871   :  { %4859 = vmatmul.mubr.bf16.vlgmr.msra.gmra.mrb[56].mxu0 %v4566_v8  ;;  %v5322_v8 = vld [vmem:[%s8193_s6 + $0x7] ss:$0 sm:$0xff] }
 0x872   :  { %5460 = vmatpush3.bf16.msra.mxu0 %v5768_v49 }
 0x873   :  { %5461 = vmatprep.subr.bf16.mxu0 %v5769_v39  ;;  %v4553_v3 = vpop.permute.xlu0 %4552 }
 0x874   :  { %4555 = vst.msk [vmem:[#allocation2 + $0x18] sm:$0xf] %vm4501_vm13, %v4553_v3 }
 0x875   :  { %4560 = vst.msk [vmem:[#allocation2 + $0x18] sm:$0xf] %vm4507_vm15, %v4558_v32 }
 0x876   :  { %5462 = vmatpush3.bf16.msra.mxu0 %v5770_v38 }
 0x877   :  { %5463 = vmatprep.subr.bf16.mxu0 %v5771_v31  ;;  %v4563_v7 = vpop.permute.xlu0 %4562  ;;  %v4568_v37 = vld [vmem:[#allocation2 + $0x10] sm:$0xf] }
 0x878   :  { %4565 = vst.msk [vmem:[#allocation2 + $0x18] sm:$0xf] %vm4513_vm3, %v4563_v7 }
 0x87a   :  { %5464 = vmatpush3.bf16.msra.mxu0 %v5772_v63 }
 0x87b   :  { %5465 = vmatprep.subr.bf16.mxu0 %v5773_v61 }
 0x87e   :  { %5466 = vmatpush3.bf16.msra.mxu0 %v5774_v21 }
 0x87f   :  { %5467 = vmatprep.subr.bf16.mxu0 %v5775_v45  ;;  %v4569_v56 = vld [vmem:[#allocation2 + $0x18] sm:$0xf] }
 0x880   :  { %4898 = vmatprep.mubr.bf16.mxu0 %v4569_v56 }
 0x882   :  { %5468 = vmatpush3.bf16.msra.mxu0 %v5776_v40 }
 0x883   :  { %5469 = vmatprep.subr.bf16.mxu0 %v5777_v58 }
 0x886   :  { %5470 = vmatpush3.bf16.msra.mxu0 %v5778_v60 }
 0x887   :  { %5471 = vmatprep.subr.bf16.mxu0 %v5779_v46 }
 0x88a   :  { %5472 = vmatpush3.bf16.msra.mxu0 %v5780_v42 }
 0x88b   :  { %5473 = vmatprep.subr.bf16.mxu0 %v5781_v18 }
 0x88e   :  { %5474 = vmatpush3.bf16.msra.mxu0 %v5782_v5 }
 0x891   :  { %4899 = vmatmul.mubr.bf16.vlgmr.msra.gmra.mrb[60].mxu0 %v4568_v37 }
 0x944   :  { %v5453_v9 = vpop.f32.mrb[56].mxu0 }
 0x945   :  { %v5454_v34 = vpop.f32.mrb[57].mxu0 }
 0x946   :  { %v5455_v48 = vadd.f32 %v5454_v34, %v5453_v9  ;;  %v5456_v30 = vpop.f32.mrb[58].mxu0 }
 0x947   :  { %v5457_v27 = vpop.f32.mrb[59].mxu0 }
 0x964   :  { %v5475_v26 = vpop.f32.mrb[60].mxu0 }
 0x965   :  { %v5476_v17 = vpop.f32.mrb[61].mxu0 }
 0x966   :  { %v5477_v24 = vadd.f32 %v5476_v17, %v5475_v26  ;;  %v5478_v41 = vpop.f32.mrb[62].mxu0 }
 0x967   :  { %v5479_v19 = vpop.f32.mrb[63].mxu0 }
 0x968   :  { %v4901_v54 = vadd.f32 %v5477_v24, %v5455_v48 }
 0x96a   :  { %v4909_v0 = vsel %vm4908_vm12, %v4901_v54, 0.0  ;;  %v4917_v11 = vmul.f32 %v4901_v54, %v4901_v54 }
 0x96b   :  { %v4910_v57 = vrot.slane %v4909_v0, 4 }
 0x96c   :  { %v4918_v50 = vsel %vm4908_vm12, %v4917_v11, 0.0 }
 0x96d   :  { %v4911_v59 = vadd.f32 %v4910_v57, %v4909_v0  ;;  %v4919_v13 = vrot.slane %v4918_v50, 4 }
 0x96f   :  { %v4912_v14 = vrot.slane %v4911_v59, 2  ;;  %v4920_v20 = vadd.f32 %v4919_v13, %v4918_v50 }
 0x971   :  { %v4913_v4 = vadd.f32 %v4912_v14, %v4911_v59  ;;  %v4921_v2 = vrot.slane %v4920_v20, 2 }
 0x973   :  { %v4914_v51 = vrot.slane %v4913_v4, 1  ;;  %v4922_v62 = vadd.f32 %v4921_v2, %v4920_v20 }
 0x975   :  { %v4915_v52 = vadd.f32 %v4914_v51, %v4913_v4  ;;  %v4923_v16 = vrot.slane %v4922_v62, 1 }
 0x977   :  { %v4916_v1 = vmul.f32 0.5, %v4915_v52  ;;  %v4924_v28 = vadd.f32 %v4923_v16, %v4922_v62 }
 0x979   :  { %v4925_v36 = vmul.f32 0.5, %v4924_v28  ;;  %v4926_v29 = vmul.f32 %v4916_v1, %v4916_v1  ;;  %v4929_v55 = vsub.f32 %v4901_v54, %v4916_v1 }
 0x97b   :  { %v4927_v10 = vsub.f32 %v4925_v36, %v4926_v29 }
 0x97d   :  { %v4928_v33 = vmax.f32 %v4927_v10, 0.0 }
 0x97f   :  { %v4930_v53 = vadd.f32 1e-05, %v4928_v33 }
 0x981   :  { %5787 = vrsqrt.f32 %v4930_v53 }
 0x98b   :  { %v5788_v6 = vpop.eup %5787 }
 0x98c   :  { %v4932_v49 = vmul.f32 %v5788_v6, %v4929_v55 }
 0x98e   :  { %v4937_v39 = vmul.f32 %v5320_v22, %v4932_v49 }
 0x990   :  { %v4942_v15 = vadd.f32 %v5321_v47, %v4937_v39 }
 0x992   :  { %v4943_v32 = vmax.f32 %v4942_v15, 0.0 }
 0x994   :  { %5681 = vmatmul.mubr.msk.f32.vlgmr.msra.gmra.mrb[64].mxu1 %vm4908_vm12, %v4943_v32 }
 0xa67   :  { %v5026_v38 = vpop.f32.mrb[64].mxu1 }
 0xa68   :  { %v5027_v31 = vadd.f32 %v5322_v8, %v5026_v38  ;;  %v5682_v3 = vpop.f32.mrb[65].mxu1 }
 0xa6a   :  { %5030 = vst [vmem:[%s8198_s7] sm:$0xff] %v5027_v31 }

</bundles_post_ra>
